<compile_context>
chip_gen: v6e
topology: v6e:2x2x1
jax: 0.10.0
libtpu: 0.0.40
codegen_flags: <defaults>
</compile_context>

<pallas_src>
import functools
import numpy as np

import jax
import jax.numpy as jnp
from jax import lax
from jax.experimental import pallas as pl
from jax.experimental.pallas import tpu as pltpu

GROUPS = 4  # BasicConv in NexToU uses groups=4 for the 1x1 conv


# ----------------------------------------------------------------------------
# Fused kernel (per batch element):
#   kNN graph -> max-relative gather -> grouped 1x1 conv + bias + ReLU
#   -> MaxUnpool2d scatter, written lane-dense as (OUT, H*W).
# ----------------------------------------------------------------------------
def fused_mrconv_kernel(x_ref, ind_ref, w_ref, b_ref, s_ref, o_ref, *, k):
    x = x_ref[0]                                   # (N, C) pooled, UN-normalized
    n, c = x.shape
    out_ch = o_ref.shape[1]
    hw = o_ref.shape[2]

    # --- DenseDilatedKnnGraph (dilation=1, stochastic=False) -----------------
    # torch: F.normalize(x, p=2, dim=channel), then k smallest pairwise sq-dist.
    # For unit vectors dist = 2 - 2*sim, so ranking by max cosine similarity is
    # identical (saves one MXU dot and an (N,N) add/broadcast pass).
    nrm = jnp.sqrt(jnp.sum(x * x, axis=-1, keepdims=True))
    xn = x / jnp.maximum(nrm, 1e-12)
    sim = lax.dot_general(xn, xn, (((1,), (1,)), ((), ())),
                          preferred_element_type=jnp.float32)       # (N, N)

    col = lax.broadcasted_iota(jnp.int32, (n, n), 1)
    d = sim
    sel_list = []
    for _ in range(k):                             # iterative k-largest, lowest col on ties
        m = jnp.max(d, axis=-1, keepdims=True)                      # (N, 1)
        sel = jnp.min(jnp.where(d == m, col, n), axis=-1, keepdims=True)
        sel_list.append(sel)
        d = jnp.where(col == sel, -jnp.inf, d)

    # --- MRConv gather: ONE stacked one-hot matmul instead of k small ones ---
    idx_stack = jnp.concatenate(sel_list, axis=0)                   # (k*N, 1)
    col_kn = lax.broadcasted_iota(jnp.int32, (k * n, n), 1)
    onehot = (col_kn == idx_stack).astype(jnp.float32)              # (k*N, N)
    gathered = jnp.dot(onehot, x, preferred_element_type=jnp.float32)  # (k*N, C)

    neigh_max = gathered[0:n, :]                   # max over the k neighbors
    for e in range(1, k):
        neigh_max = jnp.maximum(neigh_max, gathered[e * n:(e + 1) * n, :])
    max_rel = neigh_max - x                        # (N, C) max-relative feature

    feat = jnp.concatenate([x, max_rel], axis=-1)  # (N, 2C), columns [x..., xj...]

    # --- BasicConv: grouped 1x1 conv (weight pre-expanded & column-permuted in
    # the wrapper) + bias + ReLU.  Computed channel-major (OUT, N) so that the
    # unpool epilogue / output store stay lane-dense.
    y = lax.dot_general(w_ref[...], feat, (((1,), (1,)), ((), ())),
                        preferred_element_type=jnp.float32)         # (OUT, N)
    y = jnp.maximum(y + b_ref[...], 0.0)

    # --- MaxUnpool2d epilogue: upsample pooled values and pool indices with
    # the constant (N, H*W) scatter matrix S, keep only the argmax positions.
    s = s_ref[...]                                                   # (N, HW)
    y_up = jnp.dot(y, s, preferred_element_type=jnp.float32)         # (OUT, HW)
    ind_up = jnp.dot(ind_ref[0], s, preferred_element_type=jnp.float32)
    pos = lax.broadcasted_iota(jnp.int32, (out_ch, hw), 1).astype(jnp.float32)
    o_ref[0] = jnp.where(jnp.abs(ind_up - pos) < 0.5, y_up, 0.0)


def fused_mrconv(xt, ind_f, w_perm, bias_col, scatter, *, k):
    B, N, C = xt.shape
    OUT = w_perm.shape[0]
    HW = scatter.shape[1]
    return pl.pallas_call(
        functools.partial(fused_mrconv_kernel, k=k),
        out_shape=jax.ShapeDtypeStruct((B, OUT, HW), jnp.float32),
        grid=(B,),
        in_specs=[
            pl.BlockSpec((1, N, C), lambda b: (b, 0, 0)),        # pooled features
            pl.BlockSpec((1, OUT, N), lambda b: (b, 0, 0)),      # pool argmax idx (f32)
            pl.BlockSpec((OUT, 2 * C), lambda b: (0, 0)),        # conv weight (dense)
            pl.BlockSpec((OUT, 1), lambda b: (0, 0)),            # bias
            pl.BlockSpec((N, HW), lambda b: (0, 0)),             # constant unpool scatter
        ],
        out_specs=pl.BlockSpec((1, OUT, HW), lambda b: (b, 0, 0)),  # lane-dense (256)
        compiler_params=pltpu.CompilerParams(
            dimension_semantics=("parallel",)),    # 2 TCs on v7x; harmless on v5e/v6e
    )(xt, ind_f, w_perm, bias_col, scatter)


# ----------------------------------------------------------------------------
# Plain-JAX / host glue
# ----------------------------------------------------------------------------
def compute_pool_size(img_shape, img_min_shape):
    n = 1
    for h in img_shape:
        n = n * h
    n_small = 1
    for h_small in img_min_shape:
        n_small = n_small * h_small * 4
    if n > n_small:
        return [2 if h % 2 == 0 else 1 for h in img_shape]
    return [1 for _ in img_shape]


def max_pool2d_with_indices(x, pool):
    # nn.MaxPool2d(pool, stride=pool, return_indices=True) — index bookkeeping.
    # TODO(synk): the strided 2x2 window argmax is kept in plain-JAX glue; it has
    # no clean vector form at this in-kernel layout and is a few KB of work.
    B, C, H, W = x.shape
    ph, pw = pool
    Hp, Wp = H // ph, W // pw
    xr = x.reshape(B, C, Hp, ph, Wp, pw).transpose(0, 1, 2, 4, 3, 5)
    xr = xr.reshape(B, C, Hp, Wp, ph * pw)
    vals = jnp.max(xr, axis=-1)
    arg = jnp.argmax(xr, axis=-1).astype(jnp.int32)
    dh, dw = arg // pw, arg % pw
    hh = jnp.arange(Hp, dtype=jnp.int32)[None, None, :, None] * ph + dh
    ww = jnp.arange(Wp, dtype=jnp.int32)[None, None, None, :] * pw + dw
    indices = hh * W + ww                                  # flat index in the (H,W) plane
    return vals, indices


def expand_grouped_weight(w, groups):
    # torch Conv2d(2C, OUT, 1, groups=4) weight (OUT, 2C/groups) -> dense (OUT, 2C)
    out_ch, ipg = w.shape
    c2 = ipg * groups
    opg = out_ch // groups
    wf = np.zeros((out_ch, c2), np.float32)
    w_np = np.asarray(w)
    for o in range(out_ch):
        g = o // opg
        wf[o, g * ipg:(g + 1) * ipg] = w_np[o]
    return jnp.asarray(wf)


def make_unpool_scatter(H, W, ph, pw):
    # Constant (N, H*W) matrix mapping pooled cell q -> every output position it
    # covers (exactly one 1 per column).  Data-independent, built on host.
    Hp, Wp = H // ph, W // pw
    N, HW = Hp * Wp, H * W
    p = np.arange(HW)
    h, w_ = p // W, p % W
    q = (h // ph) * Wp + (w_ // pw)
    S = np.zeros((N, HW), np.float32)
    S[q, p] = 1.0
    return jnp.asarray(S)


def pool_dy_graph_conv_forward(x, w, bias, *, k, img_shape, img_min_shape):
    """x: (B, C, H, W) NCHW float32.  Returns (B, 2C, H, W)."""
    B, C, H, W = x.shape
    pool = compute_pool_size(img_shape, img_min_shape)
    ph, pw = pool
    Hp, Wp = H // ph, W // pw
    N = Hp * Wp
    OUT = bias.shape[0]

    xp, ind = max_pool2d_with_indices(x, (ph, pw))          # (B,C,Hp,Wp) each
    xt = xp.reshape(B, C, N).transpose(0, 2, 1)             # node-major (B,N,C), ~2 KB
    # MaxUnpool uses indices_cat = cat([ind, ind]) over the doubled channels.
    ind_f = jnp.concatenate([ind, ind], axis=1).reshape(B, OUT, N).astype(jnp.float32)

    w_full = expand_grouped_weight(w, GROUPS)               # (OUT, 2C) block-diagonal
    # torch channel order after cat/reshape is interleaved [x0, xj0, x1, xj1, ...];
    # the kernel feeds [x..., xj...], so permute weight columns accordingly.
    perm = np.array([2 * c for c in range(C)] + [2 * c + 1 for c in range(C)])
    w_perm = w_full[:, perm]
    bias_col = bias.reshape(OUT, 1).astype(jnp.float32)
    scatter = make_unpool_scatter(H, W, ph, pw)             # (N, H*W) constant

    yflat = fused_mrconv(xt, ind_f, w_perm, bias_col, scatter, k=k)  # (B, OUT, H*W)
    return yflat.reshape(B, OUT, H, W)                      # free reshape (no transpose)


# ----------------------------------------------------------------------------
# Pure-JAX reference (mirrors the torch semantics) for verification
# ----------------------------------------------------------------------------
def reference_forward(x, w, bias, *, k, img_shape, img_min_shape):
    B, C, H, W = x.shape
    pool = compute_pool_size(img_shape, img_min_shape)
    ph, pw = pool
    Hp, Wp = H // ph, W // pw
    N = Hp * Wp
    xp, ind = max_pool2d_with_indices(x, (ph, pw))
    xf = xp.reshape(B, C, N)
    # DenseDilatedKnnGraph: k-NN of L2-normalized features.  For unit vectors
    # dist = 2 - 2*sim, so topk(sim) == topk(-dist).
    norm = jnp.sqrt(jnp.sum(xf * xf, axis=1, keepdims=True))
    xn = xf / jnp.maximum(norm, 1e-12)
    xt = jnp.transpose(xn, (0, 2, 1))
    inner = jnp.einsum('bnc,bmc->bnm', xt, xt)
    _, nn_idx = lax.top_k(inner, k)                         # (B,N,k)
    # MRConv: max-relative feature + grouped 1x1 conv + bias + ReLU
    x_j = jax.vmap(lambda f, i: f[:, i])(xf, nn_idx)        # (B,C,N,k)
    max_rel = jnp.max(x_j - xf[:, :, :, None], axis=-1)     # (B,C,N)
    x_cat = jnp.stack([xf, max_rel], axis=2).reshape(B, 2 * C, N)
    w_full = expand_grouped_weight(w, GROUPS)
    y = jnp.einsum('oc,bcn->bon', w_full, x_cat) + bias[None, :, None]
    y = jnp.maximum(y, 0.0)
    OUT = y.shape[1]
    # MaxUnpool2d
    idxc = jnp.concatenate([ind, ind], axis=1).reshape(B, OUT, N)
    flat = jnp.zeros((B, OUT, H * W), jnp.float32)
    bi = jnp.arange(B)[:, None, None]
    ci = jnp.arange(OUT)[None, :, None]
    flat = flat.at[bi, ci, idxc].set(y)
    return flat.reshape(B, OUT, H, W)


# ----------------------------------------------------------------------------
if __name__ == "__main__":
    B, C, H, W = 2, 4, 16, 16
    out_channels = 2 * C                                    # required by the unpool path
    k = 9
    img_shape = (H, W)
    img_min_shape = (2, 2)

    key = jax.random.PRNGKey(0)
    kx, kw, kb = jax.random.split(key, 3)
    x = jax.random.normal(kx, (B, C, H, W), dtype=jnp.float32)
    # BasicConv: Conv2d(2C, OUT, kernel=1, groups=4, bias=True)
    # weight shape (OUT, 2C/groups, 1, 1) -> stored here as (OUT, 2C/groups)
    w = 0.3 * jax.random.normal(kw, (out_channels, 2 * C // GROUPS), dtype=jnp.float32)
    bias = 0.1 * jax.random.normal(kb, (out_channels,), dtype=jnp.float32)

    out = pool_dy_graph_conv_forward(x, w, bias, k=k,
                                     img_shape=img_shape,
                                     img_min_shape=img_min_shape)
    out = jax.block_until_ready(out)

    ref = reference_forward(x, w, bias, k=k,
                            img_shape=img_shape, img_min_shape=img_min_shape)
    np.testing.assert_allclose(np.asarray(out), np.asarray(ref),
                               rtol=1e-4, atol=1e-4)
    assert out.shape == (B, out_channels, H, W)
    print("KERNEL_OK")
</pallas_src>

<mosaic_0001>
module attributes {stable_mosaic.version = 11 : i64} {
  func.func @fused_mrconv_kernel(%arg0: i32, %arg1: memref<1x64x4xf32, #tpu.memory_space<vmem>>, %arg2: memref<1x8x64xf32, #tpu.memory_space<vmem>>, %arg3: memref<8x8xf32, #tpu.memory_space<vmem>>, %arg4: memref<8x1xf32, #tpu.memory_space<vmem>>, %arg5: memref<64x256xf32, #tpu.memory_space<vmem>>, %arg6: memref<1x8x256xf32, #tpu.memory_space<vmem>>) attributes {dimension_semantics = [#tpu.dimension_semantics<parallel>], iteration_bounds = array<i64: 2>, scalar_prefetch = 0 : i64, scratch_operands = 0 : i64, tpu.core_type = #tpu.core_type<tc>, window_params = [{transform_indices = @transform_0, window_bounds = array<i64: 1, 64, 4>}, {transform_indices = @transform_1, window_bounds = array<i64: 1, 8, 64>}, {pipeline_mode = #tpu.pipeline_mode<synchronous>, transform_indices = @transform_2, window_bounds = array<i64: 8, 8>}, {pipeline_mode = #tpu.pipeline_mode<synchronous>, transform_indices = @transform_3, window_bounds = array<i64: 8, 1>}, {pipeline_mode = #tpu.pipeline_mode<synchronous>, transform_indices = @transform_4, window_bounds = array<i64: 64, 256>}, {transform_indices = @transform_5, window_bounds = array<i64: 1, 8, 256>}]} {
    %c0 = arith.constant 0 : index
    %c0_0 = arith.constant 0 : index
    %c0_1 = arith.constant 0 : index
    %0 = vector.load %arg1[%c0, %c0_0, %c0_1] : memref<1x64x4xf32, #tpu.memory_space<vmem>>, vector<1x64x4xf32>
    %1 = vector.shape_cast %0 : vector<1x64x4xf32> to vector<64x4xf32>
    %2 = arith.mulf %1, %1 : vector<64x4xf32>
    %cst = arith.constant dense<0.000000e+00> : vector<64xf32>
    %3 = vector.multi_reduction <add>, %2, %cst [1] : vector<64x4xf32> to vector<64xf32>
    %4 = vector.shape_cast %3 : vector<64xf32> to vector<64x1xf32>
    %5 = math.sqrt %4 : vector<64x1xf32>
    %cst_2 = arith.constant 9.99999996E-13 : f32
    %6 = vector.broadcast %cst_2 : f32 to vector<64x1xf32>
    %7 = arith.maximumf %5, %6 : vector<64x1xf32>
    %8 = vector.broadcast %7 : vector<64x1xf32> to vector<64x4xf32>
    %9 = arith.divf %1, %8 : vector<64x4xf32>
    %cst_3 = arith.constant dense<0.000000e+00> : vector<64x64xf32>
    %10 = tpu.matmul %9, %9, %cst_3 {dimension_numbers = #tpu.dot_dimension_numbers<[1], [1], [0], [0], [0, 0, 1, 0], [], []>} : vector<64x4xf32>, vector<64x4xf32>, vector<64x64xf32> -> vector<64x64xf32>
    %11 = tpu.iota {dimensions = array<i32: 1>} : vector<64x64xi32>
    %cst_4 = arith.constant dense<0xFF800000> : vector<64xf32>
    %12 = vector.multi_reduction <maximumf>, %10, %cst_4 [1] : vector<64x64xf32> to vector<64xf32>
    %13 = vector.shape_cast %12 : vector<64xf32> to vector<64x1xf32>
    %14 = vector.broadcast %13 : vector<64x1xf32> to vector<64x64xf32>
    %15 = arith.cmpf oeq, %10, %14 : vector<64x64xf32>
    %c64_i32 = arith.constant 64 : i32
    %16 = vector.broadcast %c64_i32 : i32 to vector<64x64xi32>
    %17 = arith.select %15, %11, %16 : vector<64x64xi1>, vector<64x64xi32>
    %cst_5 = arith.constant dense<2147483647> : vector<64xi32>
    %18 = vector.multi_reduction <minsi>, %17, %cst_5 [1] : vector<64x64xi32> to vector<64xi32>
    %19 = vector.shape_cast %18 : vector<64xi32> to vector<64x1xi32>
    %20 = vector.broadcast %19 : vector<64x1xi32> to vector<64x64xi32>
    %21 = arith.cmpi eq, %11, %20 : vector<64x64xi32>
    %cst_6 = arith.constant 0xFF800000 : f32
    %22 = vector.broadcast %cst_6 : f32 to vector<64x64xf32>
    %23 = arith.select %21, %22, %10 : vector<64x64xi1>, vector<64x64xf32>
    %cst_7 = arith.constant dense<0xFF800000> : vector<64xf32>
    %24 = vector.multi_reduction <maximumf>, %23, %cst_7 [1] : vector<64x64xf32> to vector<64xf32>
    %25 = vector.shape_cast %24 : vector<64xf32> to vector<64x1xf32>
    %26 = vector.broadcast %25 : vector<64x1xf32> to vector<64x64xf32>
    %27 = arith.cmpf oeq, %23, %26 : vector<64x64xf32>
    %c64_i32_8 = arith.constant 64 : i32
    %28 = vector.broadcast %c64_i32_8 : i32 to vector<64x64xi32>
    %29 = arith.select %27, %11, %28 : vector<64x64xi1>, vector<64x64xi32>
    %cst_9 = arith.constant dense<2147483647> : vector<64xi32>
    %30 = vector.multi_reduction <minsi>, %29, %cst_9 [1] : vector<64x64xi32> to vector<64xi32>
    %31 = vector.shape_cast %30 : vector<64xi32> to vector<64x1xi32>
    %32 = vector.broadcast %31 : vector<64x1xi32> to vector<64x64xi32>
    %33 = arith.cmpi eq, %11, %32 : vector<64x64xi32>
    %cst_10 = arith.constant 0xFF800000 : f32
    %34 = vector.broadcast %cst_10 : f32 to vector<64x64xf32>
    %35 = arith.select %33, %34, %23 : vector<64x64xi1>, vector<64x64xf32>
    %cst_11 = arith.constant dense<0xFF800000> : vector<64xf32>
    %36 = vector.multi_reduction <maximumf>, %35, %cst_11 [1] : vector<64x64xf32> to vector<64xf32>
    %37 = vector.shape_cast %36 : vector<64xf32> to vector<64x1xf32>
    %38 = vector.broadcast %37 : vector<64x1xf32> to vector<64x64xf32>
    %39 = arith.cmpf oeq, %35, %38 : vector<64x64xf32>
    %c64_i32_12 = arith.constant 64 : i32
    %40 = vector.broadcast %c64_i32_12 : i32 to vector<64x64xi32>
    %41 = arith.select %39, %11, %40 : vector<64x64xi1>, vector<64x64xi32>
    %cst_13 = arith.constant dense<2147483647> : vector<64xi32>
    %42 = vector.multi_reduction <minsi>, %41, %cst_13 [1] : vector<64x64xi32> to vector<64xi32>
    %43 = vector.shape_cast %42 : vector<64xi32> to vector<64x1xi32>
    %44 = vector.broadcast %43 : vector<64x1xi32> to vector<64x64xi32>
    %45 = arith.cmpi eq, %11, %44 : vector<64x64xi32>
    %cst_14 = arith.constant 0xFF800000 : f32
    %46 = vector.broadcast %cst_14 : f32 to vector<64x64xf32>
    %47 = arith.select %45, %46, %35 : vector<64x64xi1>, vector<64x64xf32>
    %cst_15 = arith.constant dense<0xFF800000> : vector<64xf32>
    %48 = vector.multi_reduction <maximumf>, %47, %cst_15 [1] : vector<64x64xf32> to vector<64xf32>
    %49 = vector.shape_cast %48 : vector<64xf32> to vector<64x1xf32>
    %50 = vector.broadcast %49 : vector<64x1xf32> to vector<64x64xf32>
    %51 = arith.cmpf oeq, %47, %50 : vector<64x64xf32>
    %c64_i32_16 = arith.constant 64 : i32
    %52 = vector.broadcast %c64_i32_16 : i32 to vector<64x64xi32>
    %53 = arith.select %51, %11, %52 : vector<64x64xi1>, vector<64x64xi32>
    %cst_17 = arith.constant dense<2147483647> : vector<64xi32>
    %54 = vector.multi_reduction <minsi>, %53, %cst_17 [1] : vector<64x64xi32> to vector<64xi32>
    %55 = vector.shape_cast %54 : vector<64xi32> to vector<64x1xi32>
    %56 = vector.broadcast %55 : vector<64x1xi32> to vector<64x64xi32>
    %57 = arith.cmpi eq, %11, %56 : vector<64x64xi32>
    %cst_18 = arith.constant 0xFF800000 : f32
    %58 = vector.broadcast %cst_18 : f32 to vector<64x64xf32>
    %59 = arith.select %57, %58, %47 : vector<64x64xi1>, vector<64x64xf32>
    %cst_19 = arith.constant dense<0xFF800000> : vector<64xf32>
    %60 = vector.multi_reduction <maximumf>, %59, %cst_19 [1] : vector<64x64xf32> to vector<64xf32>
    %61 = vector.shape_cast %60 : vector<64xf32> to vector<64x1xf32>
    %62 = vector.broadcast %61 : vector<64x1xf32> to vector<64x64xf32>
    %63 = arith.cmpf oeq, %59, %62 : vector<64x64xf32>
    %c64_i32_20 = arith.constant 64 : i32
    %64 = vector.broadcast %c64_i32_20 : i32 to vector<64x64xi32>
    %65 = arith.select %63, %11, %64 : vector<64x64xi1>, vector<64x64xi32>
    %cst_21 = arith.constant dense<2147483647> : vector<64xi32>
    %66 = vector.multi_reduction <minsi>, %65, %cst_21 [1] : vector<64x64xi32> to vector<64xi32>
    %67 = vector.shape_cast %66 : vector<64xi32> to vector<64x1xi32>
    %68 = vector.broadcast %67 : vector<64x1xi32> to vector<64x64xi32>
    %69 = arith.cmpi eq, %11, %68 : vector<64x64xi32>
    %cst_22 = arith.constant 0xFF800000 : f32
    %70 = vector.broadcast %cst_22 : f32 to vector<64x64xf32>
    %71 = arith.select %69, %70, %59 : vector<64x64xi1>, vector<64x64xf32>
    %cst_23 = arith.constant dense<0xFF800000> : vector<64xf32>
    %72 = vector.multi_reduction <maximumf>, %71, %cst_23 [1] : vector<64x64xf32> to vector<64xf32>
    %73 = vector.shape_cast %72 : vector<64xf32> to vector<64x1xf32>
    %74 = vector.broadcast %73 : vector<64x1xf32> to vector<64x64xf32>
    %75 = arith.cmpf oeq, %71, %74 : vector<64x64xf32>
    %c64_i32_24 = arith.constant 64 : i32
    %76 = vector.broadcast %c64_i32_24 : i32 to vector<64x64xi32>
    %77 = arith.select %75, %11, %76 : vector<64x64xi1>, vector<64x64xi32>
    %cst_25 = arith.constant dense<2147483647> : vector<64xi32>
    %78 = vector.multi_reduction <minsi>, %77, %cst_25 [1] : vector<64x64xi32> to vector<64xi32>
    %79 = vector.shape_cast %78 : vector<64xi32> to vector<64x1xi32>
    %80 = vector.broadcast %79 : vector<64x1xi32> to vector<64x64xi32>
    %81 = arith.cmpi eq, %11, %80 : vector<64x64xi32>
    %cst_26 = arith.constant 0xFF800000 : f32
    %82 = vector.broadcast %cst_26 : f32 to vector<64x64xf32>
    %83 = arith.select %81, %82, %71 : vector<64x64xi1>, vector<64x64xf32>
    %cst_27 = arith.constant dense<0xFF800000> : vector<64xf32>
    %84 = vector.multi_reduction <maximumf>, %83, %cst_27 [1] : vector<64x64xf32> to vector<64xf32>
    %85 = vector.shape_cast %84 : vector<64xf32> to vector<64x1xf32>
    %86 = vector.broadcast %85 : vector<64x1xf32> to vector<64x64xf32>
    %87 = arith.cmpf oeq, %83, %86 : vector<64x64xf32>
    %c64_i32_28 = arith.constant 64 : i32
    %88 = vector.broadcast %c64_i32_28 : i32 to vector<64x64xi32>
    %89 = arith.select %87, %11, %88 : vector<64x64xi1>, vector<64x64xi32>
    %cst_29 = arith.constant dense<2147483647> : vector<64xi32>
    %90 = vector.multi_reduction <minsi>, %89, %cst_29 [1] : vector<64x64xi32> to vector<64xi32>
    %91 = vector.shape_cast %90 : vector<64xi32> to vector<64x1xi32>
    %92 = vector.broadcast %91 : vector<64x1xi32> to vector<64x64xi32>
    %93 = arith.cmpi eq, %11, %92 : vector<64x64xi32>
    %cst_30 = arith.constant 0xFF800000 : f32
    %94 = vector.broadcast %cst_30 : f32 to vector<64x64xf32>
    %95 = arith.select %93, %94, %83 : vector<64x64xi1>, vector<64x64xf32>
    %cst_31 = arith.constant dense<0xFF800000> : vector<64xf32>
    %96 = vector.multi_reduction <maximumf>, %95, %cst_31 [1] : vector<64x64xf32> to vector<64xf32>
    %97 = vector.shape_cast %96 : vector<64xf32> to vector<64x1xf32>
    %98 = vector.broadcast %97 : vector<64x1xf32> to vector<64x64xf32>
    %99 = arith.cmpf oeq, %95, %98 : vector<64x64xf32>
    %c64_i32_32 = arith.constant 64 : i32
    %100 = vector.broadcast %c64_i32_32 : i32 to vector<64x64xi32>
    %101 = arith.select %99, %11, %100 : vector<64x64xi1>, vector<64x64xi32>
    %cst_33 = arith.constant dense<2147483647> : vector<64xi32>
    %102 = vector.multi_reduction <minsi>, %101, %cst_33 [1] : vector<64x64xi32> to vector<64xi32>
    %103 = vector.shape_cast %102 : vector<64xi32> to vector<64x1xi32>
    %104 = vector.broadcast %103 : vector<64x1xi32> to vector<64x64xi32>
    %105 = arith.cmpi eq, %11, %104 : vector<64x64xi32>
    %cst_34 = arith.constant 0xFF800000 : f32
    %106 = vector.broadcast %cst_34 : f32 to vector<64x64xf32>
    %107 = arith.select %105, %106, %95 : vector<64x64xi1>, vector<64x64xf32>
    %cst_35 = arith.constant dense<0xFF800000> : vector<64xf32>
    %108 = vector.multi_reduction <maximumf>, %107, %cst_35 [1] : vector<64x64xf32> to vector<64xf32>
    %109 = vector.shape_cast %108 : vector<64xf32> to vector<64x1xf32>
    %110 = vector.broadcast %109 : vector<64x1xf32> to vector<64x64xf32>
    %111 = arith.cmpf oeq, %107, %110 : vector<64x64xf32>
    %c64_i32_36 = arith.constant 64 : i32
    %112 = vector.broadcast %c64_i32_36 : i32 to vector<64x64xi32>
    %113 = arith.select %111, %11, %112 : vector<64x64xi1>, vector<64x64xi32>
    %cst_37 = arith.constant dense<2147483647> : vector<64xi32>
    %114 = vector.multi_reduction <minsi>, %113, %cst_37 [1] : vector<64x64xi32> to vector<64xi32>
    %115 = vector.shape_cast %114 : vector<64xi32> to vector<64x1xi32>
    %116 = tpu.concatenate %19, %31, %43, %55, %67, %79, %91, %103, %115 in 0 : vector<64x1xi32>, vector<64x1xi32>, vector<64x1xi32>, vector<64x1xi32>, vector<64x1xi32>, vector<64x1xi32>, vector<64x1xi32>, vector<64x1xi32>, vector<64x1xi32> -> vector<576x1xi32>
    %117 = tpu.iota {dimensions = array<i32: 1>} : vector<576x64xi32>
    %118 = vector.broadcast %116 : vector<576x1xi32> to vector<576x64xi32>
    %119 = arith.cmpi eq, %117, %118 : vector<576x64xi32>
    %120 = arith.extui %119 : vector<576x64xi1> to vector<576x64xi32>
    %121 = arith.sitofp %120 : vector<576x64xi32> to vector<576x64xf32>
    %cst_38 = arith.constant dense<0.000000e+00> : vector<576x4xf32>
    %122 = tpu.matmul %121, %1, %cst_38 {dimension_numbers = #tpu.dot_dimension_numbers<[1], [0], [0], [1], [0, 0, 1, 1], [], []>} : vector<576x64xf32>, vector<64x4xf32>, vector<576x4xf32> -> vector<576x4xf32>
    %123 = vector.extract_strided_slice %122 {offsets = [0, 0], sizes = [64, 4], strides = [1, 1]} : vector<576x4xf32> to vector<64x4xf32>
    %124 = vector.extract_strided_slice %122 {offsets = [64, 0], sizes = [64, 4], strides = [1, 1]} : vector<576x4xf32> to vector<64x4xf32>
    %125 = arith.maximumf %123, %124 : vector<64x4xf32>
    %126 = vector.extract_strided_slice %122 {offsets = [128, 0], sizes = [64, 4], strides = [1, 1]} : vector<576x4xf32> to vector<64x4xf32>
    %127 = arith.maximumf %125, %126 : vector<64x4xf32>
    %128 = vector.extract_strided_slice %122 {offsets = [192, 0], sizes = [64, 4], strides = [1, 1]} : vector<576x4xf32> to vector<64x4xf32>
    %129 = arith.maximumf %127, %128 : vector<64x4xf32>
    %130 = vector.extract_strided_slice %122 {offsets = [256, 0], sizes = [64, 4], strides = [1, 1]} : vector<576x4xf32> to vector<64x4xf32>
    %131 = arith.maximumf %129, %130 : vector<64x4xf32>
    %132 = vector.extract_strided_slice %122 {offsets = [320, 0], sizes = [64, 4], strides = [1, 1]} : vector<576x4xf32> to vector<64x4xf32>
    %133 = arith.maximumf %131, %132 : vector<64x4xf32>
    %134 = vector.extract_strided_slice %122 {offsets = [384, 0], sizes = [64, 4], strides = [1, 1]} : vector<576x4xf32> to vector<64x4xf32>
    %135 = arith.maximumf %133, %134 : vector<64x4xf32>
    %136 = vector.extract_strided_slice %122 {offsets = [448, 0], sizes = [64, 4], strides = [1, 1]} : vector<576x4xf32> to vector<64x4xf32>
    %137 = arith.maximumf %135, %136 : vector<64x4xf32>
    %138 = vector.extract_strided_slice %122 {offsets = [512, 0], sizes = [64, 4], strides = [1, 1]} : vector<576x4xf32> to vector<64x4xf32>
    %139 = arith.maximumf %137, %138 : vector<64x4xf32>
    %140 = arith.subf %139, %1 : vector<64x4xf32>
    %141 = tpu.concatenate %1, %140 in 1 : vector<64x4xf32>, vector<64x4xf32> -> vector<64x8xf32>
    %c0_39 = arith.constant 0 : index
    %c0_40 = arith.constant 0 : index
    %142 = vector.load %arg3[%c0_39, %c0_40] : memref<8x8xf32, #tpu.memory_space<vmem>>, vector<8x8xf32>
    %cst_41 = arith.constant dense<0.000000e+00> : vector<8x64xf32>
    %143 = tpu.matmul %142, %141, %cst_41 {dimension_numbers = #tpu.dot_dimension_numbers<[1], [1], [0], [0], [0, 0, 1, 0], [], []>} : vector<8x8xf32>, vector<64x8xf32>, vector<8x64xf32> -> vector<8x64xf32>
    %c0_42 = arith.constant 0 : index
    %c0_43 = arith.constant 0 : index
    %144 = vector.load %arg4[%c0_42, %c0_43] : memref<8x1xf32, #tpu.memory_space<vmem>>, vector<8x1xf32>
    %145 = vector.broadcast %144 : vector<8x1xf32> to vector<8x64xf32>
    %146 = arith.addf %143, %145 : vector<8x64xf32>
    %cst_44 = arith.constant 0.000000e+00 : f32
    %147 = vector.broadcast %cst_44 : f32 to vector<8x64xf32>
    %148 = arith.maximumf %146, %147 : vector<8x64xf32>
    %c0_45 = arith.constant 0 : index
    %c0_46 = arith.constant 0 : index
    %149 = vector.load %arg5[%c0_45, %c0_46] : memref<64x256xf32, #tpu.memory_space<vmem>>, vector<64x256xf32>
    %cst_47 = arith.constant dense<0.000000e+00> : vector<8x256xf32>
    %150 = tpu.matmul %148, %149, %cst_47 {dimension_numbers = #tpu.dot_dimension_numbers<[1], [0], [0], [1], [0, 0, 1, 1], [], []>} : vector<8x64xf32>, vector<64x256xf32>, vector<8x256xf32> -> vector<8x256xf32>
    %c0_48 = arith.constant 0 : index
    %c0_49 = arith.constant 0 : index
    %c0_50 = arith.constant 0 : index
    %151 = vector.load %arg2[%c0_48, %c0_49, %c0_50] : memref<1x8x64xf32, #tpu.memory_space<vmem>>, vector<1x8x64xf32>
    %152 = vector.shape_cast %151 : vector<1x8x64xf32> to vector<8x64xf32>
    %cst_51 = arith.constant dense<0.000000e+00> : vector<8x256xf32>
    %153 = tpu.matmul %152, %149, %cst_51 {dimension_numbers = #tpu.dot_dimension_numbers<[1], [0], [0], [1], [0, 0, 1, 1], [], []>} : vector<8x64xf32>, vector<64x256xf32>, vector<8x256xf32> -> vector<8x256xf32>
    %154 = tpu.iota {dimensions = array<i32: 1>} : vector<8x256xi32>
    %155 = arith.sitofp %154 : vector<8x256xi32> to vector<8x256xf32>
    %156 = arith.subf %153, %155 : vector<8x256xf32>
    %157 = math.absf %156 : vector<8x256xf32>
    %cst_52 = arith.constant 5.000000e-01 : f32
    %158 = vector.broadcast %cst_52 : f32 to vector<8x256xf32>
    %159 = arith.cmpf olt, %157, %158 : vector<8x256xf32>
    %cst_53 = arith.constant 0.000000e+00 : f32
    %160 = vector.broadcast %cst_53 : f32 to vector<8x256xf32>
    %161 = arith.select %159, %150, %160 : vector<8x256xi1>, vector<8x256xf32>
    %c0_54 = arith.constant 0 : index
    %c0_55 = arith.constant 0 : index
    %c0_56 = arith.constant 0 : index
    %162 = vector.load %arg6[%c0_54, %c0_55, %c0_56] : memref<1x8x256xf32, #tpu.memory_space<vmem>>, vector<1x8x256xf32>
    %163 = vector.shape_cast %162 : vector<1x8x256xf32> to vector<8x256xf32>
    %164 = vector.shape_cast %161 : vector<8x256xf32> to vector<1x8x256xf32>
    tpu.vector_store %arg6[%c0_54, %c0_55, %c0_56], %164 {strides = array<i32>} : memref<1x8x256xf32, #tpu.memory_space<vmem>>, vector<1x8x256xf32>,
    return
  }
  func.func @transform_0(%arg0: i32) -> (i32, i32, i32) {
    %c0_i32 = arith.constant 0 : i32
    %c0_i32_0 = arith.constant 0 : i32
    %c0_i32_1 = arith.constant 0 : i32
    return %arg0, %c0_i32, %c0_i32_0 : i32, i32, i32
  }
  func.func @transform_1(%arg0: i32) -> (i32, i32, i32) {
    %c0_i32 = arith.constant 0 : i32
    %c0_i32_0 = arith.constant 0 : i32
    %c0_i32_1 = arith.constant 0 : i32
    return %arg0, %c0_i32, %c0_i32_0 : i32, i32, i32
  }
  func.func @transform_2(%arg0: i32) -> (i32, i32) {
    %c0_i32 = arith.constant 0 : i32
    %c0_i32_0 = arith.constant 0 : i32
    %c0_i32_1 = arith.constant 0 : i32
    return %c0_i32, %c0_i32_0 : i32, i32
  }
  func.func @transform_3(%arg0: i32) -> (i32, i32) {
    %c0_i32 = arith.constant 0 : i32
    %c0_i32_0 = arith.constant 0 : i32
    %c0_i32_1 = arith.constant 0 : i32
    return %c0_i32, %c0_i32_0 : i32, i32
  }
  func.func @transform_4(%arg0: i32) -> (i32, i32) {
    %c0_i32 = arith.constant 0 : i32
    %c0_i32_0 = arith.constant 0 : i32
    %c0_i32_1 = arith.constant 0 : i32
    return %c0_i32, %c0_i32_0 : i32, i32
  }
  func.func @transform_5(%arg0: i32) -> (i32, i32, i32) {
    %c0_i32 = arith.constant 0 : i32
    %c0_i32_0 = arith.constant 0 : i32
    %c0_i32_1 = arith.constant 0 : i32
    return %arg0, %c0_i32, %c0_i32_0 : i32, i32, i32
  }
}

</mosaic_0001>

<bundles_post_ra>
// kernel: tpu_custom_call.1
= control target key start
LH: loop header
LB: loop body
LE: loop exit
PB: predicated region body
PF: predicated region fallthrough
CT: control target
= control target key end

     0   :  { %10 = vsyncpa [#allocation3], 0  ;;  %s6046_s0 = inlined_call_operand.vmem [shape: f32[2,64,4], index: 0, kind: input, shape index: {}]   ;;  %s6047_s1 = inlined_call_operand.vmem [shape: f32[2,8,64], index: 1, kind: input, shape index: {}]   ;;  %s6048_s2 = inlined_call_operand.vmem [shape: f32[8,8], index: 2, kind: input, shape index: {}]   ;;  %s6049_s3 = inlined_call_operand.vmem [shape: f32[8,1], index: 3, kind: input, shape index: {}]   ;;  %s6050_s4 = inlined_call_operand.vmem [shape: f32[64,256], index: 4, kind: input, shape index: {}]   ;;  %s6051_s5 = inlined_call_operand.hbm [shape: f32[2,8,256], index: 5, kind: output, shape index: {}]  }
   0x1   :  { %12 = vsyncpa [#allocation3 + $0x1], 0  ;;  %s4276_s18 = smov 0   ;;  %s4278_s19 = smov 0  }
   0x2   :  { %s4280_s20 = smov 0   ;;  %s4282_s21 = smov 0  }
   0x3 LB: > { %s4297_s22 = sadd.s32 4294967295, %s4239_s21   ;;  %s3616_s23 = sadd.s32 4294967294, %s4239_s21   ;;  %s4239_s21 = sphi %s4282_s21, %s6154_s21   ;;  %s4235_s20 = sphi %s4280_s20, %s6153_s20   ;;  %s4231_s19 = sphi %s4278_s19, %s6152_s19   ;;  %s4227_s18 = sphi %s4276_s18, %s6151_s18  }
   0x4   : > { %s4301_s24 = sadd.s32 1, %s4239_s21   ;;  %s140_s25 = sadd.s32 1, %s4235_s20 }
   0x5   : > { %s137_s26 = ssub.s32 %s4239_s21, %s4301_s24  ;;  %p150_p0 = scmp.ne.s32.totalorder %s4235_s20, %s4231_s19 }
   0x6   : > { %p138_p1 = scmp.eq.s32.totalorder %s137_s26, 0  ;;  %p151_p2 = scmp.eq.s32.totalorder %s4297_s22, 1 }
   0x7   : > { %p156_p3 = scmp.ne.s32.totalorder %s4231_s19, %s4227_s18  ;;  %p157_p4 = scmp.eq.s32.totalorder %s3616_s23, 1 }
   0x8   : > { %s4312_s27 = scalar_select %p138_p1, %s4235_s20, %s140_s25  }
   0x9   : > { %p4314_p5 = por %p151_p2, %p150_p0  ;;  %p4318_p6 = por %p157_p4, %p156_p3 }
   0xa   : > { %p3619_p7 = scmp.ge.s32.totalorder %s4239_s21, 1  ;;  %p199_p8 = scmp.lt.s32.totalorder %s4239_s21, 3 }
   0xc   : > { %p200_p9 = pnand %p3619_p7, %p199_p8 }
   0xe   : > { %203 = sbr.rel (%p200_p9) target bundleno = 5208 (0x1458), region = 40 }
  0x13   : > { %p231_p10 = scmp.lt.s32.totalorder %s4297_s22, 1  ;;  %vm256_vm0 = vcmask 31744   ;;  %s4243_s10 = smov 4  }
  0x14   : > { %s3801_s7 = sshll.u32 %s4297_s22, 8 }
  0x15   : > { %s4326_s30 = scalar_select %p231_p10, %s4297_s22, 1 }
  0x16   : > { %s6011_s12 = scalar_lea.hbm %s6051_s5, %s3801_s7  ;;  %s4245_s22 = smov [#allocation2]  }
  0x17   : > { %s3800_s6 = sshll.u32 %s4326_s30, 6  ;;  %s3623_s17 = sshll.u32 %s4326_s30, 3 }
  0x18   : > { %s4332_s9 = scalar_lea.vmem %s6046_s0, %s3800_s6  ;;  %s239_s26 = scalar_lea.vmem %s6047_s1, %s3623_s17 }
  0x19   : > { %v4335_v0 = vld [vmem:[%s4332_s9 + $0x38] sm:$0xff]  ;;  %v4338_v1 = vld [vmem:[%s4332_s9 + $0x28] sm:$0xff]  ;;  %v4341_v2 = vld [vmem:[%s4332_s9 + $0x30] sm:$0xff]  ;;  %s228_s6 = sand.u32 1, %s4231_s19   ;;  %s4183_s15 = sshll.u32 %s4245_s22, 4  ;;  %s4184_s15 = int_to_ptr.vmem [resolvable:$false] %s4183_s15 }
  0x1a   : > { %v255_v3 = vmul.f32 %v4335_v0, %v4335_v0  ;;  %v253_v4 = vmul.f32 %v4338_v1, %v4338_v1  ;;  %v254_v5 = vmul.f32 %v4341_v2, %v4341_v2  ;;  %v4350_v6 = vld [vmem:[%s4332_s9 + $0x20] sm:$0xff]  ;;  %4078 = vmatprep.subr.mxu1 %v4335_v0  ;;  %v4356_v8 = vld [vmem:[%s4332_s9 + $0x18] sm:$0xff]  ;;  %v4359_v9 = vld [vmem:[%s4332_s9 + $0x10] sm:$0xff]  ;;  %s3620_s30 = sshll.u32 %s228_s6, 4  ;;  %s3531_s13 = scalar_lea.sflag [#allocation3], %s228_s6 }
  0x1b   : > { %v252_v7 = vmul.f32 %v4350_v6, %v4350_v6  ;;  %4086 = vmatpush3.msra.mxu1 %v4335_v0  ;;  %v251_v14 = vmul.f32 %v4356_v8, %v4356_v8  ;;  %v250_v15 = vmul.f32 %v4359_v9, %v4359_v9  ;;  %v4373_v16 = vld [vmem:[%s4332_s9 + $0x8] sm:$0xff]  ;;  %v4376_v17 = vld [vmem:[%s4332_s9] sm:$0xff]  ;;  %s230_s8 = scalar_lea.vmem [#allocation2], %s3620_s30  ;;  %s4185_s16 = scalar_lea.vmem %s4184_s15, 512 }
  0x1c   : > { %v278_v10 = vsel %vm256_vm0, %v255_v3, 0.0  ;;  %v272_v11 = vsel %vm256_vm0, %v253_v4, 0.0  ;;  %4079 = vmatprep.subr.mxu1 %v4341_v2  ;;  %v275_v12 = vsel %vm256_vm0, %v254_v5, 0.0  ;;  %v249_v20 = vmul.f32 %v4373_v16, %v4373_v16 }
  0x1d   : > { %279 = vadd.xlane.f32.xlu0 %v278_v10  ;;  %273 = vadd.xlane.f32.xlu1 %v272_v11  ;;  %v269_v13 = vsel %vm256_vm0, %v252_v7, 0.0  ;;  %v266_v18 = vsel %vm256_vm0, %v251_v14, 0.0  ;;  %v263_v19 = vsel %vm256_vm0, %v250_v15, 0.0  ;;  %v248_v21 = vmul.f32 %v4376_v17, %v4376_v17 }
  0x1e   : > { %4087 = vmatpush3.msra.mxu1 %v4341_v2  ;;  %v260_v22 = vsel %vm256_vm0, %v249_v20, 0.0 }
  0x1f   : > { %4080 = vmatprep.subr.mxu1 %v4338_v1  ;;  %v257_v23 = vsel %vm256_vm0, %v248_v21, 0.0 }
  0x20   : > { %4088 = vmatpush3.msra.mxu1 %v4338_v1 }
  0x21   : > { %276 = vadd.xlane.f32.xlu0 %v275_v12  ;;  %270 = vadd.xlane.f32.xlu1 %v269_v13 }
  0x22   : > { %4081 = vmatprep.subr.mxu1 %v4350_v6 }
  0x23   : > { %4089 = vmatpush3.msra.mxu1 %v4350_v6 }
  0x24   : > { %4082 = vmatprep.subr.mxu1 %v4356_v8 }
  0x25   : > { %267 = vadd.xlane.f32.xlu0 %v266_v18  ;;  %264 = vadd.xlane.f32.xlu1 %v263_v19 }
  0x26   : > { %4090 = vmatpush3.msra.mxu1 %v4356_v8 }
  0x27   : > { %4083 = vmatprep.subr.mxu1 %v4359_v9 }
  0x28   : > { %4091 = vmatpush3.msra.mxu1 %v4359_v9 }
  0x29   : > { %261 = vadd.xlane.f32.xlu0 %v260_v22  ;;  %258 = vadd.xlane.f32.xlu1 %v257_v23 }
  0x2a   : > { %4084 = vmatprep.subr.mxu1 %v4373_v16 }
  0x2b   : > { %4092 = vmatpush3.msra.mxu1 %v4373_v16 }
  0x2c   : > { %4085 = vmatprep.subr.mxu1 %v4376_v17 }
  0x2d   : > { %4093 = vmatpush3.msra.mxu1 %v4376_v17 }
  0xa6   : > { %v280_v24 = vpop.xlane.xlu0 %279  ;;  %v274_v25 = vpop.xlane.xlu1 %273 }
  0xa7   : > { %4139 = vrsqrt.f32 %v280_v24  ;;  %vm332_vm1 = vcmp.eq.f32.partialorder %v280_v24, inf  ;;  %v335_v35 = vand.u32 2147483648, %v280_v24  ;;  %vm334_vm2 = vcmp.eq.f32.partialorder %v280_v24, 0.0 }
  0xa8   : > { %4141 = vrsqrt.f32 %v274_v25  ;;  %vm318_vm3 = vcmp.eq.f32.partialorder %v274_v25, inf  ;;  %v321_v38 = vand.u32 2147483648, %v274_v25  ;;  %vm320_vm4 = vcmp.eq.f32.partialorder %v274_v25, 0.0 }
  0xaa   : > { %v277_v26 = vpop.xlane.xlu0 %276  ;;  %v271_v27 = vpop.xlane.xlu1 %270 }
  0xab   : > { %4143 = vrsqrt.f32 %v277_v26  ;;  %vm325_vm5 = vcmp.eq.f32.partialorder %v277_v26, inf  ;;  %vm327_vm6 = vcmp.eq.f32.partialorder %v277_v26, 0.0  ;;  %v328_v47 = vand.u32 2147483648, %v277_v26 }
  0xac   : > { %4145 = vrsqrt.f32 %v271_v27  ;;  %vm311_vm7 = vcmp.eq.f32.partialorder %v271_v27, inf  ;;  %v314_v50 = vand.u32 2147483648, %v271_v27  ;;  %vm313_vm8 = vcmp.eq.f32.partialorder %v271_v27, 0.0 }
  0xae   : > { %v268_v28 = vpop.xlane.xlu0 %267  ;;  %v4398_v29 = vpop.xlane.xlu1 %264 }
  0xaf   : > { %4147 = vrsqrt.f32 %v268_v28  ;;  %vm304_vm9 = vcmp.eq.f32.partialorder %v268_v28, inf  ;;  %v307_v58 = vand.u32 2147483648, %v268_v28  ;;  %vm306_vm10 = vcmp.eq.f32.partialorder %v268_v28, 0.0 }
  0xb0   : > { %4149 = vrsqrt.f32 %v4398_v29  ;;  %vm297_vm11 = vcmp.eq.f32.partialorder %v4398_v29, inf  ;;  %v300_v10 = vand.u32 2147483648, %v4398_v29  ;;  %vm299_vm14 = vcmp.eq.f32.partialorder %v4398_v29, 0.0 }
  0xb2   : > { %v4401_v30 = vpop.xlane.xlu0 %261  ;;  %v4403_v31 = vpop.xlane.xlu1 %258 }
  0xb3   : > { %4151 = vrsqrt.f32 %v4401_v30  ;;  %vm283_vm12 = vcmp.eq.f32.partialorder %v4403_v31, inf  ;;  %v286_v7 = vand.u32 2147483648, %v4403_v31  ;;  %vm285_vm13 = vcmp.eq.f32.partialorder %v4403_v31, 0.0 }
  0xb4   : > { %v4140_v32 = vpop.eup %4139  ;;  %4153 = vrsqrt.f32 %v4403_v31  ;;  %vm290_vm15 = vcmp.eq.f32.partialorder %v4401_v30, inf  ;;  %v293_v19 = vand.u32 2147483648, %v4401_v30 }
  0xb5   : > { %v4142_v33 = vpop.eup %4141  ;;  %v331_v34 = vmul.f32 %v4140_v32, %v280_v24 }
  0xb6   : > { %v317_v36 = vmul.f32 %v4142_v33, %v274_v25 }
  0xb7   : > { %v333_v37 = vsel %vm332_vm1, %v280_v24, %v331_v34  ;;  %vm292_vm1 = vcmp.eq.f32.partialorder %v4401_v30, 0.0 }
  0xb8   : > { %v4144_v39 = vpop.eup %4143  ;;  %v336_v40 = vsel %vm334_vm2, %v335_v35, %v333_v37  ;;  %v319_v41 = vsel %vm318_vm3, %v274_v25, %v317_v36  ;;  %vm492_vm2 = vcmask 523264  }
  0xb9   : > { %v4146_v42 = vpop.eup %4145  ;;  %v344_v43 = vmax.f32 %v336_v40, 1e-12  ;;  %v322_v44 = vsel %vm320_vm4, %v321_v38, %v319_v41  ;;  %v324_v45 = vmul.f32 %v4144_v39, %v277_v26 }
  0xba   : > { %v342_v46 = vmax.f32 %v322_v44, 1e-12  ;;  %v310_v48 = vmul.f32 %v4146_v42, %v271_v27 }
  0xbb   : > { %v326_v49 = vsel %vm325_vm5, %v277_v26, %v324_v45  ;;  %4155 = vrcp.f32 %v344_v43 }
  0xbc   : > { %v4148_v51 = vpop.eup %4147  ;;  %v329_v52 = vsel %vm327_vm6, %v328_v47, %v326_v49  ;;  %v312_v53 = vsel %vm311_vm7, %v271_v27, %v310_v48  ;;  %4157 = vrcp.f32 %v342_v46  ;;  %v490_v48 = vlaneseq }
  0xbd   : > { %v4150_v54 = vpop.eup %4149  ;;  %v343_v55 = vmax.f32 %v329_v52, 1e-12  ;;  %v315_v56 = vsel %vm313_vm8, %v314_v50, %v312_v53  ;;  %v303_v57 = vmul.f32 %v4148_v51, %v268_v28 }
  0xbe   : > { %v296_v59 = vmul.f32 %v4150_v54, %v4398_v29  ;;  %v341_v60 = vmax.f32 %v315_v56, 1e-12  ;;  %v4502_v49 = vand.u32 127, %v490_v48 }
  0xbf   : > { %4159 = vrcp.f32 %v343_v55  ;;  %v305_v61 = vsel %vm304_vm9, %v268_v28, %v303_v57 }
  0xc0   : > { %v4152_v62 = vpop.eup %4151  ;;  %v308_v63 = vsel %vm306_vm10, %v307_v58, %v305_v61  ;;  %v298_v4 = vsel %vm297_vm11, %v4398_v29, %v296_v59  ;;  %4161 = vrcp.f32 %v341_v60  ;;  %6082 = vst [vmem:[#allocation5_spill] sm:$0xff] %v4502_v49 }
  0xc1   : > { %v4154_v3 = vpop.eup %4153  ;;  %v289_v5 = vmul.f32 %v4152_v62, %v4401_v30  ;;  %v340_v12 = vmax.f32 %v308_v63, 1e-12  ;;  %v301_v13 = vsel %vm299_vm14, %v300_v10, %v298_v4 }
  0xc2   : > { %v282_v11 = vmul.f32 %v4154_v3, %v4403_v31  ;;  %v339_v21 = vmax.f32 %v301_v13, 1e-12 }
  0xc3   : > { %v291_v15 = vsel %vm290_vm15, %v4401_v30, %v289_v5  ;;  %4163 = vrcp.f32 %v340_v12 }
  0xc4   : > { %v284_v14 = vsel %vm283_vm12, %v4403_v31, %v282_v11  ;;  %v294_v23 = vsel %vm292_vm1, %v293_v19, %v291_v15 }
  0xc5   : > { %v287_v18 = vsel %vm285_vm13, %v286_v7, %v284_v14  ;;  %v338_v26 = vmax.f32 %v294_v23, 1e-12 }
  0xc6   : > { %v337_v20 = vmax.f32 %v287_v18, 1e-12 }
  0xc8   : > { %v4156_v22 = vpop.eup %4155  ;;  %4165 = vrcp.f32 %v337_v20 }
  0xc9   : > { %v360_v24 = vmul.f32 %v4156_v22, %v4335_v0  ;;  %v4158_v25 = vpop.eup %4157  ;;  %4167 = vrcp.f32 %v339_v21 }
  0xca   : > { %4169 = vrcp.f32 %v338_v26  ;;  %v356_v29 = vmul.f32 %v4158_v25, %v4338_v1 }
  0xcb   : > { %3907 = vmatprep.subr.msk.mxu0 %vm256_vm0, %v360_v24 }
  0xcc   : > { %v4160_v27 = vpop.eup %4159  ;;  %3908 = vmatpush3.xpose.msk.msra.mxu0 %vm256_vm0, %v360_v24 }
  0xcd   : > { %v358_v28 = vmul.f32 %v4160_v27, %v4341_v2  ;;  %v4162_v30 = vpop.eup %4161 }
  0xce   : > { %v354_v31 = vmul.f32 %v4162_v30, %v4350_v6 }
  0xcf   : > { %3909 = vmatprep.subr.msk.mxu0 %vm256_vm0, %v358_v28 }
  0xd0   : > { %3910 = vmatpush3.xpose.msk.msra.mxu0 %vm256_vm0, %v358_v28  ;;  %v4164_v32 = vpop.eup %4163 }
  0xd1   : > { %3911 = vmatprep.subr.msk.mxu0 %vm256_vm0, %v356_v29  ;;  %v352_v35 = vmul.f32 %v4164_v32, %v4356_v8 }
  0xd4   : > { %3912 = vmatpush3.xpose.msk.msra.mxu0 %vm256_vm0, %v356_v29 }
  0xd5   : > { %v4166_v33 = vpop.eup %4165  ;;  %3913 = vmatprep.subr.msk.mxu0 %vm256_vm0, %v354_v31 }
  0xd6   : > { %v346_v34 = vmul.f32 %v4166_v33, %v4376_v17  ;;  %v4168_v36 = vpop.eup %4167 }
  0xd7   : > { %v350_v37 = vmul.f32 %v4168_v36, %v4359_v9  ;;  %v4170_v38 = vpop.eup %4169 }
  0xd8   : > { %3923 = vmatprep.mubr.msk.f32.mxu0 %vm256_vm0, %v346_v34  ;;  %3914 = vmatpush3.xpose.msk.msra.mxu0 %vm256_vm0, %v354_v31  ;;  %v348_v39 = vmul.f32 %v4170_v38, %v4373_v16 }
  0xd9   : > { %3915 = vmatprep.subr.msk.mxu0 %vm256_vm0, %v352_v35 }
  0xdc   : > { %3916 = vmatpush3.xpose.msk.msra.mxu0 %vm256_vm0, %v352_v35 }
  0xdd   : > { %3917 = vmatprep.subr.msk.mxu0 %vm256_vm0, %v350_v37 }
  0xe0   : > { %3918 = vmatpush3.xpose.msk.msra.mxu0 %vm256_vm0, %v350_v37 }
  0xe1   : > { %3919 = vmatprep.subr.msk.mxu0 %vm256_vm0, %v348_v39 }
  0xe4   : > { %3920 = vmatpush3.xpose.msk.msra.mxu0 %vm256_vm0, %v348_v39 }
  0xe5   : > { %3921 = vmatprep.subr.msk.mxu0 %vm256_vm0, %v346_v34 }
  0xe8   : > { %3922 = vmatpush3.xpose.msk.msra.mxu0 %vm256_vm0, %v346_v34 }
  0xe9   : > { %3935 = vmatprep.subr.mxu0 %v4335_v0 }
  0xeb   : > { %3924 = vmatmul.mubr.msk.f32.vlgmr.msra.gmra.mxu0 %vm256_vm0, %v348_v39 }
  0xec   : > { %3926 = vmatprep.mubr.msk.f32.mxu0 %vm256_vm0, %v350_v37  ;;  %3936 = vmatpush3.msra.mxu0 %v4335_v0 }
  0xed   : > { %3937 = vmatprep.subr.mxu0 %v4341_v2 }
  0xee   : > { %3938 = vmatpush3.msra.mxu0 %v4341_v2 }
  0xef   : > { %3927 = vmatmul.mubr.msk.f32.gmra.mxu0 %vm256_vm0, %v352_v35  ;;  %3939 = vmatprep.subr.mxu0 %v4338_v1 }
  0xf0   : > { %3929 = vmatprep.mubr.msk.f32.mxu0 %vm256_vm0, %v354_v31  ;;  %3940 = vmatpush3.msra.mxu0 %v4338_v1 }
  0xf1   : > { %3941 = vmatprep.subr.mxu0 %v4350_v6 }
  0xf2   : > { %3942 = vmatpush3.msra.mxu0 %v4350_v6 }
  0xf3   : > { %3930 = vmatmul.mubr.msk.f32.gmra.mxu0 %vm256_vm0, %v356_v29  ;;  %3943 = vmatprep.subr.mxu0 %v4356_v8 }
  0xf4   : > { %3932 = vmatprep.mubr.msk.f32.mxu0 %vm256_vm0, %v358_v28  ;;  %3944 = vmatpush3.msra.mxu0 %v4356_v8 }
  0xf5   : > { %3945 = vmatprep.subr.mxu0 %v4359_v9 }
  0xf6   : > { %3946 = vmatpush3.msra.mxu0 %v4359_v9 }
  0xf7   : > { %3933 = vmatmul.mubr.msk.f32.gmra.mxu0 %vm256_vm0, %v360_v24  ;;  %3947 = vmatprep.subr.mxu0 %v4373_v16 }
  0xf8   : > { %3948 = vmatpush3.msra.mxu0 %v4373_v16 }
  0xf9   : > { %3949 = vmatprep.subr.mxu0 %v4376_v17 }
  0xfa   : > { %3950 = vmatpush3.msra.mxu0 %v4376_v17 }
 0x1ab   : > { %v4470_v0 = vpop.f32.mrf.mxu0 }
 0x1ac   : > { %v496_v1 = vsel %vm492_vm2, %v4470_v0, -inf }
 0x1ad   : > { %497 = vmax.xlane.f32.xlu1 %v496_v1  ;;  %v4474_v2 = vpop.f32.mrf.mxu0 }
 0x1ae   : > { %v493_v6 = vsel %vm492_vm2, %v4474_v2, -inf }
 0x1af   : > { %494 = vmax.xlane.f32.xlu0 %v493_v6  ;;  %v4478_v8 = vpop.f32.mrf.mxu0 }
 0x1b0   : > { %v502_v9 = vsel %vm492_vm2, %v4478_v8, -inf }
 0x1b1   : > { %503 = vmax.xlane.f32.xlu1 %v502_v9  ;;  %v4482_v16 = vpop.f32.mrf.mxu0 }
 0x1b2   : > { %v499_v17 = vsel %vm492_vm2, %v4482_v16, -inf }
 0x1b3   : > { %500 = vmax.xlane.f32.xlu0 %v499_v17  ;;  %v4486_v40 = vpop.f32.mrf.mxu0 }
 0x1b4   : > { %v508_v41 = vsel %vm492_vm2, %v4486_v40, -inf }
 0x1b5   : > { %509 = vmax.xlane.f32.xlu1 %v508_v41  ;;  %v4490_v42 = vpop.f32.mrf.mxu0 }
 0x1b6   : > { %v505_v43 = vsel %vm492_vm2, %v4490_v42, -inf }
 0x1b7   : > { %506 = vmax.xlane.f32.xlu0 %v505_v43  ;;  %v4494_v44 = vpop.f32.mrf.mxu0 }
 0x1b8   : > { %v514_v45 = vsel %vm492_vm2, %v4494_v44, -inf }
 0x1b9   : > { %515 = vmax.xlane.f32.xlu1 %v514_v45  ;;  %v4498_v46 = vpop.f32.mrf.mxu0 }
 0x1ba   : > { %v511_v47 = vsel %vm492_vm2, %v4498_v46, -inf }
 0x1bb   : > { %512 = vmax.xlane.f32.xlu0 %v511_v47 }
 0x236   : > { %v498_v50 = vpop.xlane.xlu1 %497 }
 0x237   : > { %vm518_vm3 = vcmp.eq.f32.partialorder %v4470_v0, %v498_v50 }
 0x238   : > { %v526_v51 = vsel %vm518_vm3, %v4502_v49, 64  ;;  %v495_v52 = vpop.xlane.xlu0 %494 }
 0x239   : > { %vm517_vm4 = vcmp.eq.f32.partialorder %v4474_v2, %v495_v52  ;;  %v548_v53 = vsel %vm492_vm2, %v526_v51, 2147483647 }
 0x23a   : > { %v525_v54 = vsel %vm517_vm4, %v4502_v49, 64  ;;  %v504_v55 = vpop.xlane.xlu1 %503  ;;  %v550_v56 = vshra.s32 %v548_v53, 16  ;;  %v549_v34 = vand.u32 65535, %v548_v53 }
 0x23b   : > { %vm520_vm5 = vcmp.eq.f32.partialorder %v4478_v8, %v504_v55  ;;  %v533_v57 = vsel %vm492_vm2, %v525_v54, 2147483647 }
 0x23c   : > { %v528_v58 = vsel %vm520_vm5, %v4502_v49, 64  ;;  %v501_v59 = vpop.xlane.xlu0 %500  ;;  %v552_v60 = vcvt.s32.f32 %v550_v56  ;;  %v535_v61 = vshra.s32 %v533_v57, 16  ;;  %v534_v35 = vand.u32 65535, %v533_v57 }
 0x23d   : > { %vm519_vm6 = vcmp.eq.f32.partialorder %v4482_v16, %v501_v59  ;;  %v578_v62 = vsel %vm492_vm2, %v528_v58, 2147483647  ;;  %v551_v37 = vcvt.s32.f32 %v549_v34 }
 0x23e   : > { %v527_v63 = vsel %vm519_vm6, %v4502_v49, 64  ;;  %v510_v3 = vpop.xlane.xlu1 %509  ;;  %553 = vmin.xlane.f32.xlu1 %v552_v60  ;;  %v537_v4 = vcvt.s32.f32 %v535_v61  ;;  %v580_v5 = vshra.s32 %v578_v62, 16  ;;  %v579_v38 = vand.u32 65535, %v578_v62 }
 0x23f   : > { %vm522_vm7 = vcmp.eq.f32.partialorder %v4486_v40, %v510_v3  ;;  %v563_v7 = vsel %vm492_vm2, %v527_v63, 2147483647  ;;  %v536_v6 = vcvt.s32.f32 %v534_v35 }
 0x240   : > { %v530_v10 = vsel %vm522_vm7, %v4502_v49, 64  ;;  %v507_v11 = vpop.xlane.xlu0 %506  ;;  %538 = vmin.xlane.f32.xlu0 %v537_v4  ;;  %v582_v12 = vcvt.s32.f32 %v580_v5  ;;  %v565_v13 = vshra.s32 %v563_v7, 16  ;;  %v564_v9 = vand.u32 65535, %v563_v7 }
 0x241   : > { %vm521_vm8 = vcmp.eq.f32.partialorder %v4490_v42, %v507_v11  ;;  %v608_v14 = vsel %vm492_vm2, %v530_v10, 2147483647  ;;  %v581_v43 = vcvt.s32.f32 %v579_v38 }
 0x242   : > { %v529_v15 = vsel %vm521_vm8, %v4502_v49, 64  ;;  %583 = vmin.xlane.f32.xlu1 %v582_v12  ;;  %v516_v18 = vpop.xlane.xlu1 %515  ;;  %v567_v19 = vcvt.s32.f32 %v565_v13  ;;  %v610_v20 = vshra.s32 %v608_v14, 16  ;;  %v609_v45 = vand.u32 65535, %v608_v14 }
 0x243   : > { %vm524_vm9 = vcmp.eq.f32.partialorder %v4494_v44, %v516_v18  ;;  %v593_v21 = vsel %vm492_vm2, %v529_v15, 2147483647  ;;  %v566_v50 = vcvt.s32.f32 %v564_v9 }
 0x244   : > { %v532_v22 = vsel %vm524_vm9, %v4502_v49, 64  ;;  %568 = vmin.xlane.f32.xlu0 %v567_v19  ;;  %v513_v23 = vpop.xlane.xlu0 %512  ;;  %v612_v24 = vcvt.s32.f32 %v610_v20  ;;  %v595_v25 = vshra.s32 %v593_v21, 16  ;;  %v594_v51 = vand.u32 65535, %v593_v21 }
 0x245   : > { %vm523_vm10 = vcmp.eq.f32.partialorder %v4498_v46, %v513_v23  ;;  %v638_v26 = vsel %vm492_vm2, %v532_v22, 2147483647  ;;  %v611_v54 = vcvt.s32.f32 %v609_v45 }
 0x246   : > { %v531_v27 = vsel %vm523_vm10, %v4502_v49, 64  ;;  %613 = vmin.xlane.f32.xlu1 %v612_v24  ;;  %v597_v28 = vcvt.s32.f32 %v595_v25  ;;  %v640_v29 = vshra.s32 %v638_v26, 16  ;;  %v639_v55 = vand.u32 65535, %v638_v26 }
 0x247   : > { %v623_v30 = vsel %vm492_vm2, %v531_v27, 2147483647  ;;  %v596_v58 = vcvt.s32.f32 %v594_v51 }
 0x248   : > { %598 = vmin.xlane.f32.xlu0 %v597_v28  ;;  %v642_v31 = vcvt.s32.f32 %v640_v29  ;;  %v625_v32 = vshra.s32 %v623_v30, 16  ;;  %v624_v59 = vand.u32 65535, %v623_v30  ;;  %v641_v62 = vcvt.s32.f32 %v639_v55 }
 0x24a   : > { %643 = vmin.xlane.f32.xlu1 %v642_v31  ;;  %v627_v33 = vcvt.s32.f32 %v625_v32 }
 0x24c   : > { %628 = vmin.xlane.f32.xlu0 %v627_v33 }
 0x2c7   : > { %v554_v36 = vpop.xlane.xlu1 %553 }
 0x2c8   : > { %vm555_vm11 = vcmp.eq.f32.partialorder %v552_v60, %v554_v36  ;;  %v560_v7 = vcvt.f32.s32 %v554_v36 }
 0x2c9   : > { %v539_v39 = vpop.xlane.xlu0 %538  ;;  %v556_v1 = vsel %vm555_vm11, %v551_v37, inf }
 0x2ca   : > { %557 = vmin.xlane.f32.xlu1 %v556_v1  ;;  %vm540_vm12 = vcmp.eq.f32.partialorder %v537_v4, %v539_v39  ;;  %v626_v4 = vcvt.s32.f32 %v624_v59  ;;  %v545_v10 = vcvt.f32.s32 %v539_v39 }
 0x2cb   : > { %v584_v17 = vpop.xlane.xlu1 %583  ;;  %v541_v41 = vsel %vm540_vm12, %v536_v6, inf }
 0x2cc   : > { %542 = vmin.xlane.f32.xlu0 %v541_v41  ;;  %vm585_vm13 = vcmp.eq.f32.partialorder %v582_v12, %v584_v17  ;;  %v561_v12 = vshll.u32 %v560_v7, 16  ;;  %v590_v13 = vcvt.f32.s32 %v584_v17 }
 0x2cd   : > { %v569_v47 = vpop.xlane.xlu0 %568  ;;  %v586_v48 = vsel %vm585_vm13, %v581_v43, inf }
 0x2ce   : > { %587 = vmin.xlane.f32.xlu1 %v586_v48  ;;  %vm570_vm14 = vcmp.eq.f32.partialorder %v567_v19, %v569_v47  ;;  %v575_v15 = vcvt.f32.s32 %v569_v47  ;;  %v546_v19 = vshll.u32 %v545_v10, 16 }
 0x2cf   : > { %v614_v52 = vpop.xlane.xlu1 %613  ;;  %v571_v53 = vsel %vm570_vm14, %v566_v50, inf }
 0x2d0   : > { %572 = vmin.xlane.f32.xlu0 %v571_v53  ;;  %vm615_vm15 = vcmp.eq.f32.partialorder %v612_v24, %v614_v52  ;;  %v620_v22 = vcvt.f32.s32 %v614_v52  ;;  %v591_v24 = vshll.u32 %v590_v13, 16  ;;  %v576_v27 = vshll.u32 %v575_v15, 16 }
 0x2d1   : > { %v599_v56 = vpop.xlane.xlu0 %598  ;;  %v616_v57 = vsel %vm615_vm15, %v611_v54, inf }
 0x2d2   : > { %617 = vmin.xlane.f32.xlu1 %v616_v57  ;;  %vm600_vm1 = vcmp.eq.f32.partialorder %v597_v28, %v599_v56  ;;  %v605_v28 = vcvt.f32.s32 %v599_v56  ;;  %v621_v34 = vshll.u32 %v620_v22, 16 }
 0x2d3   : > { %v644_v60 = vpop.xlane.xlu1 %643  ;;  %v601_v61 = vsel %vm600_vm1, %v596_v58, inf }
 0x2d4   : > { %602 = vmin.xlane.f32.xlu0 %v601_v61  ;;  %vm645_vm3 = vcmp.eq.f32.partialorder %v642_v31, %v644_v60  ;;  %v650_v35 = vcvt.f32.s32 %v644_v60  ;;  %v606_v1 = vshll.u32 %v605_v28, 16 }
 0x2d5   : > { %v629_v63 = vpop.xlane.xlu0 %628  ;;  %v646_v3 = vsel %vm645_vm3, %v641_v62, inf }
 0x2d6   : > { %647 = vmin.xlane.f32.xlu1 %v646_v3  ;;  %vm630_vm4 = vcmp.eq.f32.partialorder %v627_v33, %v629_v63  ;;  %v635_v6 = vcvt.f32.s32 %v629_v63  ;;  %v651_v45 = vshll.u32 %v650_v35, 16 }
 0x2d7   : > { %v631_v5 = vsel %vm630_vm4, %v626_v4, inf }
 0x2d8   : > { %632 = vmin.xlane.f32.xlu0 %v631_v5  ;;  %v636_v52 = vshll.u32 %v635_v6, 16 }
 0x353   : > { %v558_v11 = vpop.xlane.xlu1 %557 }
 0x354   : > { %v559_v14 = vcvt.f32.s32 %v558_v11 }
 0x355   : > { %v543_v18 = vpop.xlane.xlu0 %542 }
 0x356   : > { %v4528_v20 = vadd.s32 %v561_v12, %v559_v14  ;;  %v544_v21 = vcvt.f32.s32 %v543_v18 }
 0x357   : > { %v588_v23 = vpop.xlane.xlu1 %587 }
 0x358   : > { %6083 = vst [vmem:[#allocation6_spill] sm:$0xff] %v4528_v20  ;;  %v4530_v25 = vadd.s32 %v546_v19, %v544_v21  ;;  %v589_v26 = vcvt.f32.s32 %v588_v23  ;;  %vm654_vm5 = vcmp.eq.s32.totalorder %v4502_v49, %v4528_v20 }
 0x359   : > { %v573_v29 = vpop.xlane.xlu0 %572  ;;  %v4535_v30 = vsel %vm654_vm5, -inf, %v4470_v0 }
 0x35a   : > { %6084 = vst [vmem:[#allocation7_spill] sm:$0xff] %v4530_v25  ;;  %v4537_v31 = vadd.s32 %v591_v24, %v589_v26  ;;  %v574_v32 = vcvt.f32.s32 %v573_v29  ;;  %v672_v33 = vsel %vm492_vm2, %v4535_v30, -inf  ;;  %vm653_vm6 = vcmp.eq.s32.totalorder %v4502_v49, %v4530_v25 }
 0x35b   : > { %673 = vmax.xlane.f32.xlu1 %v672_v33  ;;  %v618_v36 = vpop.xlane.xlu1 %617  ;;  %v4544_v37 = vsel %vm653_vm6, -inf, %v4474_v2 }
 0x35c   : > { %6085 = vst [vmem:[#allocation8_spill] sm:$0xff] %v4537_v31  ;;  %v4546_v38 = vadd.s32 %v576_v27, %v574_v32  ;;  %v619_v0 = vcvt.f32.s32 %v618_v36  ;;  %v669_v39 = vsel %vm492_vm2, %v4544_v37, -inf  ;;  %vm656_vm7 = vcmp.eq.s32.totalorder %v4502_v49, %v4537_v31 }
 0x35d   : > { %670 = vmax.xlane.f32.xlu0 %v669_v39  ;;  %v603_v9 = vpop.xlane.xlu0 %602  ;;  %v4553_v17 = vsel %vm656_vm7, -inf, %v4478_v8 }
 0x35e   : > { %6086 = vst [vmem:[#allocation9_spill] sm:$0xff] %v4546_v38  ;;  %v4555_v41 = vadd.s32 %v621_v34, %v619_v0  ;;  %v604_v2 = vcvt.f32.s32 %v603_v9  ;;  %v678_v43 = vsel %vm492_vm2, %v4553_v17, -inf  ;;  %vm655_vm8 = vcmp.eq.s32.totalorder %v4502_v49, %v4546_v38 }
 0x35f   : > { %679 = vmax.xlane.f32.xlu1 %v678_v43  ;;  %v648_v47 = vpop.xlane.xlu1 %647  ;;  %v4562_v48 = vsel %vm655_vm8, -inf, %v4482_v16  ;;  %v4241_v38 = vmov 0  }
 0x360   : > { %6087 = vst [vmem:[#allocation10_spill] sm:$0xff] %v4555_v41  ;;  %v4564_v50 = vadd.s32 %v606_v1, %v604_v2  ;;  %v649_v51 = vcvt.f32.s32 %v648_v47  ;;  %v675_v8 = vsel %vm492_vm2, %v4562_v48, -inf  ;;  %vm658_vm9 = vcmp.eq.s32.totalorder %v4502_v49, %v4555_v41  ;;  %4138 = vset.pattern.permute.xlu1 %v4241_v38  ;;  %4137 = vset.pattern.permute.xlu0 %v4241_v38 }
 0x361   : > { %676 = vmax.xlane.f32.xlu0 %v675_v8  ;;  %v633_v53 = vpop.xlane.xlu0 %632  ;;  %v4571_v54 = vsel %vm658_vm9, -inf, %v4486_v40 }
 0x362   : > { %6088 = vst [vmem:[#allocation11_spill] sm:$0xff] %v4564_v50  ;;  %v4573_v55 = vadd.s32 %v651_v45, %v649_v51  ;;  %v634_v56 = vcvt.f32.s32 %v633_v53  ;;  %v684_v16 = vsel %vm492_vm2, %v4571_v54, -inf  ;;  %vm657_vm10 = vcmp.eq.s32.totalorder %v4502_v49, %v4564_v50 }
 0x363   : > { %685 = vmax.xlane.f32.xlu1 %v684_v16  ;;  %v4580_v57 = vsel %vm657_vm10, -inf, %v4490_v42 }
 0x364   : > { %6089 = vst [vmem:[#allocation12_spill] sm:$0xff] %v4573_v55  ;;  %v4582_v58 = vadd.s32 %v636_v52, %v634_v56  ;;  %v681_v59 = vsel %vm492_vm2, %v4580_v57, -inf  ;;  %vm660_vm11 = vcmp.eq.s32.totalorder %v4502_v49, %v4573_v55 }
 0x365   : > { %682 = vmax.xlane.f32.xlu0 %v681_v59  ;;  %v4589_v40 = vsel %vm660_vm11, -inf, %v4494_v44 }
 0x366   : > { %6090 = vst [vmem:[#allocation13_spill] sm:$0xff] %v4582_v58  ;;  %v690_v60 = vsel %vm492_vm2, %v4589_v40, -inf  ;;  %vm659_vm12 = vcmp.eq.s32.totalorder %v4502_v49, %v4582_v58 }
 0x367   : > { %691 = vmax.xlane.f32.xlu1 %v690_v60  ;;  %v4596_v42 = vsel %vm659_vm12, -inf, %v4498_v46 }
 0x368   : > { %v687_v61 = vsel %vm492_vm2, %v4596_v42, -inf }
 0x369   : > { %688 = vmax.xlane.f32.xlu0 %v687_v61 }
 0x3e4   : > { %v674_v62 = vpop.xlane.xlu1 %673 }
 0x3e5   : > { %vm694_vm13 = vcmp.eq.f32.partialorder %v4535_v30, %v674_v62 }
 0x3e6   : > { %v702_v44 = vsel %vm694_vm13, %v4502_v49, 64  ;;  %v671_v63 = vpop.xlane.xlu0 %670 }
 0x3e7   : > { %vm693_vm14 = vcmp.eq.f32.partialorder %v4544_v37, %v671_v63  ;;  %v724_v3 = vsel %vm492_vm2, %v702_v44, 2147483647 }
 0x3e8   : > { %v701_v4 = vsel %vm693_vm14, %v4502_v49, 64  ;;  %v680_v5 = vpop.xlane.xlu1 %679  ;;  %v726_v7 = vshra.s32 %v724_v3, 16  ;;  %v725_v52 = vand.u32 65535, %v724_v3 }
 0x3e9   : > { %vm696_vm15 = vcmp.eq.f32.partialorder %v4553_v17, %v680_v5  ;;  %v709_v46 = vsel %vm492_vm2, %v701_v4, 2147483647 }
 0x3ea   : > { %v704_v10 = vsel %vm696_vm15, %v4502_v49, 64  ;;  %v677_v11 = vpop.xlane.xlu0 %676  ;;  %v728_v12 = vcvt.s32.f32 %v726_v7  ;;  %v711_v13 = vshra.s32 %v709_v46, 16  ;;  %v710_v53 = vand.u32 65535, %v709_v46 }
 0x3eb   : > { %vm695_vm1 = vcmp.eq.f32.partialorder %v4562_v48, %v677_v11  ;;  %v754_v14 = vsel %vm492_vm2, %v704_v10, 2147483647  ;;  %v727_v16 = vcvt.s32.f32 %v725_v52 }
 0x3ec   : > { %v703_v15 = vsel %vm695_vm1, %v4502_v49, 64  ;;  %729 = vmin.xlane.f32.xlu1 %v728_v12  ;;  %v686_v18 = vpop.xlane.xlu1 %685  ;;  %v713_v19 = vcvt.s32.f32 %v711_v13  ;;  %v756_v21 = vshra.s32 %v754_v14, 16  ;;  %v755_v59 = vand.u32 65535, %v754_v14 }
 0x3ed   : > { %vm698_vm3 = vcmp.eq.f32.partialorder %v4571_v54, %v686_v18  ;;  %v739_v22 = vsel %vm492_vm2, %v703_v15, 2147483647  ;;  %v712_v62 = vcvt.s32.f32 %v710_v53 }
 0x3ee   : > { %v706_v23 = vsel %vm698_vm3, %v4502_v49, 64  ;;  %714 = vmin.xlane.f32.xlu0 %v713_v19  ;;  %v683_v24 = vpop.xlane.xlu0 %682  ;;  %v758_v26 = vcvt.s32.f32 %v756_v21  ;;  %v741_v27 = vshra.s32 %v739_v22, 16  ;;  %v740_v44 = vand.u32 65535, %v739_v22 }
 0x3ef   : > { %vm697_vm4 = vcmp.eq.f32.partialorder %v4580_v57, %v683_v24  ;;  %v784_v28 = vsel %vm492_vm2, %v706_v23, 2147483647  ;;  %v757_v5 = vcvt.s32.f32 %v755_v59 }
 0x3f0   : > { %v705_v29 = vsel %vm697_vm4, %v4502_v49, 64  ;;  %759 = vmin.xlane.f32.xlu1 %v758_v26  ;;  %v692_v32 = vpop.xlane.xlu1 %691  ;;  %v743_v33 = vcvt.s32.f32 %v741_v27  ;;  %v786_v34 = vshra.s32 %v784_v28, 16  ;;  %v785_v7 = vand.u32 65535, %v784_v28 }
 0x3f1   : > { %vm700_vm5 = vcmp.eq.f32.partialorder %v4589_v40, %v692_v32  ;;  %v769_v35 = vsel %vm492_vm2, %v705_v29, 2147483647  ;;  %v742_v3 = vcvt.s32.f32 %v740_v44 }
 0x3f2   : > { %v708_v36 = vsel %vm700_vm5, %v4502_v49, 64  ;;  %744 = vmin.xlane.f32.xlu0 %v743_v33  ;;  %v689_v0 = vpop.xlane.xlu0 %688  ;;  %v788_v39 = vcvt.s32.f32 %v786_v34  ;;  %v771_v1 = vshra.s32 %v769_v35, 16  ;;  %v770_v46 = vand.u32 65535, %v769_v35 }
 0x3f3   : > { %vm699_vm6 = vcmp.eq.f32.partialorder %v4596_v42, %v689_v0  ;;  %v814_v6 = vsel %vm492_vm2, %v708_v36, 2147483647  ;;  %v787_v14 = vcvt.s32.f32 %v785_v7 }
 0x3f4   : > { %v707_v9 = vsel %vm699_vm6, %v4502_v49, 64  ;;  %789 = vmin.xlane.f32.xlu1 %v788_v39  ;;  %v773_v2 = vcvt.s32.f32 %v771_v1  ;;  %v816_v43 = vshra.s32 %v814_v6, 16  ;;  %v815_v15 = vand.u32 65535, %v814_v6 }
 0x3f5   : > { %v799_v45 = vsel %vm492_vm2, %v707_v9, 2147483647  ;;  %v772_v21 = vcvt.s32.f32 %v770_v46 }
 0x3f6   : > { %774 = vmin.xlane.f32.xlu0 %v773_v2  ;;  %v818_v47 = vcvt.s32.f32 %v816_v43  ;;  %v801_v51 = vshra.s32 %v799_v45, 16  ;;  %v800_v22 = vand.u32 65535, %v799_v45 }
 0x3f8   : > { %819 = vmin.xlane.f32.xlu1 %v818_v47  ;;  %v803_v8 = vcvt.s32.f32 %v801_v51  ;;  %v802_v29 = vcvt.s32.f32 %v800_v22 }
 0x3fa   : > { %804 = vmin.xlane.f32.xlu0 %v803_v8 }
 0x475   : > { %v730_v56 = vpop.xlane.xlu1 %729 }
 0x476   : > { %vm731_vm7 = vcmp.eq.f32.partialorder %v728_v12, %v730_v56 }
 0x477   : > { %v715_v60 = vpop.xlane.xlu0 %714  ;;  %v732_v61 = vsel %vm731_vm7, %v727_v16, inf }
 0x478   : > { %733 = vmin.xlane.f32.xlu1 %v732_v61  ;;  %vm716_vm8 = vcmp.eq.f32.partialorder %v713_v19, %v715_v60  ;;  %v721_v34 = vcvt.f32.s32 %v715_v60 }
 0x479   : > { %v760_v63 = vpop.xlane.xlu1 %759  ;;  %v717_v4 = vsel %vm716_vm8, %v712_v62, inf }
 0x47a   : > { %718 = vmin.xlane.f32.xlu0 %v717_v4  ;;  %vm761_vm9 = vcmp.eq.f32.partialorder %v758_v26, %v760_v63  ;;  %v817_v26 = vcvt.s32.f32 %v815_v15  ;;  %v766_v0 = vcvt.f32.s32 %v760_v63  ;;  %v722_v9 = vshll.u32 %v721_v34, 16 }
 0x47b   : > { %v745_v10 = vpop.xlane.xlu0 %744  ;;  %v762_v11 = vsel %vm761_vm9, %v757_v5, inf }
 0x47c   : > { %763 = vmin.xlane.f32.xlu1 %v762_v11  ;;  %vm746_vm10 = vcmp.eq.f32.partialorder %v743_v33, %v745_v10  ;;  %v736_v33 = vcvt.f32.s32 %v730_v56  ;;  %v751_v1 = vcvt.f32.s32 %v745_v10  ;;  %v767_v51 = vshll.u32 %v766_v0, 16 }
 0x47d   : > { %v790_v13 = vpop.xlane.xlu1 %789  ;;  %v747_v12 = vsel %vm746_vm10, %v742_v3, inf }
 0x47e   : > { %748 = vmin.xlane.f32.xlu0 %v747_v12  ;;  %vm791_vm11 = vcmp.eq.f32.partialorder %v788_v39, %v790_v13  ;;  %v737_v36 = vshll.u32 %v736_v33, 16  ;;  %v796_v45 = vcvt.f32.s32 %v790_v13  ;;  %v752_v53 = vshll.u32 %v751_v1, 16 }
 0x47f   : > { %v775_v18 = vpop.xlane.xlu0 %774  ;;  %v792_v19 = vsel %vm791_vm11, %v787_v14, inf }
 0x480   : > { %793 = vmin.xlane.f32.xlu1 %v792_v19  ;;  %vm776_vm12 = vcmp.eq.f32.partialorder %v773_v2, %v775_v18  ;;  %v781_v56 = vcvt.f32.s32 %v775_v18  ;;  %v797_v44 = vshll.u32 %v796_v45, 16 }
 0x481   : > { %v820_v23 = vpop.xlane.xlu1 %819  ;;  %v777_v24 = vsel %vm776_vm12, %v772_v21, inf }
 0x482   : > { %778 = vmin.xlane.f32.xlu0 %v777_v24  ;;  %vm821_vm13 = vcmp.eq.f32.partialorder %v818_v47, %v820_v23  ;;  %v826_v63 = vcvt.f32.s32 %v820_v23  ;;  %v782_v11 = vshll.u32 %v781_v56, 16 }
 0x483   : > { %v805_v27 = vpop.xlane.xlu0 %804  ;;  %v822_v28 = vsel %vm821_vm13, %v817_v26, inf }
 0x484   : > { %823 = vmin.xlane.f32.xlu1 %v822_v28  ;;  %vm806_vm14 = vcmp.eq.f32.partialorder %v803_v8, %v805_v27  ;;  %v811_v3 = vcvt.f32.s32 %v805_v27  ;;  %v827_v15 = vshll.u32 %v826_v63, 16 }
 0x485   : > { %v807_v32 = vsel %vm806_vm14, %v802_v29, inf }
 0x486   : > { %808 = vmin.xlane.f32.xlu0 %v807_v32  ;;  %v812_v23 = vshll.u32 %v811_v3, 16 }
 0x501   : > { %v734_v35 = vpop.xlane.xlu1 %733 }
 0x502   : > { %v735_v39 = vcvt.f32.s32 %v734_v35 }
 0x503   : > { %v719_v6 = vpop.xlane.xlu0 %718 }
 0x504   : > { %v4624_v2 = vadd.s32 %v737_v36, %v735_v39  ;;  %v720_v43 = vcvt.f32.s32 %v719_v6 }
 0x505   : > { %v764_v47 = vpop.xlane.xlu1 %763 }
 0x506   : > { %6091 = vst [vmem:[#allocation14_spill] sm:$0xff] %v4624_v2  ;;  %v4626_v52 = vadd.s32 %v722_v9, %v720_v43  ;;  %v765_v8 = vcvt.f32.s32 %v764_v47  ;;  %vm830_vm15 = vcmp.eq.s32.totalorder %v4502_v49, %v4624_v2 }
 0x507   : > { %v749_v16 = vpop.xlane.xlu0 %748  ;;  %v4631_v59 = vsel %vm830_vm15, -inf, %v4535_v30 }
 0x508   : > { %6092 = vst [vmem:[#allocation15_spill] sm:$0xff] %v4626_v52  ;;  %v4633_v60 = vadd.s32 %v767_v51, %v765_v8  ;;  %v750_v61 = vcvt.f32.s32 %v749_v16  ;;  %v848_v62 = vsel %vm492_vm2, %v4631_v59, -inf  ;;  %vm829_vm1 = vcmp.eq.s32.totalorder %v4502_v49, %v4626_v52 }
 0x509   : > { %849 = vmax.xlane.f32.xlu1 %v848_v62  ;;  %v794_v4 = vpop.xlane.xlu1 %793  ;;  %v4640_v5 = vsel %vm829_vm1, -inf, %v4544_v37 }
 0x50a   : > { %6093 = vst [vmem:[#allocation16_spill] sm:$0xff] %v4633_v60  ;;  %v4642_v7 = vadd.s32 %v752_v53, %v750_v61  ;;  %v795_v30 = vcvt.f32.s32 %v794_v4  ;;  %v845_v10 = vsel %vm492_vm2, %v4640_v5, -inf  ;;  %vm832_vm3 = vcmp.eq.s32.totalorder %v4502_v49, %v4633_v60 }
 0x50b   : > { %846 = vmax.xlane.f32.xlu0 %v845_v10  ;;  %v779_v46 = vpop.xlane.xlu0 %778  ;;  %v4649_v13 = vsel %vm832_vm3, -inf, %v4553_v17 }
 0x50c   : > { %6094 = vst [vmem:[#allocation17_spill] sm:$0xff] %v4642_v7  ;;  %v4651_v12 = vadd.s32 %v797_v44, %v795_v30  ;;  %v780_v37 = vcvt.f32.s32 %v779_v46  ;;  %v854_v14 = vsel %vm492_vm2, %v4649_v13, -inf  ;;  %vm831_vm4 = vcmp.eq.s32.totalorder %v4502_v49, %v4642_v7 }
 0x50d   : > { %855 = vmax.xlane.f32.xlu1 %v854_v14  ;;  %v824_v18 = vpop.xlane.xlu1 %823  ;;  %v4658_v19 = vsel %vm831_vm4, -inf, %v4562_v48 }
 0x50e   : > { %6095 = vst [vmem:[#allocation18_spill] sm:$0xff] %v4651_v12  ;;  %v4660_v21 = vadd.s32 %v782_v11, %v780_v37  ;;  %v825_v22 = vcvt.f32.s32 %v824_v18  ;;  %v851_v17 = vsel %vm492_vm2, %v4658_v19, -inf  ;;  %vm834_vm5 = vcmp.eq.s32.totalorder %v4502_v49, %v4651_v12 }
 0x50f   : > { %852 = vmax.xlane.f32.xlu0 %v851_v17  ;;  %v809_v24 = vpop.xlane.xlu0 %808  ;;  %v4667_v26 = vsel %vm834_vm5, -inf, %v4571_v54 }
 0x510   : > { %6096 = vst [vmem:[#allocation19_spill] sm:$0xff] %v4660_v21  ;;  %v4669_v27 = vadd.s32 %v827_v15, %v825_v22  ;;  %v810_v28 = vcvt.f32.s32 %v809_v24  ;;  %v860_v48 = vsel %vm492_vm2, %v4667_v26, -inf  ;;  %vm833_vm6 = vcmp.eq.s32.totalorder %v4502_v49, %v4660_v21 }
 0x511   : > { %861 = vmax.xlane.f32.xlu1 %v860_v48  ;;  %v4676_v29 = vsel %vm833_vm6, -inf, %v4580_v57 }
 0x512   : > { %6097 = vst [vmem:[#allocation20_spill] sm:$0xff] %v4669_v27  ;;  %v4678_v32 = vadd.s32 %v812_v23, %v810_v28  ;;  %v857_v33 = vsel %vm492_vm2, %v4676_v29, -inf  ;;  %vm836_vm7 = vcmp.eq.s32.totalorder %v4502_v49, %v4669_v27 }
 0x513   : > { %858 = vmax.xlane.f32.xlu0 %v857_v33  ;;  %v4685_v54 = vsel %vm836_vm7, -inf, %v4589_v40 }
 0x514   : > { %6098 = vst [vmem:[#allocation21_spill] sm:$0xff] %v4678_v32  ;;  %v866_v34 = vsel %vm492_vm2, %v4685_v54, -inf  ;;  %vm835_vm8 = vcmp.eq.s32.totalorder %v4502_v49, %v4678_v32 }
 0x515   : > { %867 = vmax.xlane.f32.xlu1 %v866_v34  ;;  %v4692_v57 = vsel %vm835_vm8, -inf, %v4596_v42 }
 0x516   : > { %v863_v35 = vsel %vm492_vm2, %v4692_v57, -inf }
 0x517   : > { %864 = vmax.xlane.f32.xlu0 %v863_v35 }
 0x592   : > { %v850_v36 = vpop.xlane.xlu1 %849 }
 0x593   : > { %vm870_vm9 = vcmp.eq.f32.partialorder %v4631_v59, %v850_v36 }
 0x594   : > { %v878_v40 = vsel %vm870_vm9, %v4502_v49, 64  ;;  %v847_v0 = vpop.xlane.xlu0 %846 }
 0x595   : > { %vm869_vm10 = vcmp.eq.f32.partialorder %v4640_v5, %v847_v0  ;;  %v900_v39 = vsel %vm492_vm2, %v878_v40, 2147483647 }
 0x596   : > { %v877_v1 = vsel %vm869_vm10, %v4502_v49, 64  ;;  %v856_v6 = vpop.xlane.xlu1 %855  ;;  %v902_v9 = vshra.s32 %v900_v39, 16  ;;  %v901_v40 = vand.u32 65535, %v900_v39 }
 0x597   : > { %vm872_vm11 = vcmp.eq.f32.partialorder %v4649_v13, %v856_v6  ;;  %v885_v42 = vsel %vm492_vm2, %v877_v1, 2147483647 }
 0x598   : > { %v880_v43 = vsel %vm872_vm11, %v4502_v49, 64  ;;  %v853_v45 = vpop.xlane.xlu0 %852  ;;  %v904_v47 = vcvt.s32.f32 %v902_v9  ;;  %v887_v51 = vshra.s32 %v885_v42, 16  ;;  %v886_v0 = vand.u32 65535, %v885_v42 }
 0x599   : > { %vm871_vm12 = vcmp.eq.f32.partialorder %v4658_v19, %v853_v45  ;;  %v930_v8 = vsel %vm492_vm2, %v880_v43, 2147483647  ;;  %v903_v6 = vcvt.s32.f32 %v901_v40 }
 0x59a   : > { %v879_v53 = vsel %vm871_vm12, %v4502_v49, 64  ;;  %905 = vmin.xlane.f32.xlu1 %v904_v47  ;;  %v862_v56 = vpop.xlane.xlu1 %861  ;;  %v889_v16 = vcvt.s32.f32 %v887_v51  ;;  %v932_v61 = vshra.s32 %v930_v8, 16  ;;  %v931_v9 = vand.u32 65535, %v930_v8 }
 0x59b   : > { %vm874_vm13 = vcmp.eq.f32.partialorder %v4667_v26, %v862_v56  ;;  %v915_v62 = vsel %vm492_vm2, %v879_v53, 2147483647  ;;  %v888_v51 = vcvt.s32.f32 %v886_v0 }
 0x59c   : > { %v882_v44 = vsel %vm874_vm13, %v4502_v49, 64  ;;  %890 = vmin.xlane.f32.xlu0 %v889_v16  ;;  %v859_v63 = vpop.xlane.xlu0 %858  ;;  %v934_v4 = vcvt.s32.f32 %v932_v61  ;;  %v917_v30 = vshra.s32 %v915_v62, 16  ;;  %v916_v53 = vand.u32 65535, %v915_v62 }
 0x59d   : > { %vm873_vm14 = vcmp.eq.f32.partialorder %v4676_v29, %v859_v63  ;;  %v960_v10 = vsel %vm492_vm2, %v882_v44, 2147483647  ;;  %v933_v44 = vcvt.s32.f32 %v931_v9 }
 0x59e   : > { %v881_v11 = vsel %vm873_vm14, %v4502_v49, 64  ;;  %935 = vmin.xlane.f32.xlu1 %v934_v4  ;;  %v868_v3 = vpop.xlane.xlu1 %867  ;;  %v919_v46 = vcvt.s32.f32 %v917_v30  ;;  %v962_v37 = vshra.s32 %v960_v10, 16  ;;  %v961_v63 = vand.u32 65535, %v960_v10 }
 0x59f   : > { %vm876_vm15 = vcmp.eq.f32.partialorder %v4685_v54, %v868_v3  ;;  %v945_v14 = vsel %vm492_vm2, %v881_v11, 2147483647  ;;  %v918_v39 = vcvt.s32.f32 %v916_v53 }
 0x5a0   : > { %v884_v15 = vsel %vm876_vm15, %v4502_v49, 64  ;;  %920 = vmin.xlane.f32.xlu0 %v919_v46  ;;  %v865_v18 = vpop.xlane.xlu0 %864  ;;  %v964_v22 = vcvt.s32.f32 %v962_v37  ;;  %v947_v17 = vshra.s32 %v945_v14, 16  ;;  %v946_v42 = vand.u32 65535, %v945_v14 }
 0x5a1   : > { %vm875_vm1 = vcmp.eq.f32.partialorder %v4692_v57, %v865_v18  ;;  %v990_v23 = vsel %vm492_vm2, %v884_v15, 2147483647  ;;  %v963_v3 = vcvt.s32.f32 %v961_v63 }
 0x5a2   : > { %v883_v24 = vsel %vm875_vm1, %v4502_v49, 64  ;;  %965 = vmin.xlane.f32.xlu1 %v964_v22  ;;  %v949_v28 = vcvt.s32.f32 %v947_v17  ;;  %v992_v48 = vshra.s32 %v990_v23, 16  ;;  %v991_v37 = vand.u32 65535, %v990_v23 }
 0x5a3   : > { %v975_v33 = vsel %vm492_vm2, %v883_v24, 2147483647  ;;  %v948_v15 = vcvt.s32.f32 %v946_v42 }
 0x5a4   : > { %950 = vmin.xlane.f32.xlu0 %v949_v28  ;;  %v994_v34 = vcvt.s32.f32 %v992_v48  ;;  %v977_v35 = vshra.s32 %v975_v33, 16  ;;  %v976_v18 = vand.u32 65535, %v975_v33  ;;  %v993_v17 = vcvt.s32.f32 %v991_v37 }
 0x5a6   : > { %995 = vmin.xlane.f32.xlu1 %v994_v34  ;;  %v979_v36 = vcvt.s32.f32 %v977_v35 }
 0x5a8   : > { %980 = vmin.xlane.f32.xlu0 %v979_v36 }
 0x623   : > { %v906_v1 = vpop.xlane.xlu1 %905 }
 0x624   : > { %vm907_vm3 = vcmp.eq.f32.partialorder %v904_v47, %v906_v1  ;;  %v912_v23 = vcvt.f32.s32 %v906_v1 }
 0x625   : > { %v891_v43 = vpop.xlane.xlu0 %890  ;;  %v908_v45 = vsel %vm907_vm3, %v903_v6, inf }
 0x626   : > { %909 = vmin.xlane.f32.xlu1 %v908_v45  ;;  %vm892_vm4 = vcmp.eq.f32.partialorder %v889_v16, %v891_v43  ;;  %v913_v40 = vshll.u32 %v912_v23, 16 }
 0x627   : > { %v936_v56 = vpop.xlane.xlu1 %935  ;;  %v893_v61 = vsel %vm892_vm4, %v888_v51, inf }
 0x628   : > { %894 = vmin.xlane.f32.xlu0 %v893_v61  ;;  %vm937_vm5 = vcmp.eq.f32.partialorder %v934_v4, %v936_v56  ;;  %v942_v0 = vcvt.f32.s32 %v936_v56 }
 0x629   : > { %v921_v30 = vpop.xlane.xlu0 %920  ;;  %v938_v11 = vsel %vm937_vm5, %v933_v44, inf }
 0x62a   : > { %939 = vmin.xlane.f32.xlu1 %v938_v11  ;;  %vm922_vm6 = vcmp.eq.f32.partialorder %v919_v46, %v921_v30  ;;  %v978_v46 = vcvt.s32.f32 %v976_v18  ;;  %v927_v6 = vcvt.f32.s32 %v921_v30  ;;  %v943_v61 = vshll.u32 %v942_v0, 16 }
 0x62b   : > { %v966_v8 = vpop.xlane.xlu1 %965  ;;  %v923_v47 = vsel %vm922_vm6, %v918_v39, inf }
 0x62c   : > { %924 = vmin.xlane.f32.xlu0 %v923_v47  ;;  %vm967_vm7 = vcmp.eq.f32.partialorder %v964_v22, %v966_v8  ;;  %v897_v22 = vcvt.f32.s32 %v891_v43  ;;  %v928_v1 = vshll.u32 %v927_v6, 16 }
 0x62d   : > { %v951_v62 = vpop.xlane.xlu0 %950  ;;  %v968_v16 = vsel %vm967_vm7, %v963_v3, inf }
 0x62e   : > { %969 = vmin.xlane.f32.xlu1 %v968_v16  ;;  %vm952_vm8 = vcmp.eq.f32.partialorder %v949_v28, %v951_v62  ;;  %v898_v9 = vshll.u32 %v897_v22, 16  ;;  %v957_v43 = vcvt.f32.s32 %v951_v62 }
 0x62f   : > { %v996_v10 = vpop.xlane.xlu1 %995  ;;  %v953_v4 = vsel %vm952_vm8, %v948_v15, inf }
 0x630   : > { %954 = vmin.xlane.f32.xlu0 %v953_v4  ;;  %vm997_vm9 = vcmp.eq.f32.partialorder %v994_v34, %v996_v10  ;;  %v972_v34 = vcvt.f32.s32 %v966_v8  ;;  %v1002_v8 = vcvt.f32.s32 %v996_v10  ;;  %v958_v16 = vshll.u32 %v957_v43, 16 }
 0x631   : > { %v981_v14 = vpop.xlane.xlu0 %980  ;;  %v998_v24 = vsel %vm997_vm9, %v993_v17, inf }
 0x632   : > { %999 = vmin.xlane.f32.xlu1 %v998_v24  ;;  %vm982_vm10 = vcmp.eq.f32.partialorder %v979_v36, %v981_v14  ;;  %v973_v42 = vshll.u32 %v972_v34, 16  ;;  %v987_v15 = vcvt.f32.s32 %v981_v14  ;;  %v1003_v24 = vshll.u32 %v1002_v8, 16 }
 0x633   : > { %v983_v48 = vsel %vm982_vm10, %v978_v46, inf }
 0x634   : > { %984 = vmin.xlane.f32.xlu0 %v983_v48  ;;  %v988_v22 = vshll.u32 %v987_v15, 16 }
 0x6af   : > { %v910_v35 = vpop.xlane.xlu1 %909 }
 0x6b0   : > { %v911_v33 = vcvt.f32.s32 %v910_v35 }
 0x6b1   : > { %v895_v28 = vpop.xlane.xlu0 %894 }
 0x6b2   : > { %v4720_v45 = vadd.s32 %v913_v40, %v911_v33  ;;  %v896_v51 = vcvt.f32.s32 %v895_v28 }
 0x6b3   : > { %v940_v53 = vpop.xlane.xlu1 %939 }
 0x6b4   : > { %6099 = vst [vmem:[#allocation22_spill] sm:$0xff] %v4720_v45  ;;  %v4722_v44 = vadd.s32 %v898_v9, %v896_v51  ;;  %v941_v36 = vcvt.f32.s32 %v940_v53  ;;  %vm1006_vm11 = vcmp.eq.s32.totalorder %v4502_v49, %v4720_v45 }
 0x6b5   : > { %v925_v63 = vpop.xlane.xlu0 %924  ;;  %v4727_v56 = vsel %vm1006_vm11, -inf, %v4631_v59 }
 0x6b6   : > { %6100 = vst [vmem:[#allocation23_spill] sm:$0xff] %v4722_v44  ;;  %v4729_v30 = vadd.s32 %v943_v61, %v941_v36  ;;  %v926_v11 = vcvt.f32.s32 %v925_v63  ;;  %v1024_v39 = vsel %vm492_vm2, %v4727_v56, -inf  ;;  %vm1005_vm12 = vcmp.eq.s32.totalorder %v4502_v49, %v4722_v44 }
 0x6b7   : > { %1025 = vmax.xlane.f32.xlu1 %v1024_v39  ;;  %v970_v47 = vpop.xlane.xlu1 %969  ;;  %v4736_v3 = vsel %vm1005_vm12, -inf, %v4640_v5 }
 0x6b8   : > { %v4738_v37 = vadd.s32 %v928_v1, %v926_v11  ;;  %v971_v59 = vcvt.f32.s32 %v970_v47  ;;  %v1021_v62 = vsel %vm492_vm2, %v4736_v3, -inf  ;;  %vm1008_vm13 = vcmp.eq.s32.totalorder %v4502_v49, %v4729_v30 }
 0x6b9   : > { %1022 = vmax.xlane.f32.xlu0 %v1021_v62  ;;  %v955_v18 = vpop.xlane.xlu0 %954  ;;  %v4745_v10 = vsel %vm1008_vm13, -inf, %v4649_v13 }
 0x6ba   : > { %v4747_v4 = vadd.s32 %v973_v42, %v971_v59  ;;  %v956_v5 = vcvt.f32.s32 %v955_v18  ;;  %v1030_v17 = vsel %vm492_vm2, %v4745_v10, -inf  ;;  %vm1007_vm14 = vcmp.eq.s32.totalorder %v4502_v49, %v4738_v37 }
 0x6bb   : > { %1031 = vmax.xlane.f32.xlu1 %v1030_v17  ;;  %v1000_v46 = vpop.xlane.xlu1 %999  ;;  %v4754_v48 = vsel %vm1007_vm14, -inf, %v4658_v19 }
 0x6bc   : > { %v4756_v14 = vadd.s32 %v958_v16, %v956_v5  ;;  %v1001_v23 = vcvt.f32.s32 %v1000_v46  ;;  %v1027_v13 = vsel %vm492_vm2, %v4754_v48, -inf  ;;  %vm1010_vm15 = vcmp.eq.s32.totalorder %v4502_v49, %v4747_v4 }
 0x6bd   : > { %1028 = vmax.xlane.f32.xlu0 %v1027_v13  ;;  %v985_v35 = vpop.xlane.xlu0 %984  ;;  %v4763_v40 = vsel %vm1010_vm15, -inf, %v4667_v26 }
 0x6be   : > { %v4765_v0 = vadd.s32 %v1003_v24, %v1001_v23  ;;  %v986_v33 = vcvt.f32.s32 %v985_v35  ;;  %v1036_v19 = vsel %vm492_vm2, %v4763_v40, -inf  ;;  %vm1009_vm1 = vcmp.eq.s32.totalorder %v4502_v49, %v4756_v14 }
 0x6bf   : > { %1037 = vmax.xlane.f32.xlu1 %v1036_v19  ;;  %v4772_v6 = vsel %vm1009_vm1, -inf, %v4676_v29 }
 0x6c0   : > { %v4774_v28 = vadd.s32 %v988_v22, %v986_v33  ;;  %v1033_v9 = vsel %vm492_vm2, %v4772_v6, -inf  ;;  %vm1012_vm3 = vcmp.eq.s32.totalorder %v4502_v49, %v4765_v0 }
 0x6c1   : > { %1034 = vmax.xlane.f32.xlu0 %v1033_v9  ;;  %v4781_v26 = vsel %vm1012_vm3, -inf, %v4685_v54 }
 0x6c2   : > { %v1042_v51 = vsel %vm492_vm2, %v4781_v26, -inf  ;;  %vm1011_vm4 = vcmp.eq.s32.totalorder %v4502_v49, %v4774_v28 }
 0x6c3   : > { %1043 = vmax.xlane.f32.xlu1 %v1042_v51  ;;  %v4788_v29 = vsel %vm1011_vm4, -inf, %v4692_v57 }
 0x6c4   : > { %v1039_v34 = vsel %vm492_vm2, %v4788_v29, -inf }
 0x6c5   : > { %1040 = vmax.xlane.f32.xlu0 %v1039_v34 }
 0x740   : > { %v1026_v53 = vpop.xlane.xlu1 %1025 }
 0x741   : > { %vm1046_vm5 = vcmp.eq.f32.partialorder %v4727_v56, %v1026_v53 }
 0x742   : > { %v1054_v54 = vsel %vm1046_vm5, %v4502_v49, 64  ;;  %v1023_v61 = vpop.xlane.xlu0 %1022 }
 0x743   : > { %vm1045_vm6 = vcmp.eq.f32.partialorder %v4736_v3, %v1023_v61  ;;  %v1076_v36 = vsel %vm492_vm2, %v1054_v54, 2147483647 }
 0x744   : > { %v1053_v1 = vsel %vm1045_vm6, %v4502_v49, 64  ;;  %v1032_v43 = vpop.xlane.xlu1 %1031  ;;  %v1078_v63 = vshra.s32 %v1076_v36, 16 }
 0x745   : > { %vm1048_vm7 = vcmp.eq.f32.partialorder %v4745_v10, %v1032_v43  ;;  %v1061_v57 = vsel %vm492_vm2, %v1053_v1, 2147483647 }
 0x746   : > { %v1056_v11 = vsel %vm1048_vm7, %v4502_v49, 64  ;;  %v1029_v39 = vpop.xlane.xlu0 %1028  ;;  %v1080_v42 = vcvt.s32.f32 %v1078_v63  ;;  %v1063_v8 = vshra.s32 %v1061_v57, 16 }
 0x747   : > { %vm1047_vm8 = vcmp.eq.f32.partialorder %v4754_v48, %v1029_v39  ;;  %v1106_v47 = vsel %vm492_vm2, %v1056_v11, 2147483647 }
 0x748   : > { %v1055_v59 = vsel %vm1047_vm8, %v4502_v49, 64  ;;  %1081 = vmin.xlane.f32.xlu1 %v1080_v42  ;;  %v1038_v62 = vpop.xlane.xlu1 %1037  ;;  %v1065_v16 = vcvt.s32.f32 %v1063_v8  ;;  %v1108_v15 = vshra.s32 %v1106_v47, 16 }
 0x749   : > { %vm1050_vm9 = vcmp.eq.f32.partialorder %v4763_v40, %v1038_v62  ;;  %v1091_v18 = vsel %vm492_vm2, %v1055_v59, 2147483647  ;;  %v1077_v59 = vand.u32 65535, %v1076_v36  ;;  %v1062_v62 = vand.u32 65535, %v1061_v57 }
 0x74a   : > { %v1058_v5 = vsel %vm1050_vm9, %v4502_v49, 64  ;;  %1066 = vmin.xlane.f32.xlu0 %v1065_v16  ;;  %v1035_v17 = vpop.xlane.xlu0 %1034  ;;  %v1110_v24 = vcvt.s32.f32 %v1108_v15  ;;  %v1093_v46 = vshra.s32 %v1091_v18, 16  ;;  %v1107_v15 = vand.u32 65535, %v1106_v47 }
 0x74b   : > { %vm1049_vm10 = vcmp.eq.f32.partialorder %v4772_v6, %v1035_v17  ;;  %v1136_v23 = vsel %vm492_vm2, %v1058_v5, 2147483647  ;;  %v1079_v17 = vcvt.s32.f32 %v1077_v59 }
 0x74c   : > { %v1057_v13 = vsel %vm1049_vm10, %v4502_v49, 64  ;;  %1111 = vmin.xlane.f32.xlu1 %v1110_v24  ;;  %v1044_v22 = vpop.xlane.xlu1 %1043  ;;  %v1095_v35 = vcvt.s32.f32 %v1093_v46  ;;  %v1138_v33 = vshra.s32 %v1136_v23, 16  ;;  %v1092_v46 = vand.u32 65535, %v1091_v18 }
 0x74d   : > { %vm1052_vm11 = vcmp.eq.f32.partialorder %v4781_v26, %v1044_v22  ;;  %v1121_v19 = vsel %vm492_vm2, %v1057_v13, 2147483647 }
 0x74e   : > { %v1060_v9 = vsel %vm1052_vm11, %v4502_v49, 64  ;;  %1096 = vmin.xlane.f32.xlu0 %v1095_v35  ;;  %v1041_v51 = vpop.xlane.xlu0 %1040  ;;  %v1140_v34 = vcvt.s32.f32 %v1138_v33  ;;  %v1123_v53 = vshra.s32 %v1121_v19, 16  ;;  %v1064_v33 = vcvt.s32.f32 %v1062_v62 }
 0x74f   : > { %vm1051_vm12 = vcmp.eq.f32.partialorder %v4788_v29, %v1041_v51  ;;  %v1166_v54 = vsel %vm492_vm2, %v1060_v9, 2147483647  ;;  %v1137_v9 = vand.u32 65535, %v1136_v23  ;;  %v1094_v57 = vcvt.s32.f32 %v1092_v46 }
 0x750   : > { %v1059_v61 = vsel %vm1051_vm12, %v4502_v49, 64  ;;  %1141 = vmin.xlane.f32.xlu1 %v1140_v34  ;;  %v1125_v1 = vcvt.s32.f32 %v1123_v53  ;;  %v1168_v43 = vshra.s32 %v1166_v54, 16  ;;  %v1167_v47 = vand.u32 65535, %v1166_v54 }
 0x751   : > { %v1151_v63 = vsel %vm492_vm2, %v1059_v61, 2147483647  ;;  %v1109_v61 = vcvt.s32.f32 %v1107_v15  ;;  %v1139_v59 = vcvt.s32.f32 %v1137_v9 }
 0x752   : > { %1126 = vmin.xlane.f32.xlu0 %v1125_v1  ;;  %v1170_v11 = vcvt.s32.f32 %v1168_v43  ;;  %v1153_v39 = vshra.s32 %v1151_v63, 16  ;;  %v1122_v43 = vand.u32 65535, %v1121_v19  ;;  %v1152_v62 = vand.u32 65535, %v1151_v63 }
 0x753   : > { %v1169_v19 = vcvt.s32.f32 %v1167_v47 }
 0x754   : > { %1171 = vmin.xlane.f32.xlu1 %v1170_v11  ;;  %v1155_v8 = vcvt.s32.f32 %v1153_v39 }
 0x756   : > { %1156 = vmin.xlane.f32.xlu0 %v1155_v8 }
 0x7d1   : > { %v1082_v5 = vpop.xlane.xlu1 %1081 }
 0x7d2   : > { %vm1083_vm13 = vcmp.eq.f32.partialorder %v1080_v42, %v1082_v5 }
 0x7d3   : > { %v1067_v13 = vpop.xlane.xlu0 %1066  ;;  %v1084_v22 = vsel %vm1083_vm13, %v1079_v17, inf  ;;  %v1124_v17 = vcvt.s32.f32 %v1122_v43 }
 0x7d4   : > { %1085 = vmin.xlane.f32.xlu1 %v1084_v22  ;;  %vm1068_vm14 = vcmp.eq.f32.partialorder %v1065_v16, %v1067_v13 }
 0x7d5   : > { %v1112_v51 = vpop.xlane.xlu1 %1111  ;;  %v1069_v53 = vsel %vm1068_vm14, %v1064_v33, inf  ;;  %v1088_v33 = vcvt.f32.s32 %v1082_v5 }
 0x7d6   : > { %1070 = vmin.xlane.f32.xlu0 %v1069_v53  ;;  %vm1113_vm15 = vcmp.eq.f32.partialorder %v1110_v24, %v1112_v51  ;;  %v1118_v53 = vcvt.f32.s32 %v1112_v51 }
 0x7d7   : > { %v1097_v39 = vpop.xlane.xlu0 %1096  ;;  %v1114_v36 = vsel %vm1113_vm15, %v1109_v61, inf  ;;  %v1089_v9 = vshll.u32 %v1088_v33, 16 }
 0x7d8   : > { %1115 = vmin.xlane.f32.xlu1 %v1114_v36  ;;  %vm1098_vm1 = vcmp.eq.f32.partialorder %v1095_v35, %v1097_v39  ;;  %v1154_v35 = vcvt.s32.f32 %v1152_v62  ;;  %v1103_v43 = vcvt.f32.s32 %v1097_v39 }
 0x7d9   : > { %v1142_v42 = vpop.xlane.xlu1 %1141  ;;  %v1099_v18 = vsel %vm1098_vm1, %v1094_v57, inf }
 0x7da   : > { %1100 = vmin.xlane.f32.xlu0 %v1099_v18  ;;  %vm1143_vm3 = vcmp.eq.f32.partialorder %v1140_v34, %v1142_v42  ;;  %v1073_v34 = vcvt.f32.s32 %v1067_v13  ;;  %v1104_v5 = vshll.u32 %v1103_v43, 16 }
 0x7db   : > { %v1127_v16 = vpop.xlane.xlu0 %1126  ;;  %v1144_v23 = vsel %vm1143_vm3, %v1139_v59, inf  ;;  %v1119_v59 = vshll.u32 %v1118_v53, 16 }
 0x7dc   : > { %1145 = vmin.xlane.f32.xlu1 %v1144_v23  ;;  %vm1128_vm4 = vcmp.eq.f32.partialorder %v1125_v1, %v1127_v16  ;;  %v1074_v36 = vshll.u32 %v1073_v34, 16  ;;  %v1133_v13 = vcvt.f32.s32 %v1127_v16 }
 0x7dd   : > { %v1172_v15 = vpop.xlane.xlu1 %1171  ;;  %v1129_v24 = vsel %vm1128_vm4, %v1124_v17, inf }
 0x7de   : > { %1130 = vmin.xlane.f32.xlu0 %v1129_v24  ;;  %vm1173_vm5 = vcmp.eq.f32.partialorder %v1170_v11, %v1172_v15  ;;  %v1148_v11 = vcvt.f32.s32 %v1142_v42  ;;  %v1134_v33 = vshll.u32 %v1133_v13, 16 }
 0x7df   : > { %v1157_v46 = vpop.xlane.xlu0 %1156  ;;  %v1174_v22 = vsel %vm1173_vm5, %v1169_v19, inf  ;;  %v1178_v19 = vcvt.f32.s32 %v1172_v15 }
 0x7e0   : > { %1175 = vmin.xlane.f32.xlu1 %v1174_v22  ;;  %vm1158_vm6 = vcmp.eq.f32.partialorder %v1155_v8, %v1157_v46  ;;  %v1149_v24 = vshll.u32 %v1148_v11, 16  ;;  %v1163_v34 = vcvt.f32.s32 %v1157_v46 }
 0x7e1   : > { %v1159_v54 = vsel %vm1158_vm6, %v1154_v35, inf }
 0x7e2   : > { %1160 = vmin.xlane.f32.xlu0 %v1159_v54 }
 0x85d   : > { %v1086_v63 = vpop.xlane.xlu1 %1085 }
 0x85e   : > { %v1087_v61 = vcvt.f32.s32 %v1086_v63 }
 0x85f   : > { %v1071_v1 = vpop.xlane.xlu0 %1070 }
 0x860   : > { %v4816_v57 = vadd.s32 %v1089_v9, %v1087_v61  ;;  %v1072_v47 = vcvt.f32.s32 %v1071_v1  ;;  %v1179_v61 = vshll.u32 %v1178_v19, 16 }
 0x861   : > { %v1116_v18 = vpop.xlane.xlu1 %1115 }
 0x862   : > { %v4818_v62 = vadd.s32 %v1074_v36, %v1072_v47  ;;  %v1117_v8 = vcvt.f32.s32 %v1116_v18  ;;  %vm1182_vm7 = vcmp.eq.s32.totalorder %v4502_v49, %v4816_v57  ;;  %v1164_v47 = vshll.u32 %v1163_v34, 16 }
 0x863   : > { %v1101_v23 = vpop.xlane.xlu0 %1100  ;;  %v4823_v51 = vsel %vm1182_vm7, -inf, %v4727_v56 }
 0x864   : > { %v4825_v39 = vadd.s32 %v1119_v59, %v1117_v8  ;;  %v1102_v17 = vcvt.f32.s32 %v1101_v23  ;;  %v1200_v42 = vsel %vm492_vm2, %v4823_v51, -inf  ;;  %vm1181_vm8 = vcmp.eq.s32.totalorder %v4502_v49, %v4818_v62 }
 0x865   : > { %1201 = vmax.xlane.f32.xlu1 %v1200_v42  ;;  %v1146_v22 = vpop.xlane.xlu1 %1145  ;;  %v4832_v35 = vsel %vm1181_vm8, -inf, %v4736_v3 }
 0x866   : > { %v4834_v16 = vadd.s32 %v1104_v5, %v1102_v17  ;;  %v1147_v56 = vcvt.f32.s32 %v1146_v22  ;;  %v1197_v54 = vsel %vm492_vm2, %v4832_v35, -inf  ;;  %vm1184_vm9 = vcmp.eq.s32.totalorder %v4502_v49, %v4825_v39 }
 0x867   : > { %1198 = vmax.xlane.f32.xlu0 %v1197_v54  ;;  %v1131_v63 = vpop.xlane.xlu0 %1130  ;;  %v4841_v15 = vsel %vm1184_vm9, -inf, %v4745_v10 }
 0x868   : > { %v4843_v9 = vadd.s32 %v1149_v24, %v1147_v56  ;;  %v1132_v3 = vcvt.f32.s32 %v1131_v63  ;;  %v1206_v53 = vsel %vm492_vm2, %v4841_v15, -inf  ;;  %vm1183_vm10 = vcmp.eq.s32.totalorder %v4502_v49, %v4834_v16 }
 0x869   : > { %1207 = vmax.xlane.f32.xlu1 %v1206_v53  ;;  %v1176_v43 = vpop.xlane.xlu1 %1175  ;;  %v4850_v1 = vsel %vm1183_vm10, -inf, %v4754_v48 }
 0x86a   : > { %v4852_v46 = vadd.s32 %v1134_v33, %v1132_v3  ;;  %v1177_v36 = vcvt.f32.s32 %v1176_v43  ;;  %v1203_v10 = vsel %vm492_vm2, %v4850_v1, -inf  ;;  %vm1186_vm11 = vcmp.eq.s32.totalorder %v4502_v49, %v4843_v9 }
 0x86b   : > { %1204 = vmax.xlane.f32.xlu0 %v1203_v10  ;;  %v1161_v11 = vpop.xlane.xlu0 %1160  ;;  %v4859_v18 = vsel %vm1186_vm11, -inf, %v4763_v40 }
 0x86c   : > { %v4861_v59 = vadd.s32 %v1179_v61, %v1177_v36  ;;  %v1162_v8 = vcvt.f32.s32 %v1161_v11  ;;  %v1212_v48 = vsel %vm492_vm2, %v4859_v18, -inf  ;;  %vm1185_vm12 = vcmp.eq.s32.totalorder %v4502_v49, %v4852_v46 }
 0x86d   : > { %1213 = vmax.xlane.f32.xlu1 %v1212_v48  ;;  %v4868_v5 = vsel %vm1185_vm12, -inf, %v4772_v6 }
 0x86e   : > { %v4870_v13 = vadd.s32 %v1164_v47, %v1162_v8  ;;  %v1209_v23 = vsel %vm492_vm2, %v4868_v5, -inf  ;;  %vm1188_vm13 = vcmp.eq.s32.totalorder %v4502_v49, %v4861_v59 }
 0x86f   : > { %1210 = vmax.xlane.f32.xlu0 %v1209_v23  ;;  %v4877_v40 = vsel %vm1188_vm13, -inf, %v4781_v26 }
 0x870   : > { %v1218_v17 = vsel %vm492_vm2, %v4877_v40, -inf  ;;  %vm1187_vm14 = vcmp.eq.s32.totalorder %v4502_v49, %v4870_v13 }
 0x871   : > { %1219 = vmax.xlane.f32.xlu1 %v1218_v17  ;;  %v4884_v6 = vsel %vm1187_vm14, -inf, %v4788_v29 }
 0x872   : > { %v1215_v42 = vsel %vm492_vm2, %v4884_v6, -inf }
 0x873   : > { %1216 = vmax.xlane.f32.xlu0 %v1215_v42 }
 0x8ee   : > { %v1202_v24 = vpop.xlane.xlu1 %1201 }
 0x8ef   : > { %vm1222_vm15 = vcmp.eq.f32.partialorder %v4823_v51, %v1202_v24 }
 0x8f0   : > { %v1230_v26 = vsel %vm1222_vm15, %v4502_v49, 64  ;;  %v1199_v19 = vpop.xlane.xlu0 %1198 }
 0x8f1   : > { %v1252_v22 = vsel %vm492_vm2, %v1230_v26, 2147483647  ;;  %vm1221_vm1 = vcmp.eq.f32.partialorder %v4832_v35, %v1199_v19 }
 0x8f2   : > { %v1229_v56 = vsel %vm1221_vm1, %v4502_v49, 64  ;;  %v1208_v54 = vpop.xlane.xlu1 %1207  ;;  %v1254_v33 = vshra.s32 %v1252_v22, 16  ;;  %v1253_v44 = vand.u32 65535, %v1252_v22 }
 0x8f3   : > { %v1237_v29 = vsel %vm492_vm2, %v1229_v56, 2147483647  ;;  %vm1224_vm3 = vcmp.eq.f32.partialorder %v4841_v15, %v1208_v54 }
 0x8f4   : > { %v1232_v34 = vsel %vm1224_vm3, %v4502_v49, 64  ;;  %v1205_v63 = vpop.xlane.xlu0 %1204  ;;  %v1256_v3 = vcvt.s32.f32 %v1254_v33  ;;  %v1239_v53 = vshra.s32 %v1237_v29, 16  ;;  %v1255_v27 = vcvt.s32.f32 %v1253_v44 }
 0x8f5   : > { %v1282_v61 = vsel %vm492_vm2, %v1232_v34, 2147483647  ;;  %vm1223_vm4 = vcmp.eq.f32.partialorder %v4850_v1, %v1205_v63 }
 0x8f6   : > { %v1231_v43 = vsel %vm1223_vm4, %v4502_v49, 64  ;;  %1257 = vmin.xlane.f32.xlu1 %v1256_v3  ;;  %v1214_v36 = vpop.xlane.xlu1 %1213  ;;  %v1241_v10 = vcvt.s32.f32 %v1239_v53  ;;  %v1284_v47 = vshra.s32 %v1282_v61, 16 }
 0x8f7   : > { %v1267_v11 = vsel %vm492_vm2, %v1231_v43, 2147483647  ;;  %vm1226_vm5 = vcmp.eq.f32.partialorder %v4859_v18, %v1214_v36 }
 0x8f8   : > { %v1234_v8 = vsel %vm1226_vm5, %v4502_v49, 64  ;;  %1242 = vmin.xlane.f32.xlu0 %v1241_v10  ;;  %v1211_v48 = vpop.xlane.xlu0 %1210  ;;  %v1286_v23 = vcvt.s32.f32 %v1284_v47  ;;  %v1269_v17 = vshra.s32 %v1267_v11, 16  ;;  %v1268_v21 = vand.u32 65535, %v1267_v11 }
 0x8f9   : > { %v1312_v42 = vsel %vm492_vm2, %v1234_v8, 2147483647  ;;  %vm1225_vm6 = vcmp.eq.f32.partialorder %v4868_v5, %v1211_v48 }
 0x8fa   : > { %v1233_v24 = vsel %vm1225_vm6, %v4502_v49, 64  ;;  %1287 = vmin.xlane.f32.xlu1 %v1286_v23  ;;  %v1220_v26 = vpop.xlane.xlu1 %1219  ;;  %v1271_v19 = vcvt.s32.f32 %v1269_v17  ;;  %v1314_v56 = vshra.s32 %v1312_v42, 16  ;;  %v1270_v22 = vcvt.s32.f32 %v1268_v21 }
 0x8fb   : > { %v1297_v54 = vsel %vm492_vm2, %v1233_v24, 2147483647  ;;  %vm1228_vm7 = vcmp.eq.f32.partialorder %v4877_v40, %v1220_v26 }
 0x8fc   : > { %v1236_v33 = vsel %vm1228_vm7, %v4502_v49, 64  ;;  %1272 = vmin.xlane.f32.xlu0 %v1271_v19  ;;  %v1217_v34 = vpop.xlane.xlu0 %1216  ;;  %v1316_v63 = vcvt.s32.f32 %v1314_v56  ;;  %v1299_v53 = vshra.s32 %v1297_v54, 16  ;;  %v1238_v56 = vand.u32 65535, %v1237_v29 }
 0x8fd   : > { %v1342_v43 = vsel %vm492_vm2, %v1236_v33, 2147483647  ;;  %vm1227_vm8 = vcmp.eq.f32.partialorder %v4884_v6, %v1217_v34  ;;  %v1283_v33 = vand.u32 65535, %v1282_v61  ;;  %v1298_v29 = vand.u32 65535, %v1297_v54 }
 0x8fe   : > { %v1235_v36 = vsel %vm1227_vm8, %v4502_v49, 64  ;;  %1317 = vmin.xlane.f32.xlu1 %v1316_v63  ;;  %v1301_v47 = vcvt.s32.f32 %v1299_v53  ;;  %v1344_v8 = vshra.s32 %v1342_v43, 16  ;;  %v1240_v12 = vcvt.s32.f32 %v1238_v56 }
 0x8ff   : > { %v1327_v48 = vsel %vm492_vm2, %v1235_v36, 2147483647  ;;  %v1285_v60 = vcvt.s32.f32 %v1283_v33  ;;  %v1300_v11 = vcvt.s32.f32 %v1298_v29 }
 0x900   : > { %1302 = vmin.xlane.f32.xlu0 %v1301_v47  ;;  %v1346_v17 = vcvt.s32.f32 %v1344_v8  ;;  %v1329_v24 = vshra.s32 %v1327_v48, 16  ;;  %v1313_v8 = vand.u32 65535, %v1312_v42 }
 0x902   : > { %1347 = vmin.xlane.f32.xlu1 %v1346_v17  ;;  %v1331_v26 = vcvt.s32.f32 %v1329_v24  ;;  %v1315_v61 = vcvt.s32.f32 %v1313_v8 }
 0x904   : > { %1332 = vmin.xlane.f32.xlu0 %v1331_v26 }
 0x97f   : > { %v1258_v45 = vpop.xlane.xlu1 %1257 }
 0x980   : > { %vm1259_vm9 = vcmp.eq.f32.partialorder %v1256_v3, %v1258_v45  ;;  %v1264_v54 = vcvt.f32.s32 %v1258_v45 }
 0x981   : > { %v1243_v34 = vpop.xlane.xlu0 %1242  ;;  %v1260_v32 = vsel %vm1259_vm9, %v1255_v27, inf  ;;  %v1343_v27 = vand.u32 65535, %v1342_v43 }
 0x982   : > { %1261 = vmin.xlane.f32.xlu1 %v1260_v32  ;;  %vm1244_vm10 = vcmp.eq.f32.partialorder %v1241_v10, %v1243_v34  ;;  %v1265_v33 = vshll.u32 %v1264_v54, 16 }
 0x983   : > { %v1288_v53 = vpop.xlane.xlu1 %1287  ;;  %v1245_v36 = vsel %vm1244_vm10, %v1240_v12, inf  ;;  %v1328_v12 = vand.u32 65535, %v1327_v48  ;;  %v1345_v56 = vcvt.s32.f32 %v1343_v27 }
 0x984   : > { %1246 = vmin.xlane.f32.xlu0 %v1245_v36  ;;  %vm1289_vm11 = vcmp.eq.f32.partialorder %v1286_v23, %v1288_v53  ;;  %v1294_v36 = vcvt.f32.s32 %v1288_v53 }
 0x985   : > { %v1273_v24 = vpop.xlane.xlu0 %1272  ;;  %v1290_v7 = vsel %vm1289_vm11, %v1285_v60, inf  ;;  %v1330_v21 = vcvt.s32.f32 %v1328_v12 }
 0x986   : > { %1291 = vmin.xlane.f32.xlu1 %v1290_v7  ;;  %vm1274_vm12 = vcmp.eq.f32.partialorder %v1271_v19, %v1273_v24  ;;  %v1279_v8 = vcvt.f32.s32 %v1273_v24  ;;  %v1295_v27 = vshll.u32 %v1294_v36, 16 }
 0x987   : > { %v1318_v44 = vpop.xlane.xlu1 %1317  ;;  %v1275_v3 = vsel %vm1274_vm12, %v1270_v22, inf }
 0x988   : > { %1276 = vmin.xlane.f32.xlu0 %v1275_v3  ;;  %vm1319_vm13 = vcmp.eq.f32.partialorder %v1316_v63, %v1318_v44  ;;  %v1249_v63 = vcvt.f32.s32 %v1243_v34  ;;  %v1280_v45 = vshll.u32 %v1279_v8, 16 }
 0x989   : > { %v1303_v32 = vpop.xlane.xlu0 %1302  ;;  %v1320_v10 = vsel %vm1319_vm13, %v1315_v61, inf }
 0x98a   : > { %1321 = vmin.xlane.f32.xlu1 %v1320_v10  ;;  %vm1304_vm14 = vcmp.eq.f32.partialorder %v1301_v47, %v1303_v32  ;;  %v1250_v22 = vshll.u32 %v1249_v63, 16  ;;  %v1309_v34 = vcvt.f32.s32 %v1303_v32 }
 0x98b   : > { %v1348_v42 = vpop.xlane.xlu1 %1347  ;;  %v1305_v23 = vsel %vm1304_vm14, %v1300_v11, inf }
 0x98c   : > { %1306 = vmin.xlane.f32.xlu0 %v1305_v23  ;;  %vm1349_vm15 = vcmp.eq.f32.partialorder %v1346_v17, %v1348_v42  ;;  %v1324_v17 = vcvt.f32.s32 %v1318_v44  ;;  %v1310_v54 = vshll.u32 %v1309_v34, 16 }
 0x98d   : > { %v1333_v60 = vpop.xlane.xlu0 %1332  ;;  %v1350_v7 = vsel %vm1349_vm15, %v1345_v56, inf  ;;  %v1354_v56 = vcvt.f32.s32 %v1348_v42 }
 0x98e   : > { %1351 = vmin.xlane.f32.xlu1 %v1350_v7  ;;  %vm1334_vm1 = vcmp.eq.f32.partialorder %v1331_v26, %v1333_v60  ;;  %v1325_v23 = vshll.u32 %v1324_v17, 16  ;;  %v1339_v63 = vcvt.f32.s32 %v1333_v60 }
 0x98f   : > { %v1335_v19 = vsel %vm1334_vm1, %v1330_v21, inf }
 0x990   : > { %1336 = vmin.xlane.f32.xlu0 %v1335_v19 }
 0xa0b   : > { %v1262_v43 = vpop.xlane.xlu1 %1261 }
 0xa0c   : > { %v1263_v48 = vcvt.f32.s32 %v1262_v43 }
 0xa0d   : > { %v1247_v47 = vpop.xlane.xlu0 %1246 }
 0xa0e   : > { %v4912_v29 = vadd.s32 %v1265_v33, %v1263_v48  ;;  %v1248_v3 = vcvt.f32.s32 %v1247_v47  ;;  %v1355_v48 = vshll.u32 %v1354_v56, 16 }
 0xa0f   : > { %v1292_v61 = vpop.xlane.xlu1 %1291 }
 0xa10   : > { %v4914_v10 = vadd.s32 %v1250_v22, %v1248_v3  ;;  %v1293_v26 = vcvt.f32.s32 %v1292_v61  ;;  %vm1358_vm3 = vcmp.eq.s32.totalorder %v4502_v49, %v4912_v29  ;;  %v1340_v3 = vshll.u32 %v1339_v63, 16 }
 0xa11   : > { %v1277_v11 = vpop.xlane.xlu0 %1276  ;;  %v4919_v53 = vsel %vm1358_vm3, -inf, %v4823_v51 }
 0xa12   : > { %v4921_v24 = vadd.s32 %v1295_v27, %v1293_v26  ;;  %v1278_v12 = vcvt.f32.s32 %v1277_v11  ;;  %v1376_v44 = vsel %vm492_vm2, %v4919_v53, -inf  ;;  %vm1357_vm4 = vcmp.eq.s32.totalorder %v4502_v49, %v4914_v10 }
 0xa13   : > { %1377 = vmax.xlane.f32.xlu1 %v1376_v44  ;;  %v1322_v7 = vpop.xlane.xlu1 %1321  ;;  %v4928_v21 = vsel %vm1357_vm4, -inf, %v4832_v35 }
 0xa14   : > { %v4930_v32 = vadd.s32 %v1280_v45, %v1278_v12  ;;  %v1323_v51 = vcvt.f32.s32 %v1322_v7  ;;  %v1373_v19 = vsel %vm492_vm2, %v4928_v21, -inf  ;;  %vm1360_vm5 = vcmp.eq.s32.totalorder %v4502_v49, %v4921_v24 }
 0xa15   : > { %1374 = vmax.xlane.f32.xlu0 %v1373_v19  ;;  %v1307_v43 = vpop.xlane.xlu0 %1306  ;;  %v4937_v42 = vsel %vm1360_vm5, -inf, %v4841_v15 }
 0xa16   : > { %v4939_v33 = vadd.s32 %v1325_v23, %v1323_v51  ;;  %v1308_v35 = vcvt.f32.s32 %v1307_v43  ;;  %v1382_v36 = vsel %vm492_vm2, %v4937_v42, -inf  ;;  %vm1359_vm6 = vcmp.eq.s32.totalorder %v4502_v49, %v4930_v32 }
 0xa17   : > { %1383 = vmax.xlane.f32.xlu1 %v1382_v36  ;;  %v1352_v8 = vpop.xlane.xlu1 %1351  ;;  %v4946_v47 = vsel %vm1359_vm6, -inf, %v4850_v1 }
 0xa18   : > { %v4948_v60 = vadd.s32 %v1310_v54, %v1308_v35  ;;  %v1353_v22 = vcvt.f32.s32 %v1352_v8  ;;  %v1379_v15 = vsel %vm492_vm2, %v4946_v47, -inf  ;;  %vm1362_vm7 = vcmp.eq.s32.totalorder %v4502_v49, %v4939_v33 }
 0xa19   : > { %1380 = vmax.xlane.f32.xlu0 %v1379_v15  ;;  %v1337_v17 = vpop.xlane.xlu0 %1336  ;;  %v4955_v61 = vsel %vm1362_vm7, -inf, %v4859_v18 }
 0xa1a   : > { %v4957_v27 = vadd.s32 %v1355_v48, %v1353_v22  ;;  %v1338_v26 = vcvt.f32.s32 %v1337_v17  ;;  %v1388_v1 = vsel %vm492_vm2, %v4955_v61, -inf  ;;  %vm1361_vm8 = vcmp.eq.s32.totalorder %v4502_v49, %v4948_v60 }
 0xa1b   : > { %1389 = vmax.xlane.f32.xlu1 %v1388_v1  ;;  %v4964_v45 = vsel %vm1361_vm8, -inf, %v4868_v5 }
 0xa1c   : > { %v4966_v34 = vadd.s32 %v1340_v3, %v1338_v26  ;;  %v1385_v11 = vsel %vm492_vm2, %v4964_v45, -inf  ;;  %vm1364_vm9 = vcmp.eq.s32.totalorder %v4502_v49, %v4957_v27 }
 0xa1d   : > { %1386 = vmax.xlane.f32.xlu0 %v1385_v11  ;;  %v4973_v18 = vsel %vm1364_vm9, -inf, %v4877_v40 }
 0xa1e   : > { %v1394_v12 = vsel %vm492_vm2, %v4973_v18, -inf  ;;  %vm1363_vm10 = vcmp.eq.s32.totalorder %v4502_v49, %v4966_v34 }
 0xa1f   : > { %1395 = vmax.xlane.f32.xlu1 %v1394_v12  ;;  %v4980_v5 = vsel %vm1363_vm10, -inf, %v4884_v6 }
 0xa20   : > { %v1391_v44 = vsel %vm492_vm2, %v4980_v5, -inf }
 0xa21   : > { %1392 = vmax.xlane.f32.xlu0 %v1391_v44 }
 0xa9c   : > { %v1378_v23 = vpop.xlane.xlu1 %1377 }
 0xa9d   : > { %vm1398_vm11 = vcmp.eq.f32.partialorder %v4919_v53, %v1378_v23 }
 0xa9e   : > { %v1406_v40 = vsel %vm1398_vm11, %v4502_v49, 64  ;;  %v1375_v56 = vpop.xlane.xlu0 %1374 }
 0xa9f   : > { %v1428_v7 = vsel %vm492_vm2, %v1406_v40, 2147483647  ;;  %vm1397_vm12 = vcmp.eq.f32.partialorder %v4928_v21, %v1375_v56 }
 0xaa0   : > { %v1405_v51 = vsel %vm1397_vm12, %v4502_v49, 64  ;;  %v1384_v19 = vpop.xlane.xlu1 %1383  ;;  %v1430_v54 = vshra.s32 %v1428_v7, 16  ;;  %v1429_v2 = vand.u32 65535, %v1428_v7 }
 0xaa1   : > { %v1413_v6 = vsel %vm492_vm2, %v1405_v51, 2147483647  ;;  %vm1400_vm13 = vcmp.eq.f32.partialorder %v4937_v42, %v1384_v19 }
 0xaa2   : > { %v1408_v63 = vsel %vm1400_vm13, %v4502_v49, 64  ;;  %v1381_v43 = vpop.xlane.xlu0 %1380  ;;  %v1432_v35 = vcvt.s32.f32 %v1430_v54  ;;  %v1415_v36 = vshra.s32 %v1413_v6, 16  ;;  %v1431_v55 = vcvt.s32.f32 %v1429_v2 }
 0xaa3   : > { %v1458_v48 = vsel %vm492_vm2, %v1408_v63, 2147483647  ;;  %vm1399_vm14 = vcmp.eq.f32.partialorder %v4946_v47, %v1381_v43 }
 0xaa4   : > { %v1407_v8 = vsel %vm1399_vm14, %v4502_v49, 64  ;;  %1433 = vmin.xlane.f32.xlu1 %v1432_v35  ;;  %v1390_v22 = vpop.xlane.xlu1 %1389  ;;  %v1417_v15 = vcvt.s32.f32 %v1415_v36  ;;  %v1460_v3 = vshra.s32 %v1458_v48, 16 }
 0xaa5   : > { %v1443_v17 = vsel %vm492_vm2, %v1407_v8, 2147483647  ;;  %vm1402_vm15 = vcmp.eq.f32.partialorder %v4955_v61, %v1390_v22 }
 0xaa6   : > { %v1410_v26 = vsel %vm1402_vm15, %v4502_v49, 64  ;;  %1418 = vmin.xlane.f32.xlu0 %v1417_v15  ;;  %v1387_v1 = vpop.xlane.xlu0 %1386  ;;  %v1462_v11 = vcvt.s32.f32 %v1460_v3  ;;  %v1445_v12 = vshra.s32 %v1443_v17, 16  ;;  %v1444_v31 = vand.u32 65535, %v1443_v17 }
 0xaa7   : > { %v1488_v44 = vsel %vm492_vm2, %v1410_v26, 2147483647  ;;  %vm1401_vm1 = vcmp.eq.f32.partialorder %v4964_v45, %v1387_v1 }
 0xaa8   : > { %v1409_v23 = vsel %vm1401_vm1, %v4502_v49, 64  ;;  %1463 = vmin.xlane.f32.xlu1 %v1462_v11  ;;  %v1396_v40 = vpop.xlane.xlu1 %1395  ;;  %v1447_v56 = vcvt.s32.f32 %v1445_v12  ;;  %v1490_v51 = vshra.s32 %v1488_v44, 16  ;;  %v1446_v7 = vcvt.s32.f32 %v1444_v31 }
 0xaa9   : > { %v1473_v19 = vsel %vm492_vm2, %v1409_v23, 2147483647  ;;  %vm1404_vm3 = vcmp.eq.f32.partialorder %v4973_v18, %v1396_v40 }
 0xaaa   : > { %v1412_v54 = vsel %vm1404_vm3, %v4502_v49, 64  ;;  %1448 = vmin.xlane.f32.xlu0 %v1447_v56  ;;  %v1393_v63 = vpop.xlane.xlu0 %1392  ;;  %v1492_v43 = vcvt.s32.f32 %v1490_v51  ;;  %v1475_v36 = vshra.s32 %v1473_v19, 16  ;;  %v1414_v51 = vand.u32 65535, %v1413_v6 }
 0xaab   : > { %v1518_v8 = vsel %vm492_vm2, %v1412_v54, 2147483647  ;;  %vm1403_vm4 = vcmp.eq.f32.partialorder %v4980_v5, %v1393_v63  ;;  %v1459_v54 = vand.u32 65535, %v1458_v48  ;;  %v1474_v6 = vand.u32 65535, %v1473_v19 }
 0xaac   : > { %v1411_v22 = vsel %vm1403_vm4, %v4502_v49, 64  ;;  %1493 = vmin.xlane.f32.xlu1 %v1492_v43  ;;  %v1477_v3 = vcvt.s32.f32 %v1475_v36  ;;  %v1520_v26 = vshra.s32 %v1518_v8, 16  ;;  %v1416_v58 = vcvt.s32.f32 %v1414_v51 }
 0xaad   : > { %v1503_v1 = vsel %vm492_vm2, %v1411_v22, 2147483647  ;;  %v1461_v50 = vcvt.s32.f32 %v1459_v54  ;;  %v1476_v17 = vcvt.s32.f32 %v1474_v6 }
 0xaae   : > { %1478 = vmin.xlane.f32.xlu0 %v1477_v3  ;;  %v1522_v12 = vcvt.s32.f32 %v1520_v26  ;;  %v1505_v23 = vshra.s32 %v1503_v1, 16  ;;  %v1489_v26 = vand.u32 65535, %v1488_v44 }
 0xab0   : > { %1523 = vmin.xlane.f32.xlu1 %v1522_v12  ;;  %v1507_v40 = vcvt.s32.f32 %v1505_v23  ;;  %v1491_v48 = vcvt.s32.f32 %v1489_v26 }
 0xab2   : > { %1508 = vmin.xlane.f32.xlu0 %v1507_v40 }
 0xb2d   : > { %v1434_v52 = vpop.xlane.xlu1 %1433 }
 0xb2e   : > { %vm1435_vm5 = vcmp.eq.f32.partialorder %v1432_v35, %v1434_v52  ;;  %v1440_v19 = vcvt.f32.s32 %v1434_v52 }
 0xb2f   : > { %v1419_v63 = vpop.xlane.xlu0 %1418  ;;  %v1436_v41 = vsel %vm1435_vm5, %v1431_v55, inf  ;;  %v1519_v55 = vand.u32 65535, %v1518_v8 }
 0xb30   : > { %1437 = vmin.xlane.f32.xlu1 %v1436_v41  ;;  %vm1420_vm6 = vcmp.eq.f32.partialorder %v1417_v15, %v1419_v63  ;;  %v1441_v54 = vshll.u32 %v1440_v19, 16 }
 0xb31   : > { %v1464_v36 = vpop.xlane.xlu1 %1463  ;;  %v1421_v22 = vsel %vm1420_vm6, %v1416_v58, inf  ;;  %v1504_v58 = vand.u32 65535, %v1503_v1  ;;  %v1521_v51 = vcvt.s32.f32 %v1519_v55 }
 0xb32   : > { %1422 = vmin.xlane.f32.xlu0 %v1421_v22  ;;  %vm1465_vm7 = vcmp.eq.f32.partialorder %v1462_v11, %v1464_v36  ;;  %v1470_v22 = vcvt.f32.s32 %v1464_v36 }
 0xb33   : > { %v1449_v23 = vpop.xlane.xlu0 %1448  ;;  %v1466_v20 = vsel %vm1465_vm7, %v1461_v50, inf  ;;  %v1506_v50 = vcvt.s32.f32 %v1504_v58 }
 0xb34   : > { %1467 = vmin.xlane.f32.xlu1 %v1466_v20  ;;  %vm1450_vm8 = vcmp.eq.f32.partialorder %v1447_v56, %v1449_v23  ;;  %v1455_v26 = vcvt.f32.s32 %v1449_v23  ;;  %v1471_v55 = vshll.u32 %v1470_v22, 16 }
 0xb35   : > { %v1494_v2 = vpop.xlane.xlu1 %1493  ;;  %v1451_v35 = vsel %vm1450_vm8, %v1446_v7, inf }
 0xb36   : > { %1452 = vmin.xlane.f32.xlu0 %v1451_v35  ;;  %vm1495_vm9 = vcmp.eq.f32.partialorder %v1492_v43, %v1494_v2  ;;  %v1425_v43 = vcvt.f32.s32 %v1419_v63  ;;  %v1456_v52 = vshll.u32 %v1455_v26, 16 }
 0xb37   : > { %v1479_v41 = vpop.xlane.xlu0 %1478  ;;  %v1496_v15 = vsel %vm1495_vm9, %v1491_v48, inf }
 0xb38   : > { %1497 = vmin.xlane.f32.xlu1 %v1496_v15  ;;  %vm1480_vm10 = vcmp.eq.f32.partialorder %v1477_v3, %v1479_v41  ;;  %v1426_v7 = vshll.u32 %v1425_v43, 16  ;;  %v1485_v63 = vcvt.f32.s32 %v1479_v41 }
 0xb39   : > { %v1524_v44 = vpop.xlane.xlu1 %1523  ;;  %v1481_v11 = vsel %vm1480_vm10, %v1476_v17, inf }
 0xb3a   : > { %1482 = vmin.xlane.f32.xlu0 %v1481_v11  ;;  %vm1525_vm11 = vcmp.eq.f32.partialorder %v1522_v12, %v1524_v44  ;;  %v1500_v12 = vcvt.f32.s32 %v1494_v2  ;;  %v1486_v19 = vshll.u32 %v1485_v63, 16 }
 0xb3b   : > { %v1509_v31 = vpop.xlane.xlu0 %1508  ;;  %v1526_v20 = vsel %vm1525_vm11, %v1521_v51, inf  ;;  %v1530_v51 = vcvt.f32.s32 %v1524_v44 }
 0xb3c   : > { %1527 = vmin.xlane.f32.xlu1 %v1526_v20  ;;  %vm1510_vm12 = vcmp.eq.f32.partialorder %v1507_v40, %v1509_v31  ;;  %v1501_v11 = vshll.u32 %v1500_v12, 16  ;;  %v1515_v43 = vcvt.f32.s32 %v1509_v31 }
 0xb3d   : > { %v1511_v56 = vsel %vm1510_vm12, %v1506_v50, inf }
 0xb3e   : > { %1512 = vmin.xlane.f32.xlu0 %v1511_v56 }
 0xbb9   : > { %v1438_v8 = vpop.xlane.xlu1 %1437 }
 0xbba   : > { %v1439_v1 = vcvt.f32.s32 %v1438_v8 }
 0xbbb   : > { %v1423_v3 = vpop.xlane.xlu0 %1422 }
 0xbbc   : > { %v5008_v6 = vadd.s32 %v1441_v54, %v1439_v1  ;;  %v1424_v35 = vcvt.f32.s32 %v1423_v3  ;;  %v1531_v1 = vshll.u32 %v1530_v51, 16 }
 0xbbd   : > { %v1468_v48 = vpop.xlane.xlu1 %1467 }
 0xbbe   : > { %6101 = vst [vmem:[#allocation24_spill] sm:$0xff] %v5008_v6  ;;  %v5010_v15 = vadd.s32 %v1426_v7, %v1424_v35  ;;  %v1469_v40 = vcvt.f32.s32 %v1468_v48  ;;  %vm1534_vm13 = vcmp.eq.s32.totalorder %v4502_v49, %v5008_v6  ;;  %v1516_v35 = vshll.u32 %v1515_v43, 16 }
 0xbbf   : > { %v1453_v17 = vpop.xlane.xlu0 %1452  ;;  %v5015_v36 = vsel %vm1534_vm13, -inf, %v4919_v53 }
 0xbc0   : > { %v5017_v23 = vadd.s32 %v1471_v55, %v1469_v40  ;;  %v1454_v58 = vcvt.f32.s32 %v1453_v17  ;;  %v1552_v2 = vsel %vm492_vm2, %v5015_v36, -inf  ;;  %vm1533_vm14 = vcmp.eq.s32.totalorder %v4502_v49, %v5010_v15 }
 0xbc1   : > { %1553 = vmax.xlane.f32.xlu1 %v1552_v2  ;;  %v1498_v20 = vpop.xlane.xlu1 %1497  ;;  %v5024_v50 = vsel %vm1533_vm14, -inf, %v4928_v21 }
 0xbc2   : > { %6102 = vst [vmem:[#allocation25_spill] sm:$0xff] %v5017_v23  ;;  %v5026_v41 = vadd.s32 %v1456_v52, %v1454_v58  ;;  %v1499_v53 = vcvt.f32.s32 %v1498_v20  ;;  %v1549_v56 = vsel %vm492_vm2, %v5024_v50, -inf  ;;  %vm1536_vm15 = vcmp.eq.s32.totalorder %v4502_v49, %v5017_v23 }
 0xbc3   : > { %1550 = vmax.xlane.f32.xlu0 %v1549_v56  ;;  %v1483_v8 = vpop.xlane.xlu0 %1482  ;;  %v5033_v44 = vsel %vm1536_vm15, -inf, %v4937_v42 }
 0xbc4   : > { %v5035_v54 = vadd.s32 %v1501_v11, %v1499_v53  ;;  %v1484_v21 = vcvt.f32.s32 %v1483_v8  ;;  %v1558_v22 = vsel %vm492_vm2, %v5033_v44, -inf  ;;  %vm1535_vm1 = vcmp.eq.s32.totalorder %v4502_v49, %v5026_v41 }
 0xbc5   : > { %1559 = vmax.xlane.f32.xlu1 %v1558_v22  ;;  %v1528_v26 = vpop.xlane.xlu1 %1527  ;;  %v5042_v3 = vsel %vm1535_vm1, -inf, %v4946_v47 }
 0xbc6   : > { %6103 = vst [vmem:[#allocation26_spill] sm:$0xff] %v5035_v54  ;;  %v5044_v31 = vadd.s32 %v1486_v19, %v1484_v21  ;;  %v1529_v7 = vcvt.f32.s32 %v1528_v26  ;;  %v1555_v42 = vsel %vm492_vm2, %v5042_v3, -inf  ;;  %vm1538_vm3 = vcmp.eq.s32.totalorder %v4502_v49, %v5035_v54 }
 0xbc7   : > { %1556 = vmax.xlane.f32.xlu0 %v1555_v42  ;;  %v1513_v12 = vpop.xlane.xlu0 %1512  ;;  %v5051_v48 = vsel %vm1538_vm3, -inf, %v4955_v61 }
 0xbc8   : > { %6104 = vst [vmem:[#allocation27_spill] sm:$0xff] %v5044_v31  ;;  %v5053_v55 = vadd.s32 %v1531_v1, %v1529_v7  ;;  %v1514_v40 = vcvt.f32.s32 %v1513_v12  ;;  %v1564_v47 = vsel %vm492_vm2, %v5051_v48, -inf  ;;  %vm1537_vm4 = vcmp.eq.s32.totalorder %v4502_v49, %v5044_v31 }
 0xbc9   : > { %1565 = vmax.xlane.f32.xlu1 %v1564_v47  ;;  %v5060_v52 = vsel %vm1537_vm4, -inf, %v4964_v45 }
 0xbca   : > { %6105 = vst [vmem:[#allocation28_spill] sm:$0xff] %v5053_v55  ;;  %v5062_v63 = vadd.s32 %v1516_v35, %v1514_v40  ;;  %v1561_v17 = vsel %vm492_vm2, %v5060_v52, -inf  ;;  %vm1540_vm5 = vcmp.eq.s32.totalorder %v4502_v49, %v5053_v55 }
 0xbcb   : > { %1562 = vmax.xlane.f32.xlu0 %v1561_v17  ;;  %v5069_v61 = vsel %vm1540_vm5, -inf, %v4973_v18 }
 0xbcc   : > { %6106 = vst [vmem:[#allocation29_spill] sm:$0xff] %v5062_v63  ;;  %v1570_v58 = vsel %vm492_vm2, %v5069_v61, -inf  ;;  %vm1539_vm6 = vcmp.eq.s32.totalorder %v4502_v49, %v5062_v63 }
 0xbcd   : > { %1571 = vmax.xlane.f32.xlu1 %v1570_v58  ;;  %v5076_v45 = vsel %vm1539_vm6, -inf, %v4980_v5 }
 0xbce   : > { %v1567_v2 = vsel %vm492_vm2, %v5076_v45, -inf }
 0xbcf   : > { %1568 = vmax.xlane.f32.xlu0 %v1567_v2 }
 0xc4a   : > { %v1554_v11 = vpop.xlane.xlu1 %1553 }
 0xc4b   : > { %vm1574_vm7 = vcmp.eq.f32.partialorder %v5015_v36, %v1554_v11 }
 0xc4c   : > { %v1582_v18 = vsel %vm1574_vm7, %v4502_v49, 64  ;;  %v1551_v51 = vpop.xlane.xlu0 %1550 }
 0xc4d   : > { %v1604_v20 = vsel %vm492_vm2, %v1582_v18, 2147483647  ;;  %vm1573_vm8 = vcmp.eq.f32.partialorder %v5024_v50, %v1551_v51 }
 0xc4e   : > { %v1581_v53 = vsel %vm1573_vm8, %v4502_v49, 64  ;;  %v1560_v56 = vpop.xlane.xlu1 %1559  ;;  %v1606_v19 = vshra.s32 %v1604_v20, 16 }
 0xc4f   : > { %v1589_v5 = vsel %vm492_vm2, %v1581_v53, 2147483647  ;;  %vm1576_vm9 = vcmp.eq.f32.partialorder %v5033_v44, %v1560_v56 }
 0xc50   : > { %v1584_v43 = vsel %vm1576_vm9, %v4502_v49, 64  ;;  %v1557_v8 = vpop.xlane.xlu0 %1556  ;;  %v1608_v21 = vcvt.s32.f32 %v1606_v19  ;;  %v1591_v22 = vshra.s32 %v1589_v5, 16 }
 0xc51   : > { %v1634_v1 = vsel %vm492_vm2, %v1584_v43, 2147483647  ;;  %vm1575_vm10 = vcmp.eq.f32.partialorder %v5042_v3, %v1557_v8 }
 0xc52   : > { %v1583_v26 = vsel %vm1575_vm10, %v4502_v49, 64  ;;  %1609 = vmin.xlane.f32.xlu1 %v1608_v21  ;;  %v1566_v7 = vpop.xlane.xlu1 %1565  ;;  %v1593_v42 = vcvt.s32.f32 %v1591_v22  ;;  %v1636_v35 = vshra.s32 %v1634_v1, 16  ;;  %v1635_v25 = vand.u32 65535, %v1634_v1 }
 0xc53   : > { %v1619_v12 = vsel %vm492_vm2, %v1583_v26, 2147483647  ;;  %vm1578_vm11 = vcmp.eq.f32.partialorder %v5051_v48, %v1566_v7 }
 0xc54   : > { %v1586_v40 = vsel %vm1578_vm11, %v4502_v49, 64  ;;  %1594 = vmin.xlane.f32.xlu0 %v1593_v42  ;;  %v1563_v47 = vpop.xlane.xlu0 %1562  ;;  %v1638_v17 = vcvt.s32.f32 %v1636_v35  ;;  %v1621_v58 = vshra.s32 %v1619_v12, 16  ;;  %v1620_v63 = vand.u32 65535, %v1619_v12 }
 0xc55   : > { %v1664_v2 = vsel %vm492_vm2, %v1586_v40, 2147483647  ;;  %vm1577_vm12 = vcmp.eq.f32.partialorder %v5060_v52, %v1563_v47  ;;  %v1637_v31 = vcvt.s32.f32 %v1635_v25 }
 0xc56   : > { %v1585_v11 = vsel %vm1577_vm12, %v4502_v49, 64  ;;  %1639 = vmin.xlane.f32.xlu1 %v1638_v17  ;;  %v1572_v18 = vpop.xlane.xlu1 %1571  ;;  %v1623_v51 = vcvt.s32.f32 %v1621_v58  ;;  %v1666_v53 = vshra.s32 %v1664_v2, 16 }
 0xc57   : > { %v1649_v56 = vsel %vm492_vm2, %v1585_v11, 2147483647  ;;  %vm1580_vm13 = vcmp.eq.f32.partialorder %v5069_v61, %v1572_v18 }
 0xc58   : > { %v1588_v19 = vsel %vm1580_vm13, %v4502_v49, 64  ;;  %1624 = vmin.xlane.f32.xlu0 %v1623_v51  ;;  %v1569_v43 = vpop.xlane.xlu0 %1568  ;;  %v1668_v8 = vcvt.s32.f32 %v1666_v53  ;;  %v1651_v22 = vshra.s32 %v1649_v56, 16  ;;  %v1605_v53 = vand.u32 65535, %v1604_v20 }
 0xc59   : > { %v1694_v26 = vsel %vm492_vm2, %v1588_v19, 2147483647  ;;  %vm1579_vm14 = vcmp.eq.f32.partialorder %v5076_v45, %v1569_v43  ;;  %v1590_v19 = vand.u32 65535, %v1589_v5  ;;  %v1622_v20 = vcvt.s32.f32 %v1620_v63 }
 0xc5a   : > { %v1587_v7 = vsel %vm1579_vm14, %v4502_v49, 64  ;;  %1669 = vmin.xlane.f32.xlu1 %v1668_v8  ;;  %v1653_v35 = vcvt.s32.f32 %v1651_v22  ;;  %v1696_v40 = vshra.s32 %v1694_v26, 16  ;;  %v1607_v43 = vcvt.s32.f32 %v1605_v53 }
 0xc5b   : > { %v1679_v47 = vsel %vm492_vm2, %v1587_v7, 2147483647  ;;  %v1592_v23 = vcvt.s32.f32 %v1590_v19  ;;  %v1650_v5 = vand.u32 65535, %v1649_v56 }
 0xc5c   : > { %1654 = vmin.xlane.f32.xlu0 %v1653_v35  ;;  %v1698_v58 = vcvt.s32.f32 %v1696_v40  ;;  %v1681_v11 = vshra.s32 %v1679_v47, 16  ;;  %v1680_v25 = vand.u32 65535, %v1679_v47 }
 0xc5e   : > { %1699 = vmin.xlane.f32.xlu1 %v1698_v58  ;;  %v1683_v18 = vcvt.s32.f32 %v1681_v11  ;;  %v1665_v11 = vand.u32 65535, %v1664_v2  ;;  %v1682_v56 = vcvt.s32.f32 %v1680_v25 }
 0xc60   : > { %1684 = vmin.xlane.f32.xlu0 %v1683_v18  ;;  %v1667_v53 = vcvt.s32.f32 %v1665_v11 }
 0xcdb   : > { %v1610_v55 = vpop.xlane.xlu1 %1609 }
 0xcdc   : > { %vm1611_vm15 = vcmp.eq.f32.partialorder %v1608_v21, %v1610_v55 }
 0xcdd   : > { %v1595_v54 = vpop.xlane.xlu0 %1594  ;;  %v1612_v22 = vsel %vm1611_vm15, %v1607_v43, inf  ;;  %v1695_v43 = vand.u32 65535, %v1694_v26  ;;  %v6076_v26 = vmov 0.0  }
 0xcde   : > { %1613 = vmin.xlane.f32.xlu1 %v1612_v22  ;;  %vm1596_vm1 = vcmp.eq.f32.partialorder %v1593_v42, %v1595_v54  ;;  %4059 = vmatprep.subr.mxu0 %v6076_v26 }
 0xcdf   : > { %v1640_v7 = vpop.xlane.xlu1 %1639  ;;  %v1597_v40 = vsel %vm1596_vm1, %v1592_v23, inf  ;;  %v1652_v23 = vcvt.s32.f32 %v1650_v5  ;;  %v1697_v63 = vcvt.s32.f32 %v1695_v43 }
 0xce0   : > { %1598 = vmin.xlane.f32.xlu0 %v1597_v40  ;;  %vm1641_vm3 = vcmp.eq.f32.partialorder %v1638_v17, %v1640_v7 }
 0xce1   : > { %v1625_v6 = vpop.xlane.xlu0 %1624  ;;  %v1642_v38 = vsel %vm1641_vm3, %v1637_v31, inf }
 0xce2   : > { %1643 = vmin.xlane.f32.xlu1 %v1642_v38  ;;  %vm1626_vm4 = vcmp.eq.f32.partialorder %v1623_v51, %v1625_v6 }
 0xce3   : > { %v1670_v1 = vpop.xlane.xlu1 %1669  ;;  %v1627_v21 = vsel %vm1626_vm4, %v1622_v20, inf }
 0xce4   : > { %1628 = vmin.xlane.f32.xlu0 %v1627_v21  ;;  %vm1671_vm5 = vcmp.eq.f32.partialorder %v1668_v8, %v1670_v1  ;;  %v1676_v22 = vcvt.f32.s32 %v1670_v1 }
 0xce5   : > { %v5104_v12 = vpop.xlane.xlu0 %1654  ;;  %v1672_v42 = vsel %vm1671_vm5, %v1667_v53, inf }
 0xce6   : > { %1673 = vmin.xlane.f32.xlu1 %v1672_v42  ;;  %vm1656_vm6 = vcmp.eq.f32.partialorder %v1653_v35, %v5104_v12  ;;  %v1616_v35 = vcvt.f32.s32 %v1610_v55  ;;  %v1677_v20 = vshll.u32 %v1676_v22, 16 }
 0xce7   : > { %v5107_v17 = vpop.xlane.xlu1 %1699  ;;  %v1657_v31 = vsel %vm1656_vm6, %v1652_v23, inf }
 0xce8   : > { %1658 = vmin.xlane.f32.xlu0 %v1657_v31  ;;  %vm1701_vm7 = vcmp.eq.f32.partialorder %v1698_v58, %v5107_v17  ;;  %v1646_v58 = vcvt.f32.s32 %v1640_v7  ;;  %v1706_v5 = vcvt.f32.s32 %v5107_v17 }
 0xce9   : > { %v5110_v2 = vpop.xlane.xlu0 %1684  ;;  %v1702_v51 = vsel %vm1701_vm7, %v1697_v63, inf }
 0xcea   : > { %1703 = vmin.xlane.f32.xlu1 %v1702_v51  ;;  %vm1686_vm8 = vcmp.eq.f32.partialorder %v1683_v18, %v5110_v2  ;;  %v1631_v18 = vcvt.f32.s32 %v1625_v6  ;;  %v1647_v40 = vshll.u32 %v1646_v58, 16  ;;  %v1691_v42 = vcvt.f32.s32 %v5110_v2 }
 0xceb   : > { %v1687_v8 = vsel %vm1686_vm8, %v1682_v56, inf  ;;  %v1707_v63 = vshll.u32 %v1706_v5, 16 }
 0xcec   : > { %1688 = vmin.xlane.f32.xlu0 %v1687_v8 }
 0xcfb   : > { %2119 = vperm.xlu1 %4138, %v4729_v30   ;;  %v1601_v30 = vcvt.f32.s32 %v1595_v54  ;;  %v1661_v54 = vcvt.f32.s32 %v5104_v12 }
 0xcfd   : > { %v1602_v19 = vshll.u32 %v1601_v30, 16  ;;  %v1662_v12 = vshll.u32 %v1661_v54, 16 }
 0xcff   : > { %2122 = vperm.xlu1 %4138, %v4756_v14   ;;  %v1617_v14 = vshll.u32 %v1616_v35, 16  ;;  %v1692_v35 = vshll.u32 %v1691_v42, 16 }
 0xd02   : > { %2116 = vperm.xlu0 %4137, %v4738_v37  }
 0xd03   : > { %2125 = vperm.xlu1 %4138, %v4747_v4  }
 0xd06   : > { %2143 = vperm.xlu0 %4137, %v4825_v39  }
 0xd07   : > { %2128 = vperm.xlu1 %4138, %v4774_v28  }
 0xd0b   : > { %2131 = vperm.xlu1 %4138, %v4765_v0  }
 0xd0f   : > { %2134 = vperm.xlu1 %4138, %v4818_v62  }
 0xd13   : > { %2137 = vperm.xlu1 %4138, %v4816_v57  }
 0xd17   : > { %2140 = vperm.xlu1 %4138, %v4834_v16   ;;  %v1632_v16 = vshll.u32 %v1631_v18, 16 }
 0xd67   : > { %v1614_v47 = vpop.xlane.xlu1 %1613 }
 0xd68   : > { %v1615_v37 = vcvt.f32.s32 %v1614_v47 }
 0xd69   : > { %v1599_v4 = vpop.xlane.xlu0 %1598 }
 0xd6a   : > { %v5124_v39 = vadd.s32 %v1617_v14, %v1615_v37  ;;  %v1600_v28 = vcvt.f32.s32 %v1599_v4 }
 0xd6b   : > { %v1644_v0 = vpop.xlane.xlu1 %1643 }
 0xd6c   : > { %v5126_v62 = vadd.s32 %v1602_v19, %v1600_v28  ;;  %v1645_v57 = vcvt.f32.s32 %v1644_v0  ;;  %vm1710_vm9 = vcmp.eq.s32.totalorder %v4502_v49, %v5124_v39 }
 0xd6d   : > { %v1629_v55 = vpop.xlane.xlu0 %1628  ;;  %v5132_v6 = vsel %vm1710_vm9, -inf, %v5015_v36 }
 0xd6e   : > { %v5134_v7 = vadd.s32 %v1647_v40, %v1645_v57  ;;  %v1630_v11 = vcvt.f32.s32 %v1629_v55  ;;  %v1728_v38 = vsel %vm492_vm2, %v5132_v6, -inf  ;;  %vm1709_vm10 = vcmp.eq.s32.totalorder %v4502_v49, %v5126_v62 }
 0xd6f   : > { %v1674_v1 = vpop.xlane.xlu1 %1673  ;;  %1729 = vmax.xlane.f32.xlu1 %v1728_v38  ;;  %v5142_v21 = vsel %vm1709_vm10, -inf, %v5024_v50 }
 0xd70   : > { %v5144_v53 = vadd.s32 %v1632_v16, %v1630_v11  ;;  %v1675_v36 = vcvt.f32.s32 %v1674_v1  ;;  %v1725_v43 = vsel %vm492_vm2, %v5142_v21, -inf  ;;  %vm1712_vm11 = vcmp.eq.s32.totalorder %v4502_v49, %v5134_v7 }
 0xd71   : > { %1726 = vmax.xlane.f32.xlu0 %v1725_v43  ;;  %v1659_v23 = vpop.xlane.xlu0 %1658  ;;  %v5152_v25 = vsel %vm1712_vm11, -inf, %v5033_v44 }
 0xd72   : > { %v5154_v17 = vadd.s32 %v1677_v20, %v1675_v36  ;;  %v1660_v50 = vcvt.f32.s32 %v1659_v23  ;;  %v1734_v31 = vsel %vm492_vm2, %v5152_v25, -inf  ;;  %vm1711_vm12 = vcmp.eq.s32.totalorder %v4502_v49, %v5144_v53 }
 0xd73   : > { %v1704_v51 = vpop.xlane.xlu1 %1703  ;;  %1735 = vmax.xlane.f32.xlu1 %v1734_v31  ;;  %v5161_v56 = vsel %vm1711_vm12, -inf, %v5042_v3 }
 0xd74   : > { %v5163_v2 = vadd.s32 %v1662_v12, %v1660_v50  ;;  %v1705_v8 = vcvt.f32.s32 %v1704_v51  ;;  %v1731_v44 = vsel %vm492_vm2, %v5161_v56, -inf  ;;  %vm1714_vm13 = vcmp.eq.s32.totalorder %v4502_v49, %v5154_v17 }
 0xd75   : > { %1732 = vmax.xlane.f32.xlu0 %v1731_v44  ;;  %v1689_v30 = vpop.xlane.xlu0 %1688  ;;  %v5170_v47 = vsel %vm1714_vm13, -inf, %v5051_v48 }
 0xd76   : > { %v5172_v14 = vadd.s32 %v1707_v63, %v1705_v8  ;;  %v1690_v58 = vcvt.f32.s32 %v1689_v30  ;;  %v1740_v3 = vsel %vm492_vm2, %v5170_v47, -inf  ;;  %vm1713_vm14 = vcmp.eq.s32.totalorder %v4502_v49, %v5163_v2 }
 0xd77   : > { %v2120_v37 = vpop.permute.xlu1 %2119  ;;  %1741 = vmax.xlane.f32.xlu1 %v1740_v3  ;;  %v5179_v18 = vsel %vm1713_vm14, -inf, %v5060_v52 }
 0xd78   : > { %v5181_v4 = vadd.s32 %v1692_v35, %v1690_v58  ;;  %v1737_v48 = vsel %vm492_vm2, %v5179_v18, -inf  ;;  %vm1716_vm15 = vcmp.eq.s32.totalorder %v4502_v49, %v5172_v14  ;;  %vm2296_vm3 = vcmp.eq.s32.totalorder %v4502_v49, %v2120_v37 }
 0xd79   : > { %1738 = vmax.xlane.f32.xlu0 %v1737_v48  ;;  %v5188_v19 = vsel %vm1716_vm15, -inf, %v5069_v61  ;;  %v3659_v16 = vsel %vm2296_vm3, 1.0, %v6076_v26 }
 0xd7a   : > { %v1746_v28 = vsel %vm492_vm2, %v5188_v19, -inf  ;;  %vm1715_vm1 = vcmp.eq.s32.totalorder %v4502_v49, %v5181_v4 }
 0xd7b   : > { %v2123_v52 = vpop.permute.xlu1 %2122  ;;  %1747 = vmax.xlane.f32.xlu1 %v1746_v28  ;;  %v5195_v22 = vsel %vm1715_vm1, -inf, %v5076_v45 }
 0xd7c   : > { %v1743_v0 = vsel %vm492_vm2, %v5195_v22, -inf  ;;  %vm2297_vm4 = vcmp.eq.s32.totalorder %v4502_v49, %v2123_v52 }
 0xd7d   : > { %1744 = vmax.xlane.f32.xlu0 %v1743_v0  ;;  %v2117_v40 = vpop.permute.xlu0 %2116  ;;  %v3660_v45 = vsel %vm2297_vm4, 1.0, %v6076_v26 }
 0xd7e   : > { %vm2295_vm5 = vcmp.eq.s32.totalorder %v4502_v49, %v2117_v40 }
 0xd7f   : > { %v2126_v61 = vpop.permute.xlu1 %2125  ;;  %v3658_v57 = vsel %vm2295_vm5, 1.0, %v6076_v26 }
 0xd80   : > { %3978 = vmatprep.mubr.msk.f32.mxu1 %vm492_vm2, %v3658_v57  ;;  %vm2298_vm6 = vcmp.eq.s32.totalorder %v4502_v49, %v2126_v61 }
 0xd81   : > { %3979 = vmatmul.mubr.msk.f32.vlgmr.msra.gmra.mxu1 %vm492_vm2, %v3659_v16  ;;  %v3661_v55 = vsel %vm2298_vm6, 1.0, %v6076_v26  ;;  %v2144_v43 = vpop.permute.xlu0 %2143 }
 0xd82   : > { %3981 = vmatprep.mubr.msk.f32.mxu1 %vm492_vm2, %v3660_v45  ;;  %vm2304_vm11 = vcmp.eq.s32.totalorder %v4502_v49, %v2144_v43 }
 0xd83   : > { %v2129_v54 = vpop.permute.xlu1 %2128  ;;  %v3667_v23 = vsel %vm2304_vm11, 1.0, %v6076_v26 }
 0xd84   : > { %vm2299_vm7 = vcmp.eq.s32.totalorder %v4502_v49, %v2129_v54 }
 0xd85   : > { %v3662_v11 = vsel %vm2299_vm7, 1.0, %v6076_v26  ;;  %3982 = vmatmul.mubr.msk.f32.gmra.mxu1 %vm492_vm2, %v3661_v55 }
 0xd86   : > { %3984 = vmatprep.mubr.msk.f32.mxu1 %vm492_vm2, %v3662_v11 }
 0xd87   : > { %v2132_v38 = vpop.permute.xlu1 %2131 }
 0xd88   : > { %vm2300_vm8 = vcmp.eq.s32.totalorder %v4502_v49, %v2132_v38 }
 0xd89   : > { %v3663_v20 = vsel %vm2300_vm8, 1.0, %v6076_v26 }
 0xd8a   : > { %3985 = vmatmul.mubr.msk.f32.gmra.mxu1 %vm492_vm2, %v3663_v20 }
 0xd8b   : > { %v2135_v5 = vpop.permute.xlu1 %2134 }
 0xd8c   : > { %vm2301_vm9 = vcmp.eq.s32.totalorder %v4502_v49, %v2135_v5  ;;  %2149 = vperm.xlu1 %4138, %v4843_v9  }
 0xd8d   : > { %v3664_v1 = vsel %vm2301_vm9, 1.0, %v6076_v26 }
 0xd8e   : > { %3987 = vmatprep.mubr.msk.f32.mxu1 %vm492_vm2, %v3664_v1 }
 0xd8f   : > { %v2138_v36 = vpop.permute.xlu1 %2137 }
 0xd90   : > { %vm2302_vm10 = vcmp.eq.s32.totalorder %v4502_v49, %v2138_v36  ;;  %2155 = vperm.xlu1 %4138, %v4861_v59  }
 0xd91   : > { %v3665_v12 = vsel %vm2302_vm10, 1.0, %v6076_v26 }
 0xd92   : > { %3988 = vmatmul.mubr.msk.f32.gmra.mxu1 %vm492_vm2, %v3665_v12 }
 0xd93   : > { %v2141_v42 = vpop.permute.xlu1 %2140  ;;  %2146 = vperm.xlu0 %4137, %v4852_v46  }
 0xd94   : > { %vm2303_vm12 = vcmp.eq.s32.totalorder %v4502_v49, %v2141_v42  ;;  %2161 = vperm.xlu1 %4138, %v4912_v29  }
 0xd95   : > { %v3666_v9 = vsel %vm2303_vm12, 1.0, %v6076_v26 }
 0xd96   : > { %3990 = vmatprep.mubr.msk.f32.mxu1 %vm492_vm2, %v3666_v9 }
 0xd97   : > { %2152 = vperm.xlu0 %4137, %v4870_v13   ;;  %3991 = vmatmul.mubr.msk.f32.gmra.mxu1 %vm492_vm2, %v3667_v23 }
 0xd98   : > { %2167 = vperm.xlu1 %4138, %v4921_v24  }
 0xd9b   : > { %2158 = vperm.xlu0 %4137, %v4914_v10  }
 0xd9c   : > { %2170 = vperm.xlu1 %4138, %v4948_v60  }
 0xd9f   : > { %2164 = vperm.xlu0 %4137, %v4930_v32  }
 0xdf8   : > { %v1730_v46 = vpop.xlane.xlu1 %1729 }
 0xdf9   : > { %vm1750_vm13 = vcmp.eq.f32.partialorder %v5132_v6, %v1730_v46 }
 0xdfa   : > { %v1758_v59 = vsel %vm1750_vm13, %v4502_v49, 64  ;;  %v1727_v29 = vpop.xlane.xlu0 %1726 }
 0xdfb   : > { %v5241_v50 = vsel %vm492_vm2, %v1758_v59, 2147483647  ;;  %vm1749_vm14 = vcmp.eq.f32.partialorder %v5142_v21, %v1727_v29 }
 0xdfc   : > { %v1757_v13 = vsel %vm1749_vm14, %v4502_v49, 64  ;;  %v1736_v24 = vpop.xlane.xlu1 %1735  ;;  %v1782_v10 = vshra.s32 %v5241_v50, 16 }
 0xdfd   : > { %v5247_v60 = vsel %vm492_vm2, %v1757_v13, 2147483647  ;;  %vm1752_vm15 = vcmp.eq.f32.partialorder %v5152_v25, %v1736_v24 }
 0xdfe   : > { %v1760_v32 = vsel %vm1752_vm15, %v4502_v49, 64  ;;  %v1733_v31 = vpop.xlane.xlu0 %1732  ;;  %v5251_v63 = vcvt.s32.f32 %v1782_v10  ;;  %v1767_v51 = vshra.s32 %v5247_v60, 16 }
 0xdff   : > { %v5255_v8 = vsel %vm492_vm2, %v1760_v32, 2147483647  ;;  %vm1751_vm1 = vcmp.eq.f32.partialorder %v5161_v56, %v1733_v31 }
 0xe00   : > { %v1759_v44 = vsel %vm1751_vm1, %v4502_v49, 64  ;;  %v1742_v35 = vpop.xlane.xlu1 %1741  ;;  %1785 = vmin.xlane.f32.xlu1 %v5251_v63  ;;  %v5260_v30 = vcvt.s32.f32 %v1767_v51  ;;  %v1812_v58 = vshra.s32 %v5255_v8, 16 }
 0xe01   : > { %v5264_v3 = vsel %vm492_vm2, %v1759_v44, 2147483647  ;;  %vm1754_vm3 = vcmp.eq.f32.partialorder %v5170_v47, %v1742_v35 }
 0xe02   : > { %v1762_v37 = vsel %vm1754_vm3, %v4502_v49, 64  ;;  %1770 = vmin.xlane.f32.xlu0 %v5260_v30  ;;  %v1739_v48 = vpop.xlane.xlu0 %1738  ;;  %v5269_v28 = vcvt.s32.f32 %v1812_v58  ;;  %v1797_v52 = vshra.s32 %v5264_v3, 16 }
 0xe03   : > { %v5273_v0 = vsel %vm492_vm2, %v1762_v37, 2147483647  ;;  %vm1753_vm4 = vcmp.eq.f32.partialorder %v5179_v18, %v1739_v48 }
 0xe04   : > { %v1761_v40 = vsel %vm1753_vm4, %v4502_v49, 64  ;;  %v1748_v61 = vpop.xlane.xlu1 %1747  ;;  %1815 = vmin.xlane.f32.xlu1 %v5269_v28  ;;  %v5278_v57 = vcvt.s32.f32 %v1797_v52  ;;  %v1842_v16 = vshra.s32 %v5273_v0, 16 }
 0xe05   : > { %v5282_v45 = vsel %vm492_vm2, %v1761_v40, 2147483647  ;;  %vm1756_vm5 = vcmp.eq.f32.partialorder %v5188_v19, %v1748_v61 }
 0xe06   : > { %v1764_v54 = vsel %vm1756_vm5, %v4502_v49, 64  ;;  %1800 = vmin.xlane.f32.xlu0 %v5278_v57  ;;  %v1745_v55 = vpop.xlane.xlu0 %1744  ;;  %v5287_v11 = vcvt.s32.f32 %v1842_v16  ;;  %v1827_v38 = vshra.s32 %v5282_v45, 16  ;;  %v6107_v16 = vld [vmem:[#allocation24_spill] sm:$0xff] }
 0xe07   : > { %v5291_v20 = vsel %vm492_vm2, %v1764_v54, 2147483647  ;;  %vm1755_vm6 = vcmp.eq.f32.partialorder %v5195_v22, %v1745_v55  ;;  %v1766_v54 = vand.u32 65535, %v5247_v60 }
 0xe08   : > { %v1763_v5 = vsel %vm1755_vm6, %v4502_v49, 64  ;;  %v2150_v1 = vpop.permute.xlu1 %2149  ;;  %1845 = vmin.xlane.f32.xlu1 %v5287_v11  ;;  %v5296_v36 = vcvt.s32.f32 %v1827_v38  ;;  %v1872_v43 = vshra.s32 %v5291_v20, 16 }
 0xe09   : > { %v5300_v12 = vsel %vm492_vm2, %v1763_v5, 2147483647  ;;  %vm2306_vm7 = vcmp.eq.s32.totalorder %v4502_v49, %v2150_v1  ;;  %v1811_v5 = vand.u32 65535, %v5255_v8 }
 0xe0a   : > { %1830 = vmin.xlane.f32.xlu0 %v5296_v36  ;;  %v5303_v42 = vcvt.s32.f32 %v1872_v43  ;;  %v1857_v9 = vshra.s32 %v5300_v12, 16  ;;  %v3669_v24 = vsel %vm2306_vm7, 1.0, %v6076_v26  ;;  %v1841_v43 = vand.u32 65535, %v5273_v0 }
 0xe0b   : > { %v1813_v1 = vcvt.s32.f32 %v1811_v5  ;;  %v1871_v0 = vand.u32 65535, %v5291_v20  ;;  %v6113_v5 = vld [vmem:[#allocation28_spill] sm:$0xff] }
 0xe0c   : > { %v2156_v23 = vpop.permute.xlu1 %2155  ;;  %1875 = vmin.xlane.f32.xlu1 %v5303_v42  ;;  %v5307_v46 = vcvt.s32.f32 %v1857_v9 }
 0xe0d   : > { %vm2308_vm9 = vcmp.eq.s32.totalorder %v4502_v49, %v2156_v23 }
 0xe0e   : > { %1860 = vmin.xlane.f32.xlu0 %v5307_v46  ;;  %v2147_v59 = vpop.permute.xlu0 %2146  ;;  %v3671_v51 = vsel %vm2308_vm9, 1.0, %v6076_v26 }
 0xe0f   : > { %vm2305_vm8 = vcmp.eq.s32.totalorder %v4502_v49, %v2147_v59  ;;  %v1843_v59 = vcvt.s32.f32 %v1841_v43 }
 0xe10   : > { %v3668_v29 = vsel %vm2305_vm8, 1.0, %v6076_v26  ;;  %v2162_v13 = vpop.permute.xlu1 %2161 }
 0xe11   : > { %3993 = vmatprep.mubr.msk.f32.mxu1 %vm492_vm2, %v3668_v29  ;;  %vm2310_vm11 = vcmp.eq.s32.totalorder %v4502_v49, %v2162_v13 }
 0xe12   : > { %3994 = vmatmul.mubr.msk.f32.gmra.mxu1 %vm492_vm2, %v3669_v24  ;;  %v2153_v10 = vpop.permute.xlu0 %2152  ;;  %v3673_v37 = vsel %vm2310_vm11, 1.0, %v6076_v26 }
 0xe13   : > { %vm2307_vm10 = vcmp.eq.s32.totalorder %v4502_v49, %v2153_v10  ;;  %v1873_v10 = vcvt.s32.f32 %v1871_v0 }
 0xe14   : > { %v3670_v32 = vsel %vm2307_vm10, 1.0, %v6076_v26  ;;  %v2168_v31 = vpop.permute.xlu1 %2167 }
 0xe15   : > { %3996 = vmatprep.mubr.msk.f32.mxu1 %vm492_vm2, %v3670_v32  ;;  %vm2312_vm13 = vcmp.eq.s32.totalorder %v4502_v49, %v2168_v31 }
 0xe16   : > { %3997 = vmatmul.mubr.msk.f32.gmra.mxu1 %vm492_vm2, %v3671_v51  ;;  %v2159_v44 = vpop.permute.xlu0 %2158  ;;  %v3675_v40 = vsel %vm2312_vm13, 1.0, %v6076_v26 }
 0xe17   : > { %vm2309_vm12 = vcmp.eq.s32.totalorder %v4502_v49, %v2159_v44 }
 0xe18   : > { %v3672_v35 = vsel %vm2309_vm12, 1.0, %v6076_v26  ;;  %v2171_v58 = vpop.permute.xlu1 %2170 }
 0xe19   : > { %3999 = vmatprep.mubr.msk.f32.mxu1 %vm492_vm2, %v3672_v35  ;;  %vm2313_vm14 = vcmp.eq.s32.totalorder %v4502_v49, %v2171_v58 }
 0xe1a   : > { %4000 = vmatmul.mubr.msk.f32.gmra.mxu1 %vm492_vm2, %v3673_v37  ;;  %v2165_v48 = vpop.permute.xlu0 %2164  ;;  %v3676_v61 = vsel %vm2313_vm14, 1.0, %v6076_v26 }
 0xe1b   : > { %vm2311_vm15 = vcmp.eq.s32.totalorder %v4502_v49, %v2165_v48 }
 0xe1c   : > { %v3674_v52 = vsel %vm2311_vm15, 1.0, %v6076_v26 }
 0xe1d   : > { %2176 = vperm.xlu1 %4138, %v4966_v34   ;;  %4002 = vmatprep.mubr.msk.f32.mxu1 %vm492_vm2, %v3674_v52  ;;  %v1781_v34 = vand.u32 65535, %v5241_v50 }
 0xe1e   : > { %4003 = vmatmul.mubr.msk.f32.gmra.mxu1 %vm492_vm2, %v3675_v40  ;;  %v6108_v40 = vld [vmem:[#allocation27_spill] sm:$0xff] }
 0xe1f   : > { %4005 = vmatprep.mubr.msk.f32.mxu1 %vm492_vm2, %v3676_v61  ;;  %v1783_v38 = vcvt.s32.f32 %v1781_v34  ;;  %v6110_v34 = vld [vmem:[#allocation25_spill] sm:$0xff] }
 0xe21   : > { %2182 = vperm.xlu1 %4138, %v5010_v15  }
 0xe24   : > { %2173 = vperm.xlu0 %4137, %v4939_v33  }
 0xe25   : > { %2188 = vperm.xlu1 %4138, %v5026_v41   ;;  %v1768_v41 = vcvt.s32.f32 %v1766_v54  ;;  %v6111_v54 = vld [vmem:[#allocation26_spill] sm:$0xff] }
 0xe28   : > { %2179 = vperm.xlu0 %4137, %v4957_v27   ;;  %v1796_v27 = vand.u32 65535, %v5264_v3  ;;  %v1826_v3 = vand.u32 65535, %v5282_v45  ;;  %v1856_v45 = vand.u32 65535, %v5300_v12 }
 0xe2a   : > { %v1798_v9 = vcvt.s32.f32 %v1796_v27  ;;  %v1828_v13 = vcvt.s32.f32 %v1826_v3  ;;  %v1858_v32 = vcvt.s32.f32 %v1856_v45 }
 0xe2c   : > { %2185 = vperm.xlu0 %4137, %v6107_v16   ;;  %v6109_v16 = vld [vmem:[#allocation29_spill] sm:$0xff] }
 0xe89   : > { %v5345_v55 = vpop.xlane.xlu1 %1785 }
 0xe8a   : > { %vm1787_vm1 = vcmp.eq.f32.partialorder %v5251_v63, %v5345_v55 }
 0xe8b   : > { %v5350_v15 = vpop.xlane.xlu0 %1770  ;;  %v1788_v33 = vsel %vm1787_vm1, %v1783_v38, inf  ;;  %v6112_v38 = vld [vmem:[#allocation7_spill] sm:$0xff] }
 0xe8c   : > { %1789 = vmin.xlane.f32.xlu1 %v1788_v33  ;;  %vm1772_vm3 = vcmp.eq.f32.partialorder %v5260_v30, %v5350_v15  ;;  %v1792_v33 = vcvt.f32.s32 %v5345_v55 }
 0xe8d   : > { %v5355_v50 = vpop.xlane.xlu1 %1815  ;;  %v1773_v60 = vsel %vm1772_vm3, %v1768_v41, inf  ;;  %v1777_v41 = vcvt.f32.s32 %v5350_v15 }
 0xe8e   : > { %1774 = vmin.xlane.f32.xlu0 %v1773_v60  ;;  %vm1817_vm4 = vcmp.eq.f32.partialorder %v5269_v28, %v5355_v50  ;;  %v1793_v60 = vshll.u32 %v1792_v33, 16 }
 0xe8f   : > { %v5360_v63 = vpop.xlane.xlu0 %1800  ;;  %v1818_v8 = vsel %vm1817_vm4, %v1813_v1, inf  ;;  %v1822_v1 = vcvt.f32.s32 %v5355_v50 }
 0xe90   : > { %1819 = vmin.xlane.f32.xlu1 %v1818_v8  ;;  %vm1802_vm5 = vcmp.eq.f32.partialorder %v5278_v57, %v5360_v63  ;;  %v1807_v8 = vcvt.f32.s32 %v5360_v63 }
 0xe91   : > { %v5365_v30 = vpop.xlane.xlu1 %1845  ;;  %v1803_v23 = vsel %vm1802_vm5, %v1798_v9, inf  ;;  %v1778_v9 = vshll.u32 %v1777_v41, 16 }
 0xe92   : > { %vm1847_vm6 = vcmp.eq.f32.partialorder %v5287_v11, %v5365_v30  ;;  %1804 = vmin.xlane.f32.xlu0 %v1803_v23  ;;  %v1808_v15 = vshll.u32 %v1807_v8, 16 }
 0xe93   : > { %v5370_v28 = vpop.xlane.xlu0 %1830  ;;  %v1848_v29 = vsel %vm1847_vm6, %v1843_v59, inf  ;;  %v1852_v59 = vcvt.f32.s32 %v5365_v30 }
 0xe94   : > { %vm1832_vm7 = vcmp.eq.f32.partialorder %v5296_v36, %v5370_v28  ;;  %1849 = vmin.xlane.f32.xlu1 %v1848_v29  ;;  %v1837_v50 = vcvt.f32.s32 %v5370_v28 }
 0xe95   : > { %v5375_v57 = vpop.xlane.xlu1 %1875  ;;  %v1833_v24 = vsel %vm1832_vm7, %v1828_v13, inf }
 0xe96   : > { %vm1877_vm8 = vcmp.eq.f32.partialorder %v5303_v42, %v5375_v57  ;;  %1834 = vmin.xlane.f32.xlu0 %v1833_v24 }
 0xe97   : > { %v5379_v11 = vpop.xlane.xlu0 %1860  ;;  %v1878_v20 = vsel %vm1877_vm8, %v1873_v10, inf  ;;  %v1853_v10 = vshll.u32 %v1852_v59, 16 }
 0xe98   : > { %vm1862_vm9 = vcmp.eq.f32.partialorder %v5307_v46, %v5379_v11  ;;  %1879 = vmin.xlane.f32.xlu1 %v1878_v20  ;;  %v1882_v20 = vcvt.f32.s32 %v5375_v57 }
 0xe99   : > { %v2177_v12 = vpop.permute.xlu1 %2176  ;;  %v1863_v31 = vsel %vm1862_vm9, %v1858_v32, inf }
 0xe9a   : > { %1864 = vmin.xlane.f32.xlu0 %v1863_v31  ;;  %vm2315_vm10 = vcmp.eq.s32.totalorder %v4502_v49, %v2177_v12 }
 0xe9b   : > { %v3678_v44 = vsel %vm2315_vm10, 1.0, %v6076_v26 }
 0xe9d   : > { %v2183_v36 = vpop.permute.xlu1 %2182 }
 0xe9e   : > { %vm2317_vm12 = vcmp.eq.s32.totalorder %v4502_v49, %v2183_v36  ;;  %v1838_v36 = vshll.u32 %v1837_v50, 16 }
 0xe9f   : > { %v2174_v51 = vpop.permute.xlu0 %2173  ;;  %v3680_v37 = vsel %vm2317_vm12, 1.0, %v6076_v26 }
 0xea0   : > { %vm2314_vm11 = vcmp.eq.s32.totalorder %v4502_v49, %v2174_v51  ;;  %v1867_v51 = vcvt.f32.s32 %v5379_v11 }
 0xea1   : > { %v3677_v42 = vsel %vm2314_vm11, 1.0, %v6076_v26  ;;  %v2189_v35 = vpop.permute.xlu1 %2188 }
 0xea2   : > { %4006 = vmatmul.mubr.msk.f32.gmra.mxu1 %vm492_vm2, %v3677_v42  ;;  %vm2319_vm14 = vcmp.eq.s32.totalorder %v4502_v49, %v2189_v35  ;;  %v1883_v35 = vshll.u32 %v1882_v20, 16 }
 0xea3   : > { %4008 = vmatprep.mubr.msk.f32.mxu1 %vm492_vm2, %v3678_v44  ;;  %v2180_v46 = vpop.permute.xlu0 %2179  ;;  %v3682_v61 = vsel %vm2319_vm14, 1.0, %v6076_v26 }
 0xea4   : > { %vm2316_vm13 = vcmp.eq.s32.totalorder %v4502_v49, %v2180_v46 }
 0xea5   : > { %v3679_v58 = vsel %vm2316_vm13, 1.0, %v6076_v26 }
 0xea6   : > { %4009 = vmatmul.mubr.msk.f32.gmra.mxu1 %vm492_vm2, %v3679_v58 }
 0xea7   : > { %4011 = vmatprep.mubr.msk.f32.mxu1 %vm492_vm2, %v3680_v37  ;;  %v2186_v48 = vpop.permute.xlu0 %2185 }
 0xea8   : > { %vm2318_vm15 = vcmp.eq.s32.totalorder %v4502_v49, %v2186_v48 }
 0xea9   : > { %v3681_v52 = vsel %vm2318_vm15, 1.0, %v6076_v26  ;;  %2194 = vperm.xlu1 %4138, %v6108_v40  }
 0xeaa   : > { %4012 = vmatmul.mubr.msk.f32.gmra.mxu1 %vm492_vm2, %v3681_v52  ;;  %v1868_v52 = vshll.u32 %v1867_v51, 16 }
 0xeab   : > { %4014 = vmatprep.mubr.msk.f32.mxu1 %vm492_vm2, %v3682_v61 }
 0xead   : > { %2200 = vperm.xlu1 %4138, %v6109_v16  }
 0xeb0   : > { %2191 = vperm.xlu0 %4137, %v6110_v34  }
 0xeb1   : > { %2206 = vperm.xlu1 %4138, %v5126_v62  }
 0xeb4   : > { %2197 = vperm.xlu0 %4137, %v6111_v54  }
 0xeb5   : > { %2062 = vperm.xlu1 %4138, %v6112_v38  }
 0xeb8   : > { %2203 = vperm.xlu0 %4137, %v6113_v5  }
 0xebc   : > { %2209 = vperm.xlu0 %4137, %v5124_v39   ;;  %v1823_v39 = vshll.u32 %v1822_v1, 16 }
 0xf15   : > { %v1790_v27 = vpop.xlane.xlu1 %1789 }
 0xf16   : > { %v1791_v43 = vcvt.f32.s32 %v1790_v27 }
 0xf17   : > { %v1775_v62 = vpop.xlane.xlu0 %1774 }
 0xf18   : > { %v5413_v3 = vadd.s32 %v1793_v60, %v1791_v43  ;;  %v1776_v23 = vcvt.f32.s32 %v1775_v62 }
 0xf19   : > { %v1820_v0 = vpop.xlane.xlu1 %1819 }
 0xf1a   : > { %v5416_v29 = vadd.s32 %v1778_v9, %v1776_v23  ;;  %v1821_v55 = vcvt.f32.s32 %v1820_v0  ;;  %vm1886_vm1 = vcmp.eq.s32.totalorder %v4502_v49, %v5413_v3 }
 0xf1b   : > { %v1805_v13 = vpop.xlane.xlu0 %1804  ;;  %v5422_v63 = vsel %vm1886_vm1, -inf, %v5132_v6 }
 0xf1c   : > { %v5424_v45 = vadd.s32 %v1823_v39, %v1821_v55  ;;  %v1806_v24 = vcvt.f32.s32 %v1805_v13  ;;  %v1904_v30 = vsel %vm492_vm2, %v5422_v63, -inf  ;;  %vm1885_vm3 = vcmp.eq.s32.totalorder %v4502_v49, %v5416_v29  ;;  %v6114_v13 = vld [vmem:[#allocation9_spill] sm:$0xff] }
 0xf1d   : > { %v1850_v32 = vpop.xlane.xlu1 %1849  ;;  %1905 = vmax.xlane.f32.xlu1 %v1904_v30  ;;  %v5432_v28 = vsel %vm1885_vm3, -inf, %v5142_v21  ;;  %v6116_v30 = vld [vmem:[#allocation11_spill] sm:$0xff] }
 0xf1e   : > { %v5434_v12 = vadd.s32 %v1808_v15, %v1806_v24  ;;  %v1851_v6 = vcvt.f32.s32 %v1850_v32  ;;  %v1901_v31 = vsel %vm492_vm2, %v5432_v28, -inf  ;;  %vm1888_vm4 = vcmp.eq.s32.totalorder %v4502_v49, %v5424_v45  ;;  %v6115_v24 = vld [vmem:[#allocation6_spill] sm:$0xff] }
 0xf1f   : > { %1902 = vmax.xlane.f32.xlu0 %v1901_v31  ;;  %v1835_v42 = vpop.xlane.xlu0 %1834  ;;  %v5442_v57 = vsel %vm1888_vm4, -inf, %v5152_v25 }
 0xf20   : > { %v5444_v44 = vadd.s32 %v1853_v10, %v1851_v6  ;;  %v1836_v21 = vcvt.f32.s32 %v1835_v42  ;;  %v1910_v46 = vsel %vm492_vm2, %v5442_v57, -inf  ;;  %vm1887_vm5 = vcmp.eq.s32.totalorder %v4502_v49, %v5434_v12  ;;  %v6117_v10 = vld [vmem:[#allocation8_spill] sm:$0xff] }
 0xf21   : > { %v1880_v58 = vpop.xlane.xlu1 %1879  ;;  %1911 = vmax.xlane.f32.xlu1 %v1910_v46  ;;  %v5451_v37 = vsel %vm1887_vm5, -inf, %v5161_v56 }
 0xf22   : > { %v5453_v11 = vadd.s32 %v1838_v36, %v1836_v21  ;;  %v1881_v48 = vcvt.f32.s32 %v1880_v58  ;;  %v1907_v25 = vsel %vm492_vm2, %v5451_v37, -inf  ;;  %vm1890_vm6 = vcmp.eq.s32.totalorder %v4502_v49, %v5444_v44 }
 0xf23   : > { %1908 = vmax.xlane.f32.xlu0 %v1907_v25  ;;  %v1865_v40 = vpop.xlane.xlu0 %1864  ;;  %v5460_v61 = vsel %vm1890_vm6, -inf, %v5170_v47 }
 0xf24   : > { %v5462_v16 = vadd.s32 %v1883_v35, %v1881_v48  ;;  %v1866_v34 = vcvt.f32.s32 %v1865_v40  ;;  %v1916_v56 = vsel %vm492_vm2, %v5460_v61, -inf  ;;  %vm1889_vm7 = vcmp.eq.s32.totalorder %v4502_v49, %v5453_v11 }
 0xf25   : > { %v2195_v54 = vpop.permute.xlu1 %2194  ;;  %1917 = vmax.xlane.f32.xlu1 %v1916_v56  ;;  %v5469_v38 = vsel %vm1889_vm7, -inf, %v5179_v18 }
 0xf26   : > { %v5471_v5 = vadd.s32 %v1868_v52, %v1866_v34  ;;  %v1913_v47 = vsel %vm492_vm2, %v5469_v38, -inf  ;;  %vm1892_vm8 = vcmp.eq.s32.totalorder %v4502_v49, %v5462_v16  ;;  %vm2321_vm10 = vcmp.eq.s32.totalorder %v4502_v49, %v2195_v54 }
 0xf27   : > { %1914 = vmax.xlane.f32.xlu0 %v1913_v47  ;;  %v5478_v33 = vsel %vm1892_vm8, -inf, %v5188_v19  ;;  %v3684_v8 = vsel %vm2321_vm10, 1.0, %v6076_v26 }
 0xf28   : > { %v1922_v41 = vsel %vm492_vm2, %v5478_v33, -inf  ;;  %vm1891_vm9 = vcmp.eq.s32.totalorder %v4502_v49, %v5471_v5 }
 0xf29   : > { %v2201_v18 = vpop.permute.xlu1 %2200  ;;  %1923 = vmax.xlane.f32.xlu1 %v1922_v41  ;;  %v5485_v27 = vsel %vm1891_vm9, -inf, %v5195_v22 }
 0xf2a   : > { %v1919_v60 = vsel %vm492_vm2, %v5485_v27, -inf  ;;  %vm2323_vm12 = vcmp.eq.s32.totalorder %v4502_v49, %v2201_v18 }
 0xf2b   : > { %1920 = vmax.xlane.f32.xlu0 %v1919_v60  ;;  %v2192_v1 = vpop.permute.xlu0 %2191  ;;  %v3686_v23 = vsel %vm2323_vm12, 1.0, %v6076_v26 }
 0xf2c   : > { %vm2320_vm11 = vcmp.eq.s32.totalorder %v4502_v49, %v2192_v1 }
 0xf2d   : > { %v3683_v19 = vsel %vm2320_vm11, 1.0, %v6076_v26  ;;  %v2207_v43 = vpop.permute.xlu1 %2206 }
 0xf2e   : > { %4015 = vmatmul.mubr.msk.f32.gmra.mxu1 %vm492_vm2, %v3683_v19  ;;  %vm2325_vm15 = vcmp.eq.s32.totalorder %v4502_v49, %v2207_v43 }
 0xf2f   : > { %4017 = vmatprep.mubr.msk.f32.mxu1 %vm492_vm2, %v3684_v8  ;;  %v2198_v22 = vpop.permute.xlu0 %2197  ;;  %v3688_v55 = vsel %vm2325_vm15, 1.0, %v6076_v26 }
 0xf30   : > { %vm2322_vm13 = vcmp.eq.s32.totalorder %v4502_v49, %v2198_v22 }
 0xf31   : > { %v3685_v62 = vsel %vm2322_vm13, 1.0, %v6076_v26  ;;  %v2063_v9 = vpop.permute.xlu1 %2062 }
 0xf32   : > { %vm2277_vm14 = vcmp.eq.s32.totalorder %v4502_v49, %v2063_v9  ;;  %4018 = vmatmul.mubr.msk.f32.gmra.mxu1 %vm492_vm2, %v3685_v62 }
 0xf33   : > { %v3640_v59 = vsel %vm2277_vm14, 1.0, %v6076_v26  ;;  %4020 = vmatprep.mubr.msk.f32.mxu1 %vm492_vm2, %v3686_v23  ;;  %v2204_v0 = vpop.permute.xlu0 %2203 }
 0xf34   : > { %vm2324_vm1 = vcmp.eq.s32.totalorder %v4502_v49, %v2204_v0  ;;  %3951 = vmatprep.mubr.msk.f32.mxu0 %vm492_vm2, %v3640_v59 }
 0xf35   : > { %v3687_v39 = vsel %vm2324_vm1, 1.0, %v6076_v26 }
 0xf36   : > { %4021 = vmatmul.mubr.msk.f32.gmra.mxu1 %vm492_vm2, %v3687_v39 }
 0xf37   : > { %4023 = vmatprep.mubr.msk.f32.mxu1 %vm492_vm2, %v3688_v55  ;;  %v2210_v15 = vpop.permute.xlu0 %2209 }
 0xf38   : > { %vm2326_vm3 = vcmp.eq.s32.totalorder %v4502_v49, %v2210_v15 }
 0xf39   : > { %v3689_v50 = vsel %vm2326_vm3, 1.0, %v6076_v26 }
 0xf3a   : > { %2212 = vperm.xlu1 %4138, %v5144_v53   ;;  %4024 = vmatmul.mubr.msk.f32.gmra.mxu1 %vm492_vm2, %v3689_v50 }
 0xf3e   : > { %2068 = vperm.xlu1 %4138, %v6114_v13  }
 0xf41   : > { %2065 = vperm.xlu0 %4137, %v6115_v24  }
 0xf42   : > { %2218 = vperm.xlu1 %4138, %v5163_v2  }
 0xf45   : > { %2215 = vperm.xlu0 %4137, %v5134_v7  }
 0xf46   : > { %2074 = vperm.xlu1 %4138, %v6116_v30  }
 0xf49   : > { %2071 = vperm.xlu0 %4137, %v6117_v10  }
 0xf4d   : > { %2221 = vperm.xlu0 %4137, %v5154_v17  }
 0xfa6   : > { %v1906_v20 = vpop.xlane.xlu1 %1905 }
 0xfa7   : > { %vm1926_vm4 = vcmp.eq.f32.partialorder %v5422_v63, %v1906_v20 }
 0xfa8   : > { %v1934_v53 = vsel %vm1926_vm4, %v4502_v49, 64  ;;  %v1903_v32 = vpop.xlane.xlu0 %1902 }
 0xfa9   : > { %v5524_v6 = vsel %vm492_vm2, %v1934_v53, 2147483647  ;;  %vm1925_vm5 = vcmp.eq.f32.partialorder %v5432_v28, %v1903_v32 }
 0xfaa   : > { %v1958_v2 = vshra.s32 %v5524_v6, 16  ;;  %v1933_v7 = vsel %vm1925_vm5, %v4502_v49, 64  ;;  %v1912_v31 = vpop.xlane.xlu1 %1911 }
 0xfab   : > { %v5530_v36 = vsel %vm492_vm2, %v1933_v7, 2147483647  ;;  %vm1928_vm6 = vcmp.eq.f32.partialorder %v5442_v57, %v1912_v31  ;;  %v6118_v7 = vld [vmem:[#allocation13_spill] sm:$0xff]  ;;  %v6119_v31 = vld [vmem:[#allocation10_spill] sm:$0xff] }
 0xfac   : > { %v1943_v17 = vshra.s32 %v5530_v36, 16  ;;  %v1936_v63 = vsel %vm1928_vm6, %v4502_v49, 64  ;;  %v1909_v51 = vpop.xlane.xlu0 %1908  ;;  %v5535_v42 = vcvt.s32.f32 %v1958_v2 }
 0xfad   : > { %v5538_v21 = vsel %vm492_vm2, %v1936_v63, 2147483647  ;;  %vm1927_vm7 = vcmp.eq.f32.partialorder %v5451_v37, %v1909_v51  ;;  %v1957_v63 = vand.u32 65535, %v5524_v6  ;;  %v1942_v51 = vand.u32 65535, %v5530_v36 }
 0xfae   : > { %v1988_v28 = vshra.s32 %v5538_v21, 16  ;;  %v1935_v46 = vsel %vm1927_vm7, %v4502_v49, 64  ;;  %v1918_v35 = vpop.xlane.xlu1 %1917  ;;  %1961 = vmin.xlane.f32.xlu1 %v5535_v42  ;;  %v5544_v57 = vcvt.s32.f32 %v1943_v17  ;;  %v6120_v17 = vld [vmem:[#allocation12_spill] sm:$0xff] }
 0xfaf   : > { %v5547_v58 = vsel %vm492_vm2, %v1935_v46, 2147483647  ;;  %vm1930_vm8 = vcmp.eq.f32.partialorder %v5460_v61, %v1918_v35 }
 0xfb0   : > { %v1973_v48 = vshra.s32 %v5547_v58, 16  ;;  %v1938_v25 = vsel %vm1930_vm8, %v4502_v49, 64  ;;  %1946 = vmin.xlane.f32.xlu0 %v5544_v57  ;;  %v1915_v37 = vpop.xlane.xlu0 %1914  ;;  %v5553_v52 = vcvt.s32.f32 %v1988_v28  ;;  %v1987_v28 = vand.u32 65535, %v5538_v21 }
 0xfb1   : > { %v5556_v40 = vsel %vm492_vm2, %v1938_v25, 2147483647  ;;  %vm1929_vm9 = vcmp.eq.f32.partialorder %v5469_v38, %v1915_v37  ;;  %v1972_v35 = vand.u32 65535, %v5547_v58 }
 0xfb2   : > { %v2018_v34 = vshra.s32 %v5556_v40, 16  ;;  %v1937_v56 = vsel %vm1929_vm9, %v4502_v49, 64  ;;  %v1924_v54 = vpop.xlane.xlu1 %1923  ;;  %1991 = vmin.xlane.f32.xlu1 %v5553_v52  ;;  %v5562_v61 = vcvt.s32.f32 %v1973_v48  ;;  %v2017_v6 = vand.u32 65535, %v5556_v40 }
 0xfb3   : > { %v5565_v47 = vsel %vm492_vm2, %v1937_v56, 2147483647  ;;  %vm1932_vm10 = vcmp.eq.f32.partialorder %v5478_v33, %v1924_v54  ;;  %v1989_v25 = vcvt.s32.f32 %v1987_v28 }
 0xfb4   : > { %v2003_v41 = vshra.s32 %v5565_v47, 16  ;;  %v1940_v18 = vsel %vm1932_vm10, %v4502_v49, 64  ;;  %1976 = vmin.xlane.f32.xlu0 %v5562_v61  ;;  %v1921_v38 = vpop.xlane.xlu0 %1920  ;;  %v5571_v60 = vcvt.s32.f32 %v2018_v34  ;;  %v1974_v34 = vcvt.s32.f32 %v1972_v35 }
 0xfb5   : > { %v5574_v1 = vsel %vm492_vm2, %v1940_v18, 2147483647  ;;  %vm1931_vm11 = vcmp.eq.f32.partialorder %v5485_v27, %v1921_v38  ;;  %v2019_v54 = vcvt.s32.f32 %v2017_v6 }
 0xfb6   : > { %v2048_v19 = vshra.s32 %v5574_v1, 16  ;;  %v1939_v43 = vsel %vm1931_vm11, %v4502_v49, 64  ;;  %v2213_v8 = vpop.permute.xlu1 %2212  ;;  %2021 = vmin.xlane.f32.xlu1 %v5571_v60  ;;  %v5580_v33 = vcvt.s32.f32 %v2003_v41 }
 0xfb7   : > { %v5583_v22 = vsel %vm492_vm2, %v1939_v43, 2147483647  ;;  %vm2327_vm12 = vcmp.eq.s32.totalorder %v4502_v49, %v2213_v8 }
 0xfb8   : > { %v2033_v62 = vshra.s32 %v5583_v22, 16  ;;  %v3690_v9 = vsel %vm2327_vm12, 1.0, %v6076_v26  ;;  %2006 = vmin.xlane.f32.xlu0 %v5580_v33  ;;  %v5589_v27 = vcvt.s32.f32 %v2048_v19 }
 0xfb9   : > { %4026 = vmatprep.mubr.msk.f32.mxu1 %vm492_vm2, %v3690_v9 }
 0xfba   : > { %v2069_v23 = vpop.permute.xlu1 %2068  ;;  %2051 = vmin.xlane.f32.xlu1 %v5589_v27  ;;  %v5593_v59 = vcvt.s32.f32 %v2033_v62 }
 0xfbb   : > { %vm2279_vm13 = vcmp.eq.s32.totalorder %v4502_v49, %v2069_v23 }
 0xfbc   : > { %2036 = vmin.xlane.f32.xlu0 %v5593_v59  ;;  %v2066_v0 = vpop.permute.xlu0 %2065  ;;  %v3642_v15 = vsel %vm2279_vm13, 1.0, %v6076_v26 }
 0xfbd   : > { %vm2278_vm14 = vcmp.eq.s32.totalorder %v4502_v49, %v2066_v0 }
 0xfbe   : > { %v3641_v39 = vsel %vm2278_vm14, 1.0, %v6076_v26  ;;  %v2219_v55 = vpop.permute.xlu1 %2218 }
 0xfbf   : > { %3952 = vmatmul.mubr.msk.f32.vlgmr.msra.gmra.mxu0 %vm492_vm2, %v3641_v39  ;;  %vm2329_vm15 = vcmp.eq.s32.totalorder %v4502_v49, %v2219_v55 }
 0xfc0   : > { %3954 = vmatprep.mubr.msk.f32.mxu0 %vm492_vm2, %v3642_v15  ;;  %v2216_v50 = vpop.permute.xlu0 %2215  ;;  %v3692_v30 = vsel %vm2329_vm15, 1.0, %v6076_v26 }
 0xfc1   : > { %vm2328_vm1 = vcmp.eq.s32.totalorder %v4502_v49, %v2216_v50 }
 0xfc2   : > { %v3691_v13 = vsel %vm2328_vm1, 1.0, %v6076_v26  ;;  %v2075_v24 = vpop.permute.xlu1 %2074 }
 0xfc3   : > { %4027 = vmatmul.mubr.msk.f32.gmra.mxu1 %vm492_vm2, %v3691_v13  ;;  %vm2281_vm3 = vcmp.eq.s32.totalorder %v4502_v49, %v2075_v24  ;;  %v6121_v13 = vld [vmem:[#allocation15_spill] sm:$0xff]  ;;  %v6122_v24 = vld [vmem:[#allocation14_spill] sm:$0xff] }
 0xfc4   : > { %4029 = vmatprep.mubr.msk.f32.mxu1 %vm492_vm2, %v3692_v30  ;;  %v2072_v10 = vpop.permute.xlu0 %2071  ;;  %v3644_v53 = vsel %vm2281_vm3, 1.0, %v6076_v26  ;;  %v6123_v30 = vld [vmem:[#allocation17_spill] sm:$0xff] }
 0xfc5   : > { %vm2280_vm4 = vcmp.eq.s32.totalorder %v4502_v49, %v2072_v10  ;;  %v6124_v10 = vld [vmem:[#allocation16_spill] sm:$0xff] }
 0xfc6   : > { %v3643_v20 = vsel %vm2280_vm4, 1.0, %v6076_v26 }
 0xfc7   : > { %3955 = vmatmul.mubr.msk.f32.gmra.mxu0 %vm492_vm2, %v3643_v20  ;;  %v6125_v20 = vld [vmem:[#allocation19_spill] sm:$0xff] }
 0xfc8   : > { %3957 = vmatprep.mubr.msk.f32.mxu0 %vm492_vm2, %v3644_v53  ;;  %v2222_v32 = vpop.permute.xlu0 %2221  ;;  %v6126_v53 = vld [vmem:[#allocation18_spill] sm:$0xff] }
 0xfc9   : > { %vm2330_vm5 = vcmp.eq.s32.totalorder %v4502_v49, %v2222_v32 }
 0xfca   : > { %v3693_v2 = vsel %vm2330_vm5, 1.0, %v6076_v26 }
 0xfcb   : > { %2224 = vperm.xlu1 %4138, %v5181_v4   ;;  %4030 = vmatmul.mubr.msk.f32.gmra.mxu1 %vm492_vm2, %v3693_v2  ;;  %v1959_v4 = vcvt.s32.f32 %v1957_v63 }
 0xfcf   : > { %2080 = vperm.xlu1 %4138, %v6118_v7  }
 0xfd2   : > { %2077 = vperm.xlu0 %4137, %v6119_v31  }
 0xfd3   : > { %2230 = vperm.xlu1 %4138, %v5416_v29  }
 0xfd6   : > { %2227 = vperm.xlu0 %4137, %v5172_v14   ;;  %v1944_v14 = vcvt.s32.f32 %v1942_v51 }
 0xfda   : > { %2083 = vperm.xlu0 %4137, %v6120_v17  }
0x1037   : > { %v5626_v46 = vpop.xlane.xlu1 %1961 }
0x1038   : > { %vm1963_vm6 = vcmp.eq.f32.partialorder %v5535_v42, %v5626_v46  ;;  %v2002_v42 = vand.u32 65535, %v5565_v47 }
0x1039   : > { %v5631_v48 = vpop.xlane.xlu0 %1946  ;;  %v1964_v29 = vsel %vm1963_vm6, %v1959_v4, inf }
0x103a   : > { %vm1948_vm7 = vcmp.eq.f32.partialorder %v5544_v57, %v5631_v48  ;;  %1965 = vmin.xlane.f32.xlu0 %v1964_v29  ;;  %v2047_v57 = vand.u32 65535, %v5574_v1  ;;  %v2004_v18 = vcvt.s32.f32 %v2002_v42 }
0x103b   : > { %v5636_v36 = vpop.xlane.xlu1 %1991  ;;  %v1949_v21 = vsel %vm1948_vm7, %v1944_v14, inf }
0x103c   : > { %vm1993_vm8 = vcmp.eq.f32.partialorder %v5553_v52, %v5636_v36  ;;  %1950 = vmin.xlane.f32.xlu1 %v1949_v21  ;;  %v2032_v52 = vand.u32 65535, %v5583_v22  ;;  %v2049_v1 = vcvt.s32.f32 %v2047_v57  ;;  %v1998_v7 = vcvt.f32.s32 %v5636_v36 }
0x103d   : > { %v5641_v58 = vpop.xlane.xlu0 %1976  ;;  %v1994_v37 = vsel %vm1993_vm8, %v1989_v25, inf }
0x103e   : > { %vm1978_vm9 = vcmp.eq.f32.partialorder %v5562_v61, %v5641_v58  ;;  %1995 = vmin.xlane.f32.xlu0 %v1994_v37  ;;  %v2034_v43 = vcvt.s32.f32 %v2032_v52  ;;  %v1999_v4 = vshll.u32 %v1998_v7, 16 }
0x103f   : > { %v5646_v40 = vpop.xlane.xlu1 %2021  ;;  %v1979_v56 = vsel %vm1978_vm9, %v1974_v34, inf }
0x1040   : > { %vm2023_vm10 = vcmp.eq.f32.partialorder %v5571_v60, %v5646_v40  ;;  %1980 = vmin.xlane.f32.xlu1 %v1979_v56 }
0x1041   : > { %v5651_v47 = vpop.xlane.xlu0 %2006  ;;  %v2024_v41 = vsel %vm2023_vm10, %v2019_v54, inf }
0x1042   : > { %vm2008_vm11 = vcmp.eq.f32.partialorder %v5580_v33, %v5651_v47  ;;  %2025 = vmin.xlane.f32.xlu0 %v2024_v41  ;;  %v2013_v14 = vcvt.f32.s32 %v5651_v47 }
0x1043   : > { %v5655_v61 = vpop.xlane.xlu1 %2051  ;;  %v2009_v38 = vsel %vm2008_vm11, %v2004_v18, inf }
0x1044   : > { %vm2053_vm12 = vcmp.eq.f32.partialorder %v5589_v27, %v5655_v61  ;;  %2010 = vmin.xlane.f32.xlu1 %v2009_v38  ;;  %v2058_v42 = vcvt.f32.s32 %v5655_v61  ;;  %v2014_v57 = vshll.u32 %v2013_v14, 16 }
0x1045   : > { %v5659_v60 = vpop.xlane.xlu0 %2036  ;;  %v2054_v19 = vsel %vm2053_vm12, %v2049_v1, inf }
0x1046   : > { %vm2038_vm13 = vcmp.eq.f32.partialorder %v5593_v59, %v5659_v60  ;;  %2055 = vmin.xlane.f32.xlu0 %v2054_v19  ;;  %v2059_v41 = vshll.u32 %v2058_v42, 16 }
0x1047   : > { %v2225_v8 = vpop.permute.xlu1 %2224  ;;  %v2039_v22 = vsel %vm2038_vm13, %v2034_v43, inf }
0x1048   : > { %vm2331_vm14 = vcmp.eq.s32.totalorder %v4502_v49, %v2225_v8  ;;  %2040 = vmin.xlane.f32.xlu1 %v2039_v22 }
0x1049   : > { %v3694_v33 = vsel %vm2331_vm14, 1.0, %v6076_v26 }
0x104a   : > { %4032 = vmatprep.mubr.msk.f32.mxu1 %vm492_vm2, %v3694_v33  ;;  %v6129_v33 = vld [vmem:[#allocation22_spill] sm:$0xff] }
0x104b   : > { %v2081_v62 = vpop.permute.xlu1 %2080 }
0x104c   : > { %vm2283_vm15 = vcmp.eq.s32.totalorder %v4502_v49, %v2081_v62 }
0x104d   : > { %v2078_v9 = vpop.permute.xlu0 %2077  ;;  %v3646_v59 = vsel %vm2283_vm15, 1.0, %v6076_v26 }
0x104e   : > { %vm2282_vm1 = vcmp.eq.s32.totalorder %v4502_v49, %v2078_v9 }
0x104f   : > { %v3645_v27 = vsel %vm2282_vm1, 1.0, %v6076_v26  ;;  %v2231_v23 = vpop.permute.xlu1 %2230 }
0x1050   : > { %3958 = vmatmul.mubr.msk.f32.gmra.mxu0 %vm492_vm2, %v3645_v27  ;;  %vm2333_vm3 = vcmp.eq.s32.totalorder %v4502_v49, %v2231_v23  ;;  %v6130_v27 = vld [vmem:[#allocation23_spill] sm:$0xff] }
0x1051   : > { %3960 = vmatprep.mubr.msk.f32.mxu0 %vm492_vm2, %v3646_v59  ;;  %v2228_v0 = vpop.permute.xlu0 %2227  ;;  %v3696_v55 = vsel %vm2333_vm3, 1.0, %v6076_v26 }
0x1052   : > { %vm2332_vm4 = vcmp.eq.s32.totalorder %v4502_v49, %v2228_v0 }
0x1053   : > { %v3695_v39 = vsel %vm2332_vm4, 1.0, %v6076_v26 }
0x1054   : > { %4033 = vmatmul.mubr.msk.f32.gmra.mxu1 %vm492_vm2, %v3695_v39 }
0x1055   : > { %4035 = vmatprep.mubr.msk.f32.mxu1 %vm492_vm2, %v3696_v55  ;;  %v2084_v15 = vpop.permute.xlu0 %2083 }
0x1056   : > { %vm2284_vm5 = vcmp.eq.s32.totalorder %v4502_v49, %v2084_v15 }
0x1057   : > { %v3647_v50 = vsel %vm2284_vm5, 1.0, %v6076_v26 }
0x1058   : > { %3961 = vmatmul.mubr.msk.f32.gmra.mxu0 %vm492_vm2, %v3647_v50 }
0x1059   : > { %2086 = vperm.xlu1 %4138, %v6121_v13  }
0x105c   : > { %2233 = vperm.xlu0 %4137, %v5413_v3   ;;  %v6127_v3 = vld [vmem:[#allocation21_spill] sm:$0xff] }
0x105d   : > { %2236 = vperm.xlu1 %4138, %v5434_v12   ;;  %v6128_v12 = vld [vmem:[#allocation20_spill] sm:$0xff] }
0x1060   : > { %2089 = vperm.xlu0 %4137, %v6122_v24  }
0x1061   : > { %2092 = vperm.xlu1 %4138, %v6123_v30  }
0x1064   : > { %2239 = vperm.xlu0 %4137, %v5424_v45   ;;  %v1968_v45 = vcvt.f32.s32 %v5626_v46 }
0x1065   : > { %2242 = vperm.xlu1 %4138, %v5453_v11   ;;  %v1953_v11 = vcvt.f32.s32 %v5631_v48 }
0x1066   : > { %v1969_v2 = vshll.u32 %v1968_v45, 16 }
0x1067   : > { %v1954_v17 = vshll.u32 %v1953_v11, 16 }
0x1068   : > { %2095 = vperm.xlu0 %4137, %v6124_v10  }
0x1069   : > { %2098 = vperm.xlu1 %4138, %v6125_v20  }
0x106c   : > { %2245 = vperm.xlu0 %4137, %v5444_v44  }
0x106d   : > { %2248 = vperm.xlu1 %4138, %v5471_v5   ;;  %v1983_v5 = vcvt.f32.s32 %v5641_v58 }
0x106f   : > { %v1984_v48 = vshll.u32 %v1983_v5, 16 }
0x1070   : > { %2101 = vperm.xlu0 %4137, %v6126_v53  }
0x1071   : > { %2104 = vperm.xlu1 %4138, %v6127_v3  }
0x1074   : > { %2251 = vperm.xlu0 %4137, %v5462_v16   ;;  %v2028_v16 = vcvt.f32.s32 %v5646_v40  ;;  %v2043_v40 = vcvt.f32.s32 %v5659_v60 }
0x1076   : > { %v2029_v25 = vshll.u32 %v2028_v16, 16  ;;  %v2044_v1 = vshll.u32 %v2043_v40, 16 }
0x1078   : > { %2107 = vperm.xlu0 %4137, %v6128_v12  }
0x10c3   : > { %v1966_v32 = vpop.xlane.xlu0 %1965 }
0x10c4   : > { %v1967_v31 = vcvt.f32.s32 %v1966_v32 }
0x10c5   : > { %v1951_v44 = vpop.xlane.xlu1 %1950 }
0x10c6   : > { %v1970_v63 = vadd.s32 %v1969_v2, %v1967_v31  ;;  %v1952_v51 = vcvt.f32.s32 %v1951_v44 }
0x10c7   : > { %v1996_v28 = vpop.xlane.xlu0 %1995 }
0x10c8   : > { %v1955_v35 = vadd.s32 %v1954_v17, %v1952_v51  ;;  %v1997_v29 = vcvt.f32.s32 %v1996_v28  ;;  %2257 = vperm.xlu0 %4137, %v1970_v63  }
0x10c9   : > { %v1981_v46 = vpop.xlane.xlu1 %1980 }
0x10ca   : > { %v2000_v6 = vadd.s32 %v1999_v4, %v1997_v29  ;;  %v1982_v36 = vcvt.f32.s32 %v1981_v46  ;;  %2254 = vperm.xlu1 %4138, %v1955_v35  }
0x10cb   : > { %v2026_v21 = vpop.xlane.xlu0 %2025 }
0x10cc   : > { %v1985_v58 = vadd.s32 %v1984_v48, %v1982_v36  ;;  %v2027_v37 = vcvt.f32.s32 %v2026_v21  ;;  %2263 = vperm.xlu0 %4137, %v2000_v6  }
0x10cd   : > { %v2011_v34 = vpop.xlane.xlu1 %2010 }
0x10ce   : > { %v2030_v56 = vadd.s32 %v2029_v25, %v2027_v37  ;;  %v2012_v54 = vcvt.f32.s32 %v2011_v34  ;;  %2260 = vperm.xlu1 %4138, %v1985_v58  }
0x10cf   : > { %v2056_v52 = vpop.xlane.xlu0 %2055 }
0x10d0   : > { %v2015_v47 = vadd.s32 %v2014_v57, %v2012_v54  ;;  %v2057_v18 = vcvt.f32.s32 %v2056_v52  ;;  %2269 = vperm.xlu0 %4137, %v2030_v56   ;;  %v5781_v54 = vpop.f32.mrf.mxu1 }
0x10d1   : > { %v2041_v38 = vpop.xlane.xlu1 %2040 }
0x10d2   : > { %v2060_v19 = vadd.s32 %v2059_v41, %v2057_v18  ;;  %v2042_v43 = vcvt.f32.s32 %v2041_v38  ;;  %2266 = vperm.xlu1 %4138, %v2015_v47   ;;  %v5783_v52 = vpop.f32.mrf.mxu1 }
0x10d4   : > { %v2045_v61 = vadd.s32 %v2044_v1, %v2042_v43  ;;  %2275 = vperm.xlu0 %4137, %v2060_v19   ;;  %v5785_v41 = vpop.f32.mrf.mxu1 }
0x10d5   : > { %v2087_v8 = vpop.permute.xlu1 %2086 }
0x10d6   : > { %vm2285_vm6 = vcmp.eq.s32.totalorder %v4502_v49, %v2087_v8  ;;  %2272 = vperm.xlu1 %4138, %v2045_v61   ;;  %v5787_v47 = vpop.f32.mrf.mxu1 }
0x10d7   : > { %v3648_v60 = vsel %vm2285_vm6, 1.0, %v6076_v26  ;;  %v2234_v22 = vpop.permute.xlu0 %2233 }
0x10d8   : > { %vm2334_vm7 = vcmp.eq.s32.totalorder %v4502_v49, %v2234_v22  ;;  %3963 = vmatprep.mubr.msk.f32.mxu0 %vm492_vm2, %v3648_v60  ;;  %2113 = vperm.xlu0 %4137, %v6129_v33   ;;  %v3986_v18 = vpop.f32.mrf.mxu1 }
0x10d9   : > { %v3697_v62 = vsel %vm2334_vm7, 1.0, %v6076_v26  ;;  %v2237_v9 = vpop.permute.xlu1 %2236 }
0x10da   : > { %vm2335_vm8 = vcmp.eq.s32.totalorder %v4502_v49, %v2237_v9  ;;  %2110 = vperm.xlu1 %4138, %v6130_v27   ;;  %4036 = vmatmul.mubr.msk.f32.gmra.mxu1 %vm492_vm2, %v3697_v62  ;;  %v2885_v38 = vpop.f32.mrf.mxu1 }
0x10db   : > { %v3698_v23 = vsel %vm2335_vm8, 1.0, %v6076_v26  ;;  %v2090_v59 = vpop.permute.xlu0 %2089 }
0x10dc   : > { %vm2286_vm9 = vcmp.eq.s32.totalorder %v4502_v49, %v2090_v59  ;;  %4038 = vmatprep.mubr.msk.f32.mxu1 %vm492_vm2, %v3698_v23  ;;  %v5789_v1 = vpop.f32.mrf.mxu1 }
0x10dd   : > { %v3649_v0 = vsel %vm2286_vm9, 1.0, %v6076_v26  ;;  %v2093_v39 = vpop.permute.xlu1 %2092 }
0x10de   : > { %vm2287_vm10 = vcmp.eq.s32.totalorder %v4502_v49, %v2093_v39  ;;  %3964 = vmatmul.mubr.msk.f32.gmra.mxu0 %vm492_vm2, %v3649_v0  ;;  %v5791_v19 = vpop.f32.mrf.mxu1 }
0x10df   : > { %v3650_v55 = vsel %vm2287_vm10, 1.0, %v6076_v26  ;;  %v2240_v15 = vpop.permute.xlu0 %2239  ;;  %6131 = vst [vmem:[#allocation24_spill] sm:$0xff] %v5791_v19 }
0x10e0   : > { %vm2336_vm11 = vcmp.eq.s32.totalorder %v4502_v49, %v2240_v15  ;;  %3966 = vmatprep.mubr.msk.f32.mxu0 %vm492_vm2, %v3650_v55  ;;  %v5793_v43 = vpop.f32.mrf.mxu1 }
0x10e1   : > { %v3699_v50 = vsel %vm2336_vm11, 1.0, %v6076_v26  ;;  %v2243_v13 = vpop.permute.xlu1 %2242 }
0x10e2   : > { %vm2337_vm12 = vcmp.eq.s32.totalorder %v4502_v49, %v2243_v13  ;;  %4039 = vmatmul.mubr.msk.f32.gmra.mxu1 %vm492_vm2, %v3699_v50  ;;  %v5795_v61 = vpop.f32.mrf.mxu1 }
0x10e3   : > { %v3700_v24 = vsel %vm2337_vm12, 1.0, %v6076_v26  ;;  %v2096_v30 = vpop.permute.xlu0 %2095 }
0x10e4   : > { %vm2288_vm13 = vcmp.eq.s32.totalorder %v4502_v49, %v2096_v30  ;;  %4041 = vmatprep.mubr.msk.f32.mxu1 %vm492_vm2, %v3700_v24  ;;  %v5797_v8 = vpop.f32.mrf.mxu1 }
0x10e5   : > { %v3651_v10 = vsel %vm2288_vm13, 1.0, %v6076_v26  ;;  %v2099_v20 = vpop.permute.xlu1 %2098 }
0x10e6   : > { %vm2289_vm14 = vcmp.eq.s32.totalorder %v4502_v49, %v2099_v20  ;;  %3967 = vmatmul.mubr.msk.f32.gmra.mxu0 %vm492_vm2, %v3651_v10  ;;  %v5799_v60 = vpop.f32.mrf.mxu1  ;;  %v5829_v20 = vpop.f32.mrf.mxu0 }
0x10e7   : > { %v3652_v53 = vsel %vm2289_vm14, 1.0, %v6076_v26  ;;  %v2246_v3 = vpop.permute.xlu0 %2245 }
0x10e8   : > { %vm2338_vm15 = vcmp.eq.s32.totalorder %v4502_v49, %v2246_v3  ;;  %3969 = vmatprep.mubr.msk.f32.mxu0 %vm492_vm2, %v3652_v53  ;;  %v5801_v22 = vpop.f32.mrf.mxu1  ;;  %v5833_v3 = vpop.f32.mrf.mxu0 }
0x10e9   : > { %v3701_v12 = vsel %vm2338_vm15, 1.0, %v6076_v26  ;;  %v2249_v45 = vpop.permute.xlu1 %2248 }
0x10ea   : > { %vm2339_vm1 = vcmp.eq.s32.totalorder %v4502_v49, %v2249_v45  ;;  %4042 = vmatmul.mubr.msk.f32.gmra.mxu1 %vm492_vm2, %v3701_v12  ;;  %v5803_v33 = vpop.f32.mrf.mxu1  ;;  %v3956_v12 = vpop.f32.mrf.mxu0 }
0x10eb   : > { %v3702_v11 = vsel %vm2339_vm1, 1.0, %v6076_v26  ;;  %v2102_v32 = vpop.permute.xlu0 %2101 }
0x10ec   : > { %vm2290_vm3 = vcmp.eq.s32.totalorder %v4502_v49, %v2102_v32  ;;  %4044 = vmatprep.mubr.msk.f32.mxu1 %vm492_vm2, %v3702_v11  ;;  %v5805_v62 = vpop.f32.mrf.mxu1  ;;  %v2785_v11 = vpop.f32.mrf.mxu0 }
0x10ed   : > { %v3653_v2 = vsel %vm2290_vm3, 1.0, %v6076_v26  ;;  %v2105_v7 = vpop.permute.xlu1 %2104  ;;  %6132 = vst [vmem:[#allocation27_spill] sm:$0xff] %v5805_v62  ;;  %vm4244_vm3 = vmmov 0  }
0x10ee   : > { %vm2291_vm4 = vcmp.eq.s32.totalorder %v4502_v49, %v2105_v7  ;;  %3970 = vmatmul.mubr.msk.f32.gmra.mxu0 %vm492_vm2, %v3653_v2  ;;  %v5807_v9 = vpop.f32.mrf.mxu1 }
0x10ef   : > { %v3654_v31 = vsel %vm2291_vm4, 1.0, %v6076_v26  ;;  %v2252_v44 = vpop.permute.xlu0 %2251  ;;  %6133 = vst [vmem:[#allocation29_spill] sm:$0xff] %v5807_v9  ;;  %vm3253_vm4 = vcmask 64512  }
0x10f0   : > { %vm2340_vm5 = vcmp.eq.s32.totalorder %v4502_v49, %v2252_v44  ;;  %3972 = vmatprep.mubr.msk.f32.mxu0 %vm492_vm2, %v3654_v31  ;;  %v5809_v27 = vpop.f32.mrf.mxu1 }
0x10f1   : > { %v3703_v17 = vsel %vm2340_vm5, 1.0, %v6076_v26 }
0x10f2   : > { %4045 = vmatmul.mubr.msk.f32.gmra.mxu1 %vm492_vm2, %v3703_v17  ;;  %v5811_v23 = vpop.f32.mrf.mxu1 }
0x10f3   : > { %v2108_v5 = vpop.permute.xlu0 %2107 }
0x10f4   : > { %vm2292_vm6 = vcmp.eq.s32.totalorder %v4502_v49, %v2108_v5  ;;  %v5813_v59 = vpop.f32.mrf.mxu1 }
0x10f5   : > { %v3655_v63 = vsel %vm2292_vm6, 1.0, %v6076_v26 }
0x10f6   : > { %3973 = vmatmul.mubr.msk.f32.gmra.mxu0 %vm492_vm2, %v3655_v63  ;;  %v5815_v0 = vpop.f32.mrf.mxu1 }
0x10f8   : > { %v4010_v39 = vpop.f32.mrf.mxu1 }
0x10fa   : > { %v2965_v55 = vpop.f32.mrf.mxu1 }
0x10fc   : > { %v5817_v15 = vpop.f32.mrf.mxu1 }
0x10fd   : > { %6134 = vst [vmem:[#allocation25_spill] sm:$0xff] %v5817_v15 }
0x10fe   : > { %v5819_v50 = vpop.f32.mrf.mxu1 }
0x10ff   : > { %6135 = vst [vmem:[#allocation26_spill] sm:$0xff] %v5819_v50 }
0x1100   : > { %v5821_v13 = vpop.f32.mrf.mxu1 }
0x1102   : > { %v5823_v24 = vpop.f32.mrf.mxu1 }
0x1104   : > { %v5825_v30 = vpop.f32.mrf.mxu1 }
0x1106   : > { %v5827_v10 = vpop.f32.mrf.mxu1 }
0x1108   : > { %v5831_v53 = vpop.f32.mrf.mxu1 }
0x110a   : > { %v5835_v45 = vpop.f32.mrf.mxu1 }
0x110c   : > { %v5837_v32 = vpop.f32.mrf.mxu1 }
0x110d   : > { %6136 = vst [vmem:[#allocation7_spill] sm:$0xff] %v5837_v32 }
0x110e   : > { %v5839_v7 = vpop.f32.mrf.mxu1 }
0x110f   : > { %6137 = vst [vmem:[#allocation28_spill] sm:$0xff] %v5839_v7 }
0x1110   : > { %v3959_v2 = vpop.f32.mrf.mxu0  ;;  %v5841_v44 = vpop.f32.mrf.mxu1 }
0x1112   : > { %v2795_v31 = vpop.f32.mrf.mxu0  ;;  %v5843_v5 = vpop.f32.mrf.mxu1 }
0x1118   : > { %v3962_v17 = vpop.f32.mrf.mxu0 }
0x111a   : > { %v2805_v63 = vpop.f32.mrf.mxu0 }
0x1143   : > { %v2258_v51 = vpop.permute.xlu0 %2257 }
0x1144   : > { %vm2342_vm7 = vcmp.eq.s32.totalorder %v4502_v49, %v2258_v51  ;;  %v4031_v51 = vpop.f32.mrf.mxu1 }
0x1145   : > { %v2255_v28 = vpop.permute.xlu1 %2254  ;;  %v3705_v35 = vsel %vm2342_vm7, 1.0, %v6076_v26 }
0x1146   : > { %vm2341_vm8 = vcmp.eq.s32.totalorder %v4502_v49, %v2255_v28 }
0x1147   : > { %v3704_v4 = vsel %vm2341_vm8, 1.0, %v6076_v26  ;;  %v2264_v16 = vpop.permute.xlu0 %2263 }
0x1148   : > { %4047 = vmatprep.mubr.msk.f32.mxu1 %vm492_vm2, %v3704_v4  ;;  %vm2344_vm9 = vcmp.eq.s32.totalorder %v4502_v49, %v2264_v16  ;;  %v3035_v4 = vpop.f32.mrf.mxu1 }
0x1149   : > { %v2261_v29 = vpop.permute.xlu1 %2260  ;;  %4048 = vmatmul.mubr.msk.f32.gmra.mxu1 %vm492_vm2, %v3705_v35  ;;  %v3707_v14 = vsel %vm2344_vm9, 1.0, %v6076_v26 }
0x114a   : > { %vm2343_vm10 = vcmp.eq.s32.totalorder %v4502_v49, %v2261_v29  ;;  %v4034_v35 = vpop.f32.mrf.mxu1 }
0x114b   : > { %v3706_v46 = vsel %vm2343_vm10, 1.0, %v6076_v26  ;;  %v2270_v48 = vpop.permute.xlu0 %2269 }
0x114c   : > { %4050 = vmatprep.mubr.msk.f32.mxu1 %vm492_vm2, %v3706_v46  ;;  %vm2346_vm11 = vcmp.eq.s32.totalorder %v4502_v49, %v2270_v48  ;;  %v3045_v46 = vpop.f32.mrf.mxu1 }
0x114d   : > { %v2267_v6 = vpop.permute.xlu1 %2266  ;;  %4051 = vmatmul.mubr.msk.f32.gmra.mxu1 %vm492_vm2, %v3707_v14  ;;  %v3709_v25 = vsel %vm2346_vm11, 1.0, %v6076_v26 }
0x114e   : > { %vm2345_vm12 = vcmp.eq.s32.totalorder %v4502_v49, %v2267_v6 }
0x114f   : > { %v3708_v36 = vsel %vm2345_vm12, 1.0, %v6076_v26  ;;  %v2276_v21 = vpop.permute.xlu0 %2275 }
0x1150   : > { %4053 = vmatprep.mubr.msk.f32.mxu1 %vm492_vm2, %v3708_v36  ;;  %vm2348_vm13 = vcmp.eq.s32.totalorder %v4502_v49, %v2276_v21 }
0x1151   : > { %v2273_v42 = vpop.permute.xlu1 %2272  ;;  %4054 = vmatmul.mubr.msk.f32.gmra.mxu1 %vm492_vm2, %v3709_v25  ;;  %v3711_v34 = vsel %vm2348_vm13, 1.0, %v6076_v26 }
0x1152   : > { %vm2347_vm14 = vcmp.eq.s32.totalorder %v4502_v49, %v2273_v42 }
0x1153   : > { %v3710_v58 = vsel %vm2347_vm14, 1.0, %v6076_v26  ;;  %v2114_v37 = vpop.permute.xlu0 %2113 }
0x1154   : > { %4056 = vmatprep.mubr.msk.f32.mxu1 %vm492_vm2, %v3710_v58  ;;  %vm2294_vm15 = vcmp.eq.s32.totalorder %v4502_v49, %v2114_v37 }
0x1155   : > { %v2111_v57 = vpop.permute.xlu1 %2110  ;;  %4057 = vmatmul.mubr.msk.f32.gmra.mxu1 %vm492_vm2, %v3711_v34  ;;  %v3657_v56 = vsel %vm2294_vm15, 1.0, %v6076_v26 }
0x1156   : > { %vm2293_vm1 = vcmp.eq.s32.totalorder %v4502_v49, %v2111_v57 }
0x1157   : > { %v3656_v40 = vsel %vm2293_vm1, 1.0, %v6076_v26 }
0x1158   : > { %3975 = vmatprep.mubr.msk.f32.mxu0 %vm492_vm2, %v3656_v40 }
0x1159   : > { %3976 = vmatmul.mubr.msk.f32.gmra.mxu0 %vm492_vm2, %v3657_v56 }
0x119a   : > { %v5849_v14 = vpop.f32.mrf.mxu1 }
0x119b   : > { %6138 = vst [vmem:[#allocation9_spill] sm:$0xff] %v5849_v14 }
0x119c   : > { %v5851_v36 = vpop.f32.mrf.mxu1 }
0x119d   : > { %6139 = vst [vmem:[#allocation6_spill] sm:$0xff] %v5851_v36 }
0x119e   : > { %v5845_v28 = vpop.f32.mrf.mxu0 }
0x11a0   : > { %v5847_v16 = vpop.f32.mrf.mxu0 }
0x11a2   : > { %v5853_v25 = vpop.f32.mrf.mxu1 }
0x11a4   : > { %v5855_v58 = vpop.f32.mrf.mxu1 }
0x11a6   : > { %v3968_v29 = vpop.f32.mrf.mxu0 }
0x11a7   : > { %v3137_v50 = vmax.f32 %v3956_v12, %v3968_v29 }
0x11a8   : > { %v2825_v48 = vpop.f32.mrf.mxu0 }
0x11a9   : > { %v3136_v9 = vmax.f32 %v2785_v11, %v2825_v48  ;;  %v3145_v62 = vmax.f32 %v3137_v50, %v5781_v54  ;;  %v3134_v48 = vmax.f32 %v5833_v3, %v5847_v16 }
0x11aa   : > { %v4043_v57 = vpop.f32.mrf.mxu1 }
0x11ac   : > { %v3075_v7 = vpop.f32.mrf.mxu1 }
0x11ae   : > { %v3971_v6 = vpop.f32.mrf.mxu0 }
0x11af   : > { %v3139_v40 = vmax.f32 %v3959_v2, %v3971_v6 }
0x11b0   : > { %v2835_v21 = vpop.f32.mrf.mxu0 }
0x11b1   : > { %v3138_v26 = vmax.f32 %v2795_v31, %v2835_v21  ;;  %v3147_v14 = vmax.f32 %v3139_v40, %v5785_v41  ;;  %v3144_v31 = vmax.f32 %v3136_v9, %v5783_v52  ;;  %v6140_v40 = vld [vmem:[#allocation27_spill] sm:$0xff] }
0x11b2   : > { %v4046_v36 = vpop.f32.mrf.mxu1 }
0x11b3   : > { %v3146_v15 = vmax.f32 %v3138_v26, %v5787_v47 }
0x11b5   : > { %v3154_v12 = vmax.f32 %v3146_v15, %v5799_v60 }
0x11b6   : > { %v3974_v42 = vpop.f32.mrf.mxu0 }
0x11b7   : > { %v3141_v34 = vmax.f32 %v3962_v17, %v3974_v42  ;;  %v3155_v17 = vmax.f32 %v3147_v14, %v5797_v8  ;;  %v3162_v8 = vmax.f32 %v3154_v12, %v5815_v0  ;;  %v4173_v42 = vld [vmem:[%s4332_s9 + $0x28] sm:$0xff] }
0x11b8   : > { %v2845_v37 = vpop.f32.mrf.mxu0 }
0x11b9   : > { %v3140_v56 = vmax.f32 %v2805_v63, %v2845_v37  ;;  %v3149_v49 = vmax.f32 %v3141_v34, %v3986_v18  ;;  %v3085_v18 = vpop.f32.mrf.mxu1  ;;  %v3163_v26 = vmax.f32 %v3155_v17, %v5813_v59  ;;  %v3170_v9 = vmax.f32 %v3162_v8, %v5827_v10  ;;  %v4174_v34 = vld [vmem:[%s4332_s9 + $0x20] sm:$0xff]  ;;  %v6141_v17 = vld [vmem:[#allocation24_spill] sm:$0xff]  ;;  %v6145_v8 = vld [vmem:[#allocation26_spill] sm:$0xff] }
0x11ba   : > { %v3135_v10 = vmax.f32 %v5829_v20, %v5845_v28 }
0x11bb   : > { %v3148_v32 = vmax.f32 %v3140_v56, %v2885_v38  ;;  %v3157_v19 = vmax.f32 %v3149_v49, %v5801_v22  ;;  %v3153_v38 = vmax.f32 %v3145_v62, %v5793_v43  ;;  %v3152_v49 = vmax.f32 %v3144_v31, %v5795_v61 }
0x11bd   : > { %v3156_v2 = vmax.f32 %v3148_v32, %v5803_v33  ;;  %v3165_v63 = vmax.f32 %v3157_v19, %v4010_v39  ;;  %v3161_v33 = vmax.f32 %v3153_v38, %v5809_v27  ;;  %v3171_v19 = vmax.f32 %v3163_v26, %v5825_v30 }
0x11be   : > { %v3160_v43 = vmax.f32 %v3152_v49, %v5811_v23  ;;  %v3178_v27 = vmax.f32 %v3170_v9, %v3035_v4 }
0x11bf   : > { %v3164_v47 = vmax.f32 %v3156_v2, %v2965_v55  ;;  %v3173_v22 = vmax.f32 %v3165_v63, %v5831_v53  ;;  %v3169_v39 = vmax.f32 %v3161_v33, %v5821_v13  ;;  %v3179_v55 = vmax.f32 %v3171_v19, %v4031_v51  ;;  %v6143_v63 = vld [vmem:[#allocation29_spill] sm:$0xff]  ;;  %v6147_v19 = vld [vmem:[#allocation28_spill] sm:$0xff] }
0x11c0   : > { %v3168_v15 = vmax.f32 %v3160_v43, %v5823_v24  ;;  %v3186_v29 = vmax.f32 %v3178_v27, %v3075_v7  ;;  %v4171_v24 = vld [vmem:[%s4332_s9 + $0x38] sm:$0xff]  ;;  %v6148_v43 = vld [vmem:[#allocation6_spill] sm:$0xff] }
0x11c1   : > { %v3172_v60 = vmax.f32 %v3164_v47, %v5835_v45  ;;  %v3181_v59 = vmax.f32 %v3173_v22, %v4034_v35  ;;  %v3177_v45 = vmax.f32 %v3169_v39, %v5841_v44  ;;  %v3187_v23 = vmax.f32 %v3179_v55, %v4043_v57  ;;  %v6144_v47 = vld [vmem:[#allocation7_spill] sm:$0xff]  ;;  %v4178_v55 = vld [vmem:[%s4332_s9] sm:$0xff] }
0x11c2   : > { %v3176_v13 = vmax.f32 %v3168_v15, %v5843_v5  ;;  %v3247_v15 = vld [vmem:[%s6049_s3] sm:$0xff] }
0x11c3   : > { %v3180_v0 = vmax.f32 %v3172_v60, %v3045_v46  ;;  %v3189_v53 = vmax.f32 %v3181_v59, %v4046_v36  ;;  %v3185_v14 = vmax.f32 %v3177_v45, %v5853_v25  ;;  %v4172_v36 = vld [vmem:[%s4332_s9 + $0x30] sm:$0xff]  ;;  %v4177_v59 = vld [vmem:[%s4332_s9 + $0x8] sm:$0xff] }
0x11c4   : > { %v3184_v7 = vmax.f32 %v3176_v13, %v5855_v58  ;;  %v4175_v58 = vld [vmem:[%s4332_s9 + $0x18] sm:$0xff] }
0x11c5   : > { %v3188_v32 = vmax.f32 %v3180_v0, %v3085_v18  ;;  %v6142_v18 = vld [vmem:[#allocation25_spill] sm:$0xff] }
0x1209   : > { %v5865_v41 = vpop.f32.mrf.mxu1 }
0x120b   : > { %v5870_v54 = vpop.f32.mrf.mxu1 }
0x120d   : > { %v4052_v52 = vpop.f32.mrf.mxu1 }
0x120e   : > { %v3193_v28 = vmax.f32 %v3185_v14, %v4052_v52  ;;  %v6146_v52 = vld [vmem:[#allocation9_spill] sm:$0xff]  ;;  %v3365_v14 = vld [vmem:[%s6050_s4 + $0x68] sm:$0xff] }
0x120f   : > { %v3105_v62 = vpop.f32.mrf.mxu1 }
0x1210   : > { %v3192_v25 = vmax.f32 %v3184_v7, %v3105_v62  ;;  %v3201_v31 = vsub.f32 %v3193_v28, %v4175_v58  ;;  %v3360_v7 = vld [vmem:[%s6050_s4 + $0x40] sm:$0xff]  ;;  %v3358_v28 = vld [vmem:[%s6050_s4 + $0x30] sm:$0xff] }
0x1211   : > { %v4055_v61 = vpop.f32.mrf.mxu1 }
0x1212   : > { %v3195_v35 = vmax.f32 %v3187_v23, %v4055_v61 }
0x1213   : > { %v3115_v50 = vpop.f32.mrf.mxu1 }
0x1214   : > { %v3194_v6 = vmax.f32 %v3186_v29, %v3115_v50  ;;  %v3203_v37 = vsub.f32 %v3195_v35, %v4173_v42  ;;  %v6149_v50 = vmov 0.0  }
0x1215   : > { %v4058_v30 = vpop.f32.mrf.mxu1  ;;  %4075 = vmatprep.mubr.msk.f32.mxu0 %vm4244_vm3, %v6149_v50 }
0x1216   : > { %v3197_v11 = vmax.f32 %v3189_v53, %v4058_v30  ;;  %v3202_v57 = vsub.f32 %v3194_v6, %v4174_v34  ;;  %v3364_v6 = vld [vmem:[%s6050_s4 + $0x60] sm:$0xff] }
0x1217   : > { %v3125_v51 = vpop.f32.mrf.mxu1 }
0x1218   : > { %v3205_v46 = vsub.f32 %v3197_v11, %v4171_v24  ;;  %v3196_v4 = vmax.f32 %v3188_v32, %v3125_v51 }
0x1219   : > { %v3977_v44 = vpop.f32.mrf.mxu0 }
0x121a   : > { %v3204_v21 = vsub.f32 %v3196_v4, %v4172_v36  ;;  %v3143_v20 = vmax.f32 %v3135_v10, %v3977_v44  ;;  %3228 = vrot.lane.b32.xlu1 %v3205_v46, %s4243_s10  ;;  %v3367_v46 = vld [vmem:[%s6050_s4 + $0x78] sm:$0xff]  ;;  %v3366_v44 = vld [vmem:[%s6050_s4 + $0x70] sm:$0xff] }
0x121b   : > { %v2855_v5 = vpop.f32.mrf.mxu0 }
0x121c   : > { %v3151_v3 = vmax.f32 %v3143_v20, %v5789_v1  ;;  %v3142_v16 = vmax.f32 %v3134_v48, %v2855_v5  ;;  %3226 = vrot.lane.b32.xlu0 %v3204_v21, %s4243_s10  ;;  %v4176_v1 = vld [vmem:[%s4332_s9 + $0x10] sm:$0xff]  ;;  %v3246_v48 = vld [vmem:[%s6048_s2] sm:$0xff]  ;;  %v3361_v20 = vld [vmem:[%s6050_s4 + $0x48] sm:$0xff]  ;;  %s3545_s9 = sshll.u32 %s230_s8, 4  ;;  %s3546_s9 = int_to_ptr.vmem [resolvable:$true] %s3545_s9 }
0x121d   : > { %v3200_v26 = vsub.f32 %v3192_v25, %v4176_v1  ;;  %v3362_v21 = vld [vmem:[%s6050_s4 + $0x50] sm:$0xff]  ;;  %v3359_v5 = vld [vmem:[%s6050_s4 + $0x38] sm:$0xff]  ;;  %v3353_v25 = vld [vmem:[%s6050_s4 + $0x8] sm:$0xff]  ;;  %s4179_s14 = scalar_lea.vmem %s3546_s9, 256  ;;  %p4186_p0 = scmp.lt.s32.totalorder %s3546_s9, %s4184_s15 }
0x121e   : > { %v3159_v56 = vmax.f32 %v3151_v3, %v6140_v40  ;;  %v3150_v2 = vmax.f32 %v3142_v16, %v6141_v17  ;;  %3224 = vrot.lane.b32.xlu1 %v3203_v37, %s4243_s10  ;;  %v3356_v37 = vld [vmem:[%s6050_s4 + $0x20] sm:$0xff]  ;;  %v3355_v3 = vld [vmem:[%s6050_s4 + $0x18] sm:$0xff]  ;;  %v3354_v16 = vld [vmem:[%s6050_s4 + $0x10] sm:$0xff]  ;;  %p4180_p11 = scmp.ne.s32.totalorder %s3546_s9, %s4179_s14  ;;  %p4187_p1 = scmp.lt.s32.totalorder %s4185_s16, %s4179_s14 }
0x1220   : > { %v3167_v12 = vmax.f32 %v3159_v56, %v6142_v18  ;;  %v3158_v38 = vmax.f32 %v3150_v2, %v6143_v63  ;;  %3222 = vrot.lane.b32.xlu0 %v3202_v57, %s4243_s10  ;;  %v6150_v18 = vld [vmem:[#allocation5_spill] sm:$0xff]  ;;  %p4181_p12 = pnand %p4180_p11, %p4314_p5  ;;  %p4188_p2 = por %p4187_p1, %p4186_p0 }
0x1221   : > { %v3518_v63 = vcvt.s32.f32 %v6150_v18 }
0x1222   : > { %v3175_v49 = vmax.f32 %v3167_v12, %v6144_v47  ;;  %v3166_v22 = vmax.f32 %v3158_v38, %v6145_v8  ;;  %3220 = vrot.lane.b32.xlu1 %v3201_v31, %s4243_s10  ;;  %v3517_v12 = vadd.s32 128, %v6150_v18  ;;  %p4182_p13 = pneg %p4181_p12 }
0x1224   : > { %v3183_v33 = vmax.f32 %v3175_v49, %v6146_v52  ;;  %v3174_v60 = vmax.f32 %v3166_v22, %v6147_v19  ;;  %3218 = vrot.lane.b32.xlu0 %v3200_v26, %s4243_s10  ;;  %p4189_p3 = pnand %p4188_p2, %p4182_p13 }
0x1226   : > { %v3182_v62 = vmax.f32 %v3174_v60, %v6148_v43  ;;  %v3191_v9 = vmax.f32 %v3183_v33, %v5865_v41 }
0x1228   : > { %v3199_v61 = vsub.f32 %v3191_v9, %v4177_v59  ;;  %v3190_v39 = vmax.f32 %v3182_v62, %v5870_v54 }
0x122a   : > { %3216 = vrot.lane.b32.xlu1 %v3199_v61, %s4243_s10  ;;  %v3198_v0 = vsub.f32 %v3190_v39, %v4178_v55 }
0x122c   : > { %3214 = vrot.lane.b32.xlu0 %v3198_v0, %s4243_s10 }
0x122e   : > { %3250 = vperm.xlu1 %4138, %v3247_v15  }
0x128c   : > { %v3229_v41 = vpop.permute.xlu1 %3228 }
0x128d   : > { %v3245_v27 = vsel %vm256_vm0, %v4171_v24, %v3229_v41 }
0x128e   : > { %4060 = vmatpush3.xpose.msk.msra.mxu0 %vm3253_vm4, %v3245_v27  ;;  %v3227_v54 = vpop.permute.xlu0 %3226 }
0x128f   : > { %4061 = vmatprep.subr.mxu0 %v6149_v50  ;;  %v3244_v53 = vsel %vm256_vm0, %v4172_v36, %v3227_v54  ;;  %v3363_v36 = vld [vmem:[%s6050_s4 + $0x58] sm:$0xff] }
0x1290   : > { %v3225_v30 = vpop.permute.xlu1 %3224 }
0x1291   : > { %v3243_v45 = vsel %vm256_vm0, %v4173_v42, %v3225_v30  ;;  %v3357_v42 = vld [vmem:[%s6050_s4 + $0x28] sm:$0xff] }
0x1292   : > { %4062 = vmatpush3.xpose.msk.msra.mxu0 %vm3253_vm4, %v3244_v53  ;;  %v3223_v23 = vpop.permute.xlu0 %3222 }
0x1293   : > { %4063 = vmatprep.subr.mxu0 %v6149_v50  ;;  %v3242_v11 = vsel %vm256_vm0, %v4174_v34, %v3223_v23  ;;  %v3352_v34 = vld [vmem:[%s6050_s4] sm:$0xff] }
0x1294   : > { %v3221_v32 = vpop.permute.xlu1 %3220 }
0x1295   : > { %v3241_v10 = vsel %vm256_vm0, %v4175_v58, %v3221_v32  ;;  %v3442_v58 = vld [vmem:[%s239_s26] sm:$0xff] }
0x1296   : > { %4064 = vmatpush3.xpose.msk.msra.mxu0 %vm3253_vm4, %v3243_v45  ;;  %v3219_v13 = vpop.permute.xlu0 %3218 }
0x1297   : > { %4065 = vmatprep.subr.mxu0 %v6149_v50  ;;  %v3240_v51 = vsel %vm256_vm0, %v4176_v1, %v3219_v13  ;;  %v3519_v1 = vcvt.s32.f32 %v3517_v12 }
0x129a   : > { %4066 = vmatpush3.xpose.msk.msra.mxu0 %vm3253_vm4, %v3242_v11 }
0x129b   : > { %4067 = vmatprep.subr.mxu0 %v6149_v50 }
0x129c   : > { %v3217_v35 = vpop.permute.xlu1 %3216 }
0x129d   : > { %v3239_v29 = vsel %vm256_vm0, %v4177_v59, %v3217_v35 }
0x129e   : > { %4068 = vmatpush3.xpose.msk.msra.mxu0 %vm3253_vm4, %v3241_v10  ;;  %v3215_v24 = vpop.permute.xlu0 %3214 }
0x129f   : > { %4069 = vmatprep.subr.mxu0 %v6149_v50  ;;  %v3238_v4 = vsel %vm256_vm0, %v4178_v55, %v3215_v24 }
0x12a2   : > { %4070 = vmatpush3.xpose.msk.msra.mxu0 %vm3253_vm4, %v3240_v51 }
0x12a3   : > { %4071 = vmatprep.subr.mxu0 %v6149_v50 }
0x12a6   : > { %4072 = vmatpush3.xpose.msk.msra.mxu0 %vm3253_vm4, %v3239_v29 }
0x12a7   : > { %4073 = vmatprep.subr.mxu0 %v6149_v50 }
0x12a9   : > { %v3251_v57 = vpop.permute.xlu1 %3250 }
0x12aa   : > { %4074 = vmatpush3.xpose.msk.msra.mxu0 %vm3253_vm4, %v3238_v4 }
0x12ab   : > { %3387 = vmatprep.subr.mxu0 %v3367_v46 }
0x12ad   : > { %4076 = vmatmul.mubr.msk.f32.vlgmr.msra.gmra.mxu0 %vm3253_vm4, %v3246_v48 }
0x12ae   : > { %3388 = vmatpush1.msra.mxu0 %v3366_v44  ;;  %3435 = vmatprep.mubr.f32.mxu0 %v6149_v50 }
0x12af   : > { %3389 = vmatprep.subr.mxu0 %v3365_v14 }
0x12b0   : > { %3390 = vmatpush1.msra.mxu0 %v3364_v6 }
0x12b1   : > { %3391 = vmatprep.subr.mxu0 %v3363_v36 }
0x12b2   : > { %3392 = vmatpush1.msra.mxu0 %v3362_v21 }
0x12b3   : > { %3393 = vmatprep.subr.mxu0 %v3361_v20 }
0x12b4   : > { %3394 = vmatpush1.msra.mxu0 %v3360_v7 }
0x12b5   : > { %3395 = vmatprep.subr.mxu0 %v3359_v5 }
0x12b6   : > { %3396 = vmatpush1.msra.mxu0 %v3358_v28 }
0x12b7   : > { %3397 = vmatprep.subr.mxu0 %v3357_v42 }
0x12b8   : > { %3398 = vmatpush1.msra.mxu0 %v3356_v37 }
0x12b9   : > { %3399 = vmatprep.subr.mxu0 %v3355_v3 }
0x12ba   : > { %3400 = vmatpush1.msra.mxu0 %v3354_v16 }
0x12bb   : > { %3401 = vmatprep.subr.mxu0 %v3353_v25 }
0x12bc   : > { %3402 = vmatpush1.msra.mxu0 %v3352_v34 }
0x12bd   : > { %3462 = vmatprep.subr.mxu0 %v3367_v46 }
0x136d   : > { %v3347_v40 = vpop.f32.mrf.mxu0 }
0x136e   : > { %v3348_v56 = vadd.f32 %v3347_v40, %v3251_v57 }
0x136f   : > { %v4077_v17 = vpop.f32.mrf.mxu0 }
0x1370   : > { %v3351_v2 = vmax.f32 %v3348_v56, 0.0 }
0x1372   : > { %3793 = vmatmul.mubr.msk.f32.vlgmr.msra.gmra.mxu0 %vm492_vm2, %v3351_v2 }
0x1373   : > { %3463 = vmatpush1.msra.mxu0 %v3366_v44  ;;  %3510 = vmatprep.mubr.f32.mxu0 %v6149_v50 }
0x1374   : > { %3464 = vmatprep.subr.mxu0 %v3365_v14 }
0x1375   : > { %3465 = vmatpush1.msra.mxu0 %v3364_v6 }
0x1376   : > { %3466 = vmatprep.subr.mxu0 %v3363_v36 }
0x1377   : > { %3467 = vmatpush1.msra.mxu0 %v3362_v21 }
0x1378   : > { %3468 = vmatprep.subr.mxu0 %v3361_v20 }
0x1379   : > { %3469 = vmatpush1.msra.mxu0 %v3360_v7 }
0x137a   : > { %3470 = vmatprep.subr.mxu0 %v3359_v5 }
0x137b   : > { %3471 = vmatpush1.msra.mxu0 %v3358_v28 }
0x137c   : > { %3472 = vmatprep.subr.mxu0 %v3357_v42 }
0x137d   : > { %3473 = vmatpush1.msra.mxu0 %v3356_v37 }
0x137e   : > { %3474 = vmatprep.subr.mxu0 %v3355_v3 }
0x137f   : > { %3475 = vmatpush1.msra.mxu0 %v3354_v16 }
0x1380   : > { %3476 = vmatprep.subr.mxu0 %v3353_v25 }
0x1381   : > { %3477 = vmatpush1.msra.mxu0 %v3352_v34 }
0x1382   : > { %3794 = vmatmul.mubr.msk.f32.vlgmr.msra.gmra.mxu0 %vm492_vm2, %v3442_v58 }
0x1432   : > { %v3437_v31 = vpop.f32.mrf.mxu0 }
0x1434   : > { %v3439_v38 = vpop.f32.mrf.mxu0 }
0x1442   : > { %v3512_v26 = vpop.f32.mrf.mxu0 }
0x1443   : > { %v3520_v47 = vsub.f32 %v3512_v26, %v3518_v63 }
0x1444   : > { %v3514_v49 = vpop.f32.mrf.mxu0 }
0x1445   : > { %v3522_v8 = vand.u32 2147483647, %v3520_v47  ;;  %v3521_v22 = vsub.f32 %v3514_v49, %v3519_v1 }
0x1447   : > { %vm3524_vm0 = vcmp.lt.f32.partialorder %v3522_v8, 0.5  ;;  %v3523_v52 = vand.u32 2147483647, %v3521_v22 }
0x1448   : > { %v3526_v33 = vsel %vm3524_vm0, %v3437_v31, 0.0 }
0x1449   : > { %3528 = vst [vmem:[%s230_s8] sm:$0xff] %v3526_v33  ;;  %vm3525_vm2 = vcmp.lt.f32.partialorder %v3523_v52, 0.5 }
0x144a   : > { %v3527_v19 = vsel %vm3525_vm2, %v3439_v38, 0.0 }
0x144b   : > { %3529 = vst [vmem:[%s230_s8 + $0x8] sm:$0xff] %v3527_v19 }
0x144c   : > { %4192 = shalt.err (!%p4189_p3)
}
0x144d   : > { %s4193_s17 = scalar_lea.hbm %s6011_s12, 256  ;;  %s4197_s26 = scalar_lea.hbm %s6051_s5, 512 }
0x144e   : > { %p4194_p4 = scmp.ne.s32.totalorder %s6011_s12, %s4193_s17  ;;  %p4198_p9 = scmp.lt.s32.totalorder %s6011_s12, %s6051_s5 }
0x144f   : > { %p4199_p10 = scmp.lt.s32.totalorder %s4197_s26, %s4193_s17 }
0x1450   : > { %p4195_p7 = pnand %p4194_p4, %p4314_p5 }
0x1451   : > { %p4200_p11 = por %p4199_p10, %p4198_p9 }
0x1452   : > { %p4196_p8 = pneg %p4195_p7 }
0x1454   : > { %p4201_p12 = pnand %p4200_p11, %p4196_p8 }
0x1456   : > { %4204 = shalt.err (!%p4201_p12)
}
0x1457   : > { %4094 = dma.vmem_to_hbm [thread:$0]  (%p4314_p5), %s3546_s9, 256, %s6011_s12, %s3531_s13  }
0x1458 PF: > { %p4100_p13 = scmp.ge.s32.totalorder %s4239_s21, 2  ;;  %s3557_s7 = sand.u32 1, %s4227_s18  }
0x1459   : > { %s3558_s8 = scalar_lea.sflag [#allocation3], %s3557_s7 }
0x145a   : > { %p4097_p0 = pnand %p4100_p13, %p4318_p6 }
0x145c   : > { %p4098_p1 = pneg %p4097_p0 }
0x145e   : > { %4222 = dma.done.wait (%p4098_p1), %s3558_s8, 256  }
0x145f   : > { %4224 = vsyncadd (%p4098_p1), %s3558_s8, 4294967040  ;;  %p15_p2 = scmp.ge.s32.totalorder %s4301_s24, 4   ;;  %s6151_s18 = smov %s4231_s19 }
0x1460   : > { %s6152_s19 = smov %s4235_s20  ;;  %s6153_s20 = smov %s4312_s27 }
0x1461   : > { %s6154_s21 = smov %s4301_s24  ;;  %17 = sbr.rel (!%p15_p2) target bundleno = 3 (0x3), region = 78 }
0x1466   :  { %3563 = vsyncpa [#allocation3], 1 }
0x1467   :  { %3565 = vsyncpa [#allocation3 + $0x1], 1 }

</bundles_post_ra>
